<compile_context>
chip_gen: v5e
topology: v5e:2x2
jax: 0.10.0
libtpu: 0.0.40
codegen_flags: <defaults>
</compile_context>

<pallas_src>
import functools
import math

import jax
import jax.numpy as jnp
from jax.experimental import pallas as pl
from jax.experimental.pallas import tpu as pltpu


_SQRT_2_OVER_PI = 0.7978845608028654
_INV_SQRT2 = 0.7071067811865476


def _gelu_f32(x, approximate=True):
    # tanh-approx GELU (EUP) by default; exact erf (VALU polynomial) optional.
    if approximate:
        return 0.5 * x * (1.0 + jnp.tanh(_SQRT_2_OVER_PI * (x + 0.044715 * x * x * x)))
    return 0.5 * x * (1.0 + jax.lax.erf(x * _INV_SQRT2))


def _round_up(x, m):
    return ((x + m - 1) // m) * m


def _pick_tile_m(n):
    # Largest of 512/256/128 that still yields >= 2 M tiles (megacore on v7x,
    # higher arithmetic intensity on v6e); fall back to a single 128-row tile.
    n128 = _round_up(max(n, 1), 128)
    for c in (512, 256, 128):
        if n128 >= 2 * c:
            return c
    return 128


def _pick_k_tile(h_dim, d_out):
    # Largest divisor of h_dim from {512,256,128} whose double-buffered
    # (k_tile x d_out) bf16 W1 block stays under ~8 MiB (v7x-safe).
    for c in (512, 256, 128):
        if h_dim % c == 0 and 2 * c * d_out * 2 <= (8 << 20):
            return c
    for c in (512, 256, 128):
        if h_dim % c == 0:
            return c
    return h_dim


def _vmem_capacity_bytes():
    try:
        info = pltpu.get_tpu_info()
        cap = getattr(info, "vmem_capacity_bytes", None)
        if cap:
            return int(cap)
    except Exception:
        pass
    return 64 << 20  # conservative: v7x per-TensorCore VMEM


def _vmem_limit(need_bytes, cap):
    hi = int(0.85 * cap)  # ~52 MiB on 64-MiB v7x, ~108 MiB on 128-MiB v5e/v6e
    return int(min(hi, max(32 << 20, int(need_bytes) + (4 << 20))))


# ----------------------------------------------------------------------------
# Kernel 1 (fast path): weight-resident full-depth MLP.
#   grid = (M tiles,), all weights/biases resident via constant index_maps.
#   No HBM round trip for any intermediate; no per-M-tile weight re-stream.
# ----------------------------------------------------------------------------
def _resident_mlp_kernel(*refs, depth, approximate_gelu):
    x_ref = refs[0]
    o_ref = refs[-1]
    wb = refs[1:-1]  # w0, b0, w1, b1, ...
    y = jnp.dot(x_ref[...], wb[0][...], preferred_element_type=jnp.float32)
    y = y + wb[1][...]
    for i in range(1, depth):
        h = _gelu_f32(y, approximate_gelu).astype(wb[2 * i].dtype)
        y = jnp.dot(h, wb[2 * i][...], preferred_element_type=jnp.float32)
        y = y + wb[2 * i + 1][...]
    o_ref[...] = y.astype(o_ref.dtype)


def _resident_mlp(x, weights, biases, *, tile_m, out_dtype, approximate_gelu,
                  vmem_cap):
    n, d0 = x.shape
    depth = len(weights)
    d_out = weights[-1].shape[1]
    assert n % tile_m == 0

    in_specs = [pl.BlockSpec((tile_m, d0), lambda i: (i, 0))]
    args = [x]
    for w, b in zip(weights, biases):
        in_specs.append(pl.BlockSpec(w.shape, lambda i: (0, 0)))  # resident
        in_specs.append(pl.BlockSpec(b.shape, lambda i: (0, 0)))  # resident
        args.extend([w, b])

    out_itemsize = jnp.dtype(out_dtype).itemsize
    wbytes = sum(w.size * 2 + b.size * 4 for w, b in zip(weights, biases))
    need = (2 * (wbytes + tile_m * d0 * 2 + tile_m * d_out * out_itemsize)
            + 2 * tile_m * max(w.shape[1] for w in weights) * 4)

    flops = 2 * n * sum(int(w.shape[0]) * int(w.shape[1]) for w in weights)
    transcend = n * sum(int(w.shape[1]) for w in weights[:-1]) if depth > 1 else 0
    bytes_accessed = int(n * d0 * 2 + wbytes + n * d_out * out_itemsize)

    kernel = functools.partial(_resident_mlp_kernel, depth=depth,
                               approximate_gelu=approximate_gelu)
    return pl.pallas_call(
        kernel,
        out_shape=jax.ShapeDtypeStruct((n, d_out), out_dtype),
        grid_spec=pltpu.PrefetchScalarGridSpec(
            num_scalar_prefetch=0,
            grid=(n // tile_m,),
            in_specs=in_specs,
            out_specs=pl.BlockSpec((tile_m, d_out), lambda i: (i, 0)),
        ),
        compiler_params=pltpu.CompilerParams(
            dimension_semantics=("parallel",),
            vmem_limit_bytes=_vmem_limit(need, vmem_cap),
        ),
        cost_estimate=pl.CostEstimate(flops=int(flops), transcendentals=int(transcend),
                                      bytes_accessed=bytes_accessed),
    )(*args)


def _fits_resident(tile_m, d0, weights, biases, out_dtype, vmem_cap):
    wbytes = sum(w.size * 2 + b.size * 4 for w, b in zip(weights, biases))
    d_out = weights[-1].shape[1]
    h_max = max(w.shape[1] for w in weights)
    out_bytes = tile_m * d_out * jnp.dtype(out_dtype).itemsize
    need = (2 * (wbytes + tile_m * d0 * 2 + out_bytes)
            + 2 * tile_m * h_max * 4 + (6 << 20))
    return need <= int(0.80 * vmem_cap)


# ----------------------------------------------------------------------------
# Kernel 2 (streamed fallback): fused Linear -> GELU -> Linear, K-tiled over
# the intermediate hidden dim H. acc initialised with the output bias.
# ----------------------------------------------------------------------------
def _fused_pair_kernel(x_ref, w0_ref, b0_ref, w1_ref, b1_ref, o_ref, acc_ref, *,
                       approximate_gelu):
    k = pl.program_id(1)

    @pl.when(k == 0)
    def _():
        acc_ref[...] = jnp.broadcast_to(b1_ref[...], acc_ref.shape)

    h = jnp.dot(x_ref[...], w0_ref[...], preferred_element_type=jnp.float32)
    h = _gelu_f32(h + b0_ref[...], approximate_gelu)
    acc_ref[...] += jnp.dot(h.astype(w1_ref.dtype), w1_ref[...],
                            preferred_element_type=jnp.float32)

    @pl.when(k == pl.num_programs(1) - 1)
    def _():
        o_ref[...] = acc_ref[...].astype(o_ref.dtype)


def _fused_pair_streamed(x, w0, b0, w1, b1, *, tile_m, k_tile, out_dtype,
                         approximate_gelu, vmem_cap):
    n, d0 = x.shape
    h_dim = w0.shape[1]
    d_out = w1.shape[1]
    if k_tile is None or h_dim % k_tile != 0:
        k_tile = _pick_k_tile(h_dim, d_out)
    assert n % tile_m == 0 and h_dim % k_tile == 0

    out_itemsize = jnp.dtype(out_dtype).itemsize
    need = (2 * tile_m * d0 * 2 + 2 * d0 * k_tile * 2 + 2 * k_tile * 4
            + 2 * k_tile * d_out * 2 + 2 * d_out * 4
            + 2 * tile_m * d_out * out_itemsize + tile_m * d_out * 4)

    m_tiles = n // tile_m
    flops = 2 * n * (d0 * h_dim + h_dim * d_out)
    bytes_accessed = int(n * d0 * 2 + m_tiles * (d0 * h_dim + h_dim * d_out) * 2
                         + n * d_out * out_itemsize)

    kernel = functools.partial(_fused_pair_kernel, approximate_gelu=approximate_gelu)
    return pl.pallas_call(
        kernel,
        out_shape=jax.ShapeDtypeStruct((n, d_out), out_dtype),
        grid_spec=pltpu.PrefetchScalarGridSpec(
            num_scalar_prefetch=0,
            grid=(n // tile_m, h_dim // k_tile),
            in_specs=[
                pl.BlockSpec((tile_m, d0), lambda i, k: (i, 0)),     # x rows
                pl.BlockSpec((d0, k_tile), lambda i, k: (0, k)),     # W0 col tile
                pl.BlockSpec((1, k_tile), lambda i, k: (0, k)),      # b0 tile
                pl.BlockSpec((k_tile, d_out), lambda i, k: (k, 0)),  # W1 row tile
                pl.BlockSpec((1, d_out), lambda i, k: (0, 0)),       # b1
            ],
            out_specs=pl.BlockSpec((tile_m, d_out), lambda i, k: (i, 0)),
            scratch_shapes=[pltpu.VMEM((tile_m, d_out), jnp.float32)],
        ),
        compiler_params=pltpu.CompilerParams(
            dimension_semantics=("parallel", "arbitrary"),
            vmem_limit_bytes=_vmem_limit(need, vmem_cap),
        ),
        cost_estimate=pl.CostEstimate(flops=int(flops), transcendentals=int(n * h_dim),
                                      bytes_accessed=bytes_accessed),
    )(x, w0, b0, w1, b1)


# ----------------------------------------------------------------------------
# Kernel 3 (streamed fallback): (optional GELU ->) Linear with K-reduction axis.
# ----------------------------------------------------------------------------
def _single_layer_kernel(x_ref, w_ref, b_ref, o_ref, acc_ref, *,
                         gelu_on_input, approximate_gelu):
    k = pl.program_id(1)

    @pl.when(k == 0)
    def _():
        acc_ref[...] = jnp.broadcast_to(b_ref[...], acc_ref.shape)

    xk = x_ref[...]
    if gelu_on_input:
        xk = _gelu_f32(xk.astype(jnp.float32), approximate_gelu).astype(x_ref.dtype)
    acc_ref[...] += jnp.dot(xk, w_ref[...], preferred_element_type=jnp.float32)

    @pl.when(k == pl.num_programs(1) - 1)
    def _():
        o_ref[...] = acc_ref[...].astype(o_ref.dtype)


def _single_layer_streamed(x, w, b, *, gelu_on_input, tile_m, k_tile, out_dtype,
                           approximate_gelu, vmem_cap):
    n, d_in = x.shape
    d_out = w.shape[1]
    if k_tile is None or d_in % k_tile != 0:
        k_tile = _pick_k_tile(d_in, d_out)
    assert n % tile_m == 0 and d_in % k_tile == 0

    out_itemsize = jnp.dtype(out_dtype).itemsize
    need = (2 * tile_m * k_tile * 2 + 2 * k_tile * d_out * 2 + 2 * d_out * 4
            + 2 * tile_m * d_out * out_itemsize + tile_m * d_out * 4)

    m_tiles = n // tile_m
    flops = 2 * n * d_in * d_out
    bytes_accessed = int(n * d_in * 2 + m_tiles * d_in * d_out * 2
                         + n * d_out * out_itemsize)

    kernel = functools.partial(_single_layer_kernel, gelu_on_input=gelu_on_input,
                               approximate_gelu=approximate_gelu)
    return pl.pallas_call(
        kernel,
        out_shape=jax.ShapeDtypeStruct((n, d_out), out_dtype),
        grid_spec=pltpu.PrefetchScalarGridSpec(
            num_scalar_prefetch=0,
            grid=(n // tile_m, d_in // k_tile),
            in_specs=[
                pl.BlockSpec((tile_m, k_tile), lambda i, k: (i, k)),
                pl.BlockSpec((k_tile, d_out), lambda i, k: (k, 0)),
                pl.BlockSpec((1, d_out), lambda i, k: (0, 0)),
            ],
            out_specs=pl.BlockSpec((tile_m, d_out), lambda i, k: (i, 0)),
            scratch_shapes=[pltpu.VMEM((tile_m, d_out), jnp.float32)],
        ),
        compiler_params=pltpu.CompilerParams(
            dimension_semantics=("parallel", "arbitrary"),
            vmem_limit_bytes=_vmem_limit(need, vmem_cap),
        ),
        cost_estimate=pl.CostEstimate(
            flops=int(flops),
            transcendentals=int(n * d_in) if gelu_on_input else 0,
            bytes_accessed=bytes_accessed),
    )(x, w, b)


# ----------------------------------------------------------------------------
# Parameter init (mirrors _initialize_weights with use_mm_projector == False:
# xavier_uniform weights, zero biases). Weights stored [d_in, d_out] bf16.
# ----------------------------------------------------------------------------
def build_projector_params(key, text_hidden, llm_hidden, mlp_depth):
    weights, biases = [], []
    dims_in = [text_hidden] + [llm_hidden] * (mlp_depth - 1)
    for din in dims_in:
        key, sub = jax.random.split(key)
        bound = math.sqrt(6.0 / (din + llm_hidden))
        w = jax.random.uniform(sub, (din, llm_hidden), dtype=jnp.float32,
                               minval=-bound, maxval=bound)
        weights.append(w.astype(jnp.bfloat16))
        biases.append(jnp.zeros((1, llm_hidden), dtype=jnp.float32))
    return weights, biases


# ----------------------------------------------------------------------------
# Projector forward: fused_feature [B, S, text_hidden] -> [B, S, llm_hidden]
# ----------------------------------------------------------------------------
def visual_projector_forward(fused_feature, weights, biases, *,
                             tile_m=None, k_tile=None, out_dtype=jnp.bfloat16,
                             approximate_gelu=True, force_streamed=False):
    b, s, d0 = fused_feature.shape
    n = b * s
    x = fused_feature.reshape(n, d0).astype(jnp.bfloat16)

    if tile_m is None:
        tile_m = _pick_tile_m(n)
    n_pad = _round_up(max(n, 1), tile_m)
    if n_pad != n:
        # TODO(synk): for very large N, switch to a masked last tile instead of
        # materializing a padded copy of x; padding is cheap in the projector
        # regime (N = batch * visual tokens).
        x = jnp.pad(x, ((0, n_pad - n), (0, 0)))

    vmem_cap = _vmem_capacity_bytes()
    depth = len(weights)
    d_out = weights[-1].shape[1]

    if (not force_streamed) and _fits_resident(tile_m, d0, weights, biases,
                                               out_dtype, vmem_cap):
        y = _resident_mlp(x, weights, biases, tile_m=tile_m, out_dtype=out_dtype,
                          approximate_gelu=approximate_gelu, vmem_cap=vmem_cap)
    else:
        if depth == 1:
            y = _single_layer_streamed(x, weights[0], biases[0], gelu_on_input=False,
                                       tile_m=tile_m, k_tile=k_tile,
                                       out_dtype=out_dtype,
                                       approximate_gelu=approximate_gelu,
                                       vmem_cap=vmem_cap)
        else:
            y = _fused_pair_streamed(x, weights[0], biases[0], weights[1], biases[1],
                                     tile_m=tile_m, k_tile=k_tile,
                                     out_dtype=out_dtype if depth == 2 else jnp.bfloat16,
                                     approximate_gelu=approximate_gelu,
                                     vmem_cap=vmem_cap)
            # TODO(synk): pairwise-fuse the tail layers in the (rare) huge-weight
            # streamed path; per-layer HBM round trips of the bf16 intermediate
            # remain only here.
            for i in range(2, depth):
                last = i == depth - 1
                y = _single_layer_streamed(y, weights[i], biases[i],
                                           gelu_on_input=True, tile_m=tile_m,
                                           k_tile=k_tile,
                                           out_dtype=out_dtype if last else jnp.bfloat16,
                                           approximate_gelu=approximate_gelu,
                                           vmem_cap=vmem_cap)

    return y[:n].reshape(b, s, d_out)


# ----------------------------------------------------------------------------
# Plain-JAX reference (same GELU, bf16 matmul inputs, f32 accumulation)
# ----------------------------------------------------------------------------
def _reference(fused_feature, weights, biases, out_dtype=jnp.bfloat16,
               approximate_gelu=True):
    b, s, d0 = fused_feature.shape
    x = fused_feature.reshape(b * s, d0).astype(jnp.bfloat16)
    y = jnp.dot(x, weights[0], preferred_element_type=jnp.float32) + biases[0]
    for i in range(1, len(weights)):
        h = _gelu_f32(y, approximate_gelu).astype(jnp.bfloat16)
        y = jnp.dot(h, weights[i], preferred_element_type=jnp.float32) + biases[i]
    return y.astype(out_dtype).reshape(b, s, weights[-1].shape[1])


if __name__ == "__main__":
    # Small but lane-aligned shapes consistent with the module:
    #   batch=2, visual seq len=8, text_hidden=256, LLM_hidden=512
    B, S = 2, 8
    TEXT_HIDDEN = 256
    LLM_HIDDEN = 512

    key = jax.random.PRNGKey(0)
    k_feat, k_p2, k_p3 = jax.random.split(key, 3)

    # Simulated ViT last_hidden_state ("fused_feature")
    fused_feature = jax.random.normal(k_feat, (B, S, TEXT_HIDDEN), dtype=jnp.float32)

    # mlp_depth = 2 (Linear -> GELU -> Linear): weight-resident fused path.
    w2, b2 = build_projector_params(k_p2, TEXT_HIDDEN, LLM_HIDDEN, 2)
    out2 = visual_projector_forward(fused_feature, w2, b2)
    out2 = jax.block_until_ready(out2)
    ref2 = _reference(fused_feature, w2, b2)
    assert out2.shape == (B, S, LLM_HIDDEN)
    assert out2.dtype == jnp.bfloat16
    assert jnp.allclose(out2.astype(jnp.float32), ref2.astype(jnp.float32),
                        atol=2e-2, rtol=2e-2), "depth-2 mismatch vs reference"

    # mlp_depth = 3, forced onto the streamed (K-tiled) path to exercise the
    # accumulation kernels (k_tile=256 -> 2 reduction steps over H=512).
    w3, b3 = build_projector_params(k_p3, TEXT_HIDDEN, LLM_HIDDEN, 3)
    out3 = visual_projector_forward(fused_feature, w3, b3, k_tile=256,
                                    force_streamed=True)
    out3 = jax.block_until_ready(out3)
    ref3 = _reference(fused_feature, w3, b3)
    assert out3.shape == (B, S, LLM_HIDDEN)
    assert jnp.allclose(out3.astype(jnp.float32), ref3.astype(jnp.float32),
                        atol=2e-2, rtol=2e-2), "depth-3 mismatch vs reference"

    # depth-3 resident path must agree with the streamed path
    out3r = jax.block_until_ready(visual_projector_forward(fused_feature, w3, b3))
    assert jnp.allclose(out3r.astype(jnp.float32), ref3.astype(jnp.float32),
                        atol=2e-2, rtol=2e-2), "depth-3 resident mismatch"

    print("KERNEL_OK")
</pallas_src>

<mosaic_0001>
module attributes {stable_mosaic.version = 11 : i64} {
  func.func @_resident_mlp_kernel(%arg0: i32, %arg1: memref<128x256xbf16, #tpu.memory_space<vmem>>, %arg2: memref<256x512xbf16, #tpu.memory_space<vmem>>, %arg3: memref<1x512xf32, #tpu.memory_space<vmem>>, %arg4: memref<512x512xbf16, #tpu.memory_space<vmem>>, %arg5: memref<1x512xf32, #tpu.memory_space<vmem>>, %arg6: memref<128x512xbf16, #tpu.memory_space<vmem>>) attributes {dimension_semantics = [#tpu.dimension_semantics<parallel>], iteration_bounds = array<i64: 1>, scalar_prefetch = 0 : i64, scratch_operands = 0 : i64, tpu.core_type = #tpu.core_type<tc>, window_params = [{transform_indices = @transform_0, window_bounds = array<i64: 128, 256>}, {pipeline_mode = #tpu.pipeline_mode<synchronous>, transform_indices = @transform_1, window_bounds = array<i64: 256, 512>}, {pipeline_mode = #tpu.pipeline_mode<synchronous>, transform_indices = @transform_2, window_bounds = array<i64: 1, 512>}, {pipeline_mode = #tpu.pipeline_mode<synchronous>, transform_indices = @transform_3, window_bounds = array<i64: 512, 512>}, {pipeline_mode = #tpu.pipeline_mode<synchronous>, transform_indices = @transform_4, window_bounds = array<i64: 1, 512>}, {transform_indices = @transform_5, window_bounds = array<i64: 128, 512>}]} {
    %c0 = arith.constant 0 : index
    %c0_0 = arith.constant 0 : index
    %0 = vector.load %arg1[%c0, %c0_0] : memref<128x256xbf16, #tpu.memory_space<vmem>>, vector<128x256xbf16>
    %c0_1 = arith.constant 0 : index
    %c0_2 = arith.constant 0 : index
    %1 = vector.load %arg2[%c0_1, %c0_2] : memref<256x512xbf16, #tpu.memory_space<vmem>>, vector<256x512xbf16>
    %cst = arith.constant dense<0.000000e+00> : vector<128x512xf32>
    %2 = tpu.matmul %0, %1, %cst {dimension_numbers = #tpu.dot_dimension_numbers<[1], [0], [0], [1], [0, 0, 1, 1], [], []>} : vector<128x256xbf16>, vector<256x512xbf16>, vector<128x512xf32> -> vector<128x512xf32>
    %c0_3 = arith.constant 0 : index
    %c0_4 = arith.constant 0 : index
    %3 = vector.load %arg3[%c0_3, %c0_4] : memref<1x512xf32, #tpu.memory_space<vmem>>, vector<1x512xf32>
    %4 = vector.broadcast %3 : vector<1x512xf32> to vector<128x512xf32>
    %5 = arith.addf %2, %4 : vector<128x512xf32>
    %cst_5 = arith.constant 5.000000e-01 : f32
    %6 = vector.broadcast %cst_5 : f32 to vector<128x512xf32>
    %7 = arith.mulf %6, %5 : vector<128x512xf32>
    %cst_6 = arith.constant 4.471500e-02 : f32
    %8 = vector.broadcast %cst_6 : f32 to vector<128x512xf32>
    %9 = arith.mulf %8, %5 : vector<128x512xf32>
    %10 = arith.mulf %9, %5 : vector<128x512xf32>
    %11 = arith.mulf %10, %5 : vector<128x512xf32>
    %12 = arith.addf %5, %11 : vector<128x512xf32>
    %cst_7 = arith.constant 0.797884583 : f32
    %13 = vector.broadcast %cst_7 : f32 to vector<128x512xf32>
    %14 = arith.mulf %13, %12 : vector<128x512xf32>
    %15 = math.tanh %14 : vector<128x512xf32>
    %cst_8 = arith.constant 1.000000e+00 : f32
    %16 = vector.broadcast %cst_8 : f32 to vector<128x512xf32>
    %17 = arith.addf %16, %15 : vector<128x512xf32>
    %18 = arith.mulf %7, %17 : vector<128x512xf32>
    %19 = arith.truncf %18 : vector<128x512xf32> to vector<128x512xbf16>
    %c0_9 = arith.constant 0 : index
    %c0_10 = arith.constant 0 : index
    %20 = vector.load %arg4[%c0_9, %c0_10] : memref<512x512xbf16, #tpu.memory_space<vmem>>, vector<512x512xbf16>
    %cst_11 = arith.constant dense<0.000000e+00> : vector<128x512xf32>
    %21 = tpu.matmul %19, %20, %cst_11 {dimension_numbers = #tpu.dot_dimension_numbers<[1], [0], [0], [1], [0, 0, 1, 1], [], []>} : vector<128x512xbf16>, vector<512x512xbf16>, vector<128x512xf32> -> vector<128x512xf32>
    %c0_12 = arith.constant 0 : index
    %c0_13 = arith.constant 0 : index
    %22 = vector.load %arg5[%c0_12, %c0_13] : memref<1x512xf32, #tpu.memory_space<vmem>>, vector<1x512xf32>
    %23 = vector.broadcast %22 : vector<1x512xf32> to vector<128x512xf32>
    %24 = arith.addf %21, %23 : vector<128x512xf32>
    %25 = arith.truncf %24 : vector<128x512xf32> to vector<128x512xbf16>
    %c0_14 = arith.constant 0 : index
    %c0_15 = arith.constant 0 : index
    %26 = vector.load %arg6[%c0_14, %c0_15] : memref<128x512xbf16, #tpu.memory_space<vmem>>, vector<128x512xbf16>
    tpu.vector_store %arg6[%c0_14, %c0_15], %25 {strides = array<i32>} : memref<128x512xbf16, #tpu.memory_space<vmem>>, vector<128x512xbf16>,
    return
  }
  func.func @transform_0(%arg0: i32) -> (i32, i32) {
    %c0_i32 = arith.constant 0 : i32
    %c0_i32_0 = arith.constant 0 : i32
    return %arg0, %c0_i32 : i32, i32
  }
  func.func @transform_1(%arg0: i32) -> (i32, i32) {
    %c0_i32 = arith.constant 0 : i32
    %c0_i32_0 = arith.constant 0 : i32
    %c0_i32_1 = arith.constant 0 : i32
    return %c0_i32, %c0_i32_0 : i32, i32
  }
  func.func @transform_2(%arg0: i32) -> (i32, i32) {
    %c0_i32 = arith.constant 0 : i32
    %c0_i32_0 = arith.constant 0 : i32
    %c0_i32_1 = arith.constant 0 : i32
    return %c0_i32, %c0_i32_0 : i32, i32
  }
  func.func @transform_3(%arg0: i32) -> (i32, i32) {
    %c0_i32 = arith.constant 0 : i32
    %c0_i32_0 = arith.constant 0 : i32
    %c0_i32_1 = arith.constant 0 : i32
    return %c0_i32, %c0_i32_0 : i32, i32
  }
  func.func @transform_4(%arg0: i32) -> (i32, i32) {
    %c0_i32 = arith.constant 0 : i32
    %c0_i32_0 = arith.constant 0 : i32
    %c0_i32_1 = arith.constant 0 : i32
    return %c0_i32, %c0_i32_0 : i32, i32
  }
  func.func @transform_5(%arg0: i32) -> (i32, i32) {
    %c0_i32 = arith.constant 0 : i32
    %c0_i32_0 = arith.constant 0 : i32
    return %arg0, %c0_i32 : i32, i32
  }
}

</mosaic_0001>

<bundles_post_ra>
// kernel: tpu_custom_call.1
= control target key start
LH: loop header
LB: loop body
LE: loop exit
PB: predicated region body
PF: predicated region fallthrough
CT: control target
= control target key end

     0   :  { %10 = vsyncpa [#allocation3], 0  ;;  %s5811_s0 = inlined_call_operand.hbm [shape: bf16[128,256], index: 0, kind: input, shape index: {}]   ;;  %s5812_s1 = inlined_call_operand.hbm [shape: bf16[256,512], index: 1, kind: input, shape index: {}]   ;;  %s5813_s2 = inlined_call_operand.hbm [shape: f32[1,512], index: 2, kind: input, shape index: {}]   ;;  %s5814_s3 = inlined_call_operand.hbm [shape: bf16[512,512], index: 3, kind: input, shape index: {}]   ;;  %s5815_s4 = inlined_call_operand.hbm [shape: f32[1,512], index: 4, kind: input, shape index: {}]   ;;  %s5816_s5 = inlined_call_operand.hbm [shape: bf16[128,512], index: 5, kind: output, shape index: {}]  }
   0x1   :  { %11 = vsyncpa [#allocation6], 0 }
   0x2   :  { %12 = vsyncpa [#allocation9], 0  ;;  %s31_s20 = sshll.u32 %s5812_s1, 4  ;;  %s32_s20 = int_to_ptr.hbm [resolvable:$true] %s31_s20 }
   0x3   :  { %13 = vsyncpa [#allocation4], 0  ;;  %s4564_s21 = smov [#allocation5]   ;;  %s55_s25 = sshll.u32 %s5814_s3, 4  ;;  %s56_s25 = int_to_ptr.hbm [resolvable:$true] %s55_s25 }
   0x4   :  { %s33_s22 = sshll.u32 %s4564_s21, 4  ;;  %s4565_s26 = smov 256   ;;  %s34_s22 = int_to_ptr.vmem [resolvable:$true] %s33_s22 }
   0x5   :  { %s4566_s27 = smov 16   ;;  %s4567_s28 = smov [#allocation8]  }
   0x6   :  { %39 = dma.hbm_to_vmem [thread:$0]  %s32_s20, 8192, %s34_s22, [#allocation6], %s4565_s26, %s4565_s26, %s4566_s27  }
   0x7   :  { %s57_s29 = sshll.u32 %s4567_s28, 4  ;;  %s18_s6 = sshll.u32 %s5811_s0, 4  ;;  %s58_s29 = int_to_ptr.vmem [resolvable:$true] %s57_s29  ;;  %s19_s6 = int_to_ptr.hbm [resolvable:$true] %s18_s6 }
   0x8   :  { %63 = dma.hbm_to_vmem [thread:$0]  %s56_s25, 16384, %s58_s29, [#allocation9], %s4565_s26, %s4565_s26, %s4566_s27  }
   0x9   :  { %s4568_s3 = smov [#allocation2]   ;;  %s45_s10 = sshll.u32 %s5813_s2, 4  ;;  %s46_s10 = int_to_ptr.hbm [resolvable:$true] %s45_s10 }
   0xa   :  { %s20_s7 = sshll.u32 %s4568_s3, 4  ;;  %s4569_s11 = smov 128   ;;  %s21_s7 = int_to_ptr.vmem [resolvable:$true] %s20_s7 }
   0xb   :  { %s4570_s12 = smov 8   ;;  %s4571_s13 = smov [#allocation7]  }
   0xc   :  { %26 = dma.hbm_to_vmem [thread:$0]  %s19_s6, 2048, %s21_s7, [#allocation3], %s4569_s11, %s4569_s11, %s4570_s12  }
   0xd   :  { %s47_s14 = sshll.u32 %s4571_s13, 4  ;;  %s69_s16 = sshll.u32 %s5815_s4, 4  ;;  %s48_s14 = int_to_ptr.vmem [resolvable:$true] %s47_s14  ;;  %s70_s16 = int_to_ptr.hbm [resolvable:$true] %s69_s16 }
   0xe   :  { %50 = dma.hbm_to_vmem [thread:$0]  %s46_s10, 64, %s48_s14, [#allocation6]  }
   0xf   :  { %s4572_s17 = smov [#allocation10]  }
  0x10   :  { %s71_s18 = sshll.u32 %s4572_s17, 4  ;;  %s72_s18 = int_to_ptr.vmem [resolvable:$true] %s71_s18 }
  0x11   :  { %74 = dma.hbm_to_vmem [thread:$0]  %s70_s16, 64, %s72_s18, [#allocation9]  }
  0x12   :  { %4556 = dma.done.wait [#allocation3], 2048  }
  0x13   :  { %4557 = vsyncadd [#allocation3], 4294965248 }
  0x14   :  { %4558 = dma.done.wait [#allocation6], 8256  }
  0x15   :  { %4559 = vsyncadd [#allocation6], 4294959040 }
  0x16   :  { %4560 = dma.done.wait [#allocation9], 16448  }
  0x17   :  { %4561 = vsyncadd [#allocation9], 4294950848  ;;  %v3410_v0 = vld [vmem:[#allocation5 + $0xe0] sm:$0xf]  ;;  %v4110_v1 = vld [vmem:[#allocation5 + $0xec] sm:$0xf0] }
  0x18   :  { %v3538_v2 = vld [vmem:[#allocation5 + $0x1e0] sm:$0xf]  ;;  %v3411_v3 = vor.u32 %v4110_v1, %v3410_v0  ;;  %v4142_v4 = vld [vmem:[#allocation5 + $0x1ec] sm:$0xf0]  ;;  %v4108_v5 = vld [vmem:[#allocation5 + $0xe4] sm:$0xf] }
  0x19   :  { %v3412_v6 = vld [vmem:[#allocation5 + $0xf0] sm:$0xf0]  ;;  %v3539_v7 = vor.u32 %v4142_v4, %v3538_v2  ;;  %v4140_v9 = vld [vmem:[#allocation5 + $0x1e4] sm:$0xf]  ;;  %v3394_v11 = vld [vmem:[#allocation5 + $0xc0] sm:$0xf] }
  0x1a   :  { %v3415_v8 = vor.u32 %v4108_v5, %v3412_v6  ;;  %v3540_v10 = vld [vmem:[#allocation5 + $0x1f0] sm:$0xf0]  ;;  %585 = vmatpush.bf16.msra.mxu0 %v3411_v3  ;;  %v4106_v13 = vld [vmem:[#allocation5 + $0xcc] sm:$0xf0]  ;;  %v3522_v14 = vld [vmem:[#allocation5 + $0x1c0] sm:$0xf] }
  0x1b   :  { %v3543_v12 = vor.u32 %v4140_v9, %v3540_v10  ;;  %v4138_v15 = vld [vmem:[#allocation5 + $0x1cc] sm:$0xf0]  ;;  %634 = vmatpush.bf16.msra.mxu1 %v3539_v7  ;;  %v3395_v16 = vor.u32 %v4106_v13, %v3394_v11  ;;  %v4104_v18 = vld [vmem:[#allocation5 + $0xc4] sm:$0xf]  ;;  %v3396_v19 = vld [vmem:[#allocation5 + $0xd0] sm:$0xf0] }
  0x1c   :  { %683 = vmatpush.bf16.msra.mxu2 %v3415_v8  ;;  %v3523_v17 = vor.u32 %v4138_v15, %v3522_v14  ;;  %v4136_v20 = vld [vmem:[#allocation5 + $0x1c4] sm:$0xf]  ;;  %v3399_v21 = vor.u32 %v4104_v18, %v3396_v19  ;;  %v3524_v22 = vld [vmem:[#allocation5 + $0x1d0] sm:$0xf0]  ;;  %v3378_v23 = vld [vmem:[#allocation5 + $0xa0] sm:$0xf] }
  0x1d   :  { %732 = vmatpush.bf16.msra.mxu3 %v3543_v12  ;;  %v4102_v24 = vld [vmem:[#allocation5 + $0xac] sm:$0xf0]  ;;  %v3527_v25 = vor.u32 %v4136_v20, %v3524_v22  ;;  %v3506_v26 = vld [vmem:[#allocation5 + $0x1a0] sm:$0xf]  ;;  %v4100_v28 = vld [vmem:[#allocation5 + $0xa4] sm:$0xf] }
  0x1e   :  { %v4134_v27 = vld [vmem:[#allocation5 + $0x1ac] sm:$0xf0]  ;;  %586 = vmatpush.bf16.msra.mxu0 %v3395_v16  ;;  %v3379_v29 = vor.u32 %v4102_v24, %v3378_v23  ;;  %v3380_v30 = vld [vmem:[#allocation5 + $0xb0] sm:$0xf0]  ;;  %v4132_v31 = vld [vmem:[#allocation5 + $0x1a4] sm:$0xf] }
  0x1f   :  { %v3508_v32 = vld [vmem:[#allocation5 + $0x1b0] sm:$0xf0]  ;;  %635 = vmatpush.bf16.msra.mxu1 %v3523_v17  ;;  %v3507_v33 = vor.u32 %v4134_v27, %v3506_v26  ;;  %v3383_v34 = vor.u32 %v4100_v28, %v3380_v30  ;;  %v3362_v35 = vld [vmem:[#allocation5 + $0x80] sm:$0xf]  ;;  %v4098_v36 = vld [vmem:[#allocation5 + $0x8c] sm:$0xf0] }
  0x20   :  { %684 = vmatpush.bf16.msra.mxu2 %v3399_v21  ;;  %v3490_v37 = vld [vmem:[#allocation5 + $0x180] sm:$0xf]  ;;  %v3511_v38 = vor.u32 %v4132_v31, %v3508_v32  ;;  %v4130_v39 = vld [vmem:[#allocation5 + $0x18c] sm:$0xf0]  ;;  %v4096_v40 = vld [vmem:[#allocation5 + $0x84] sm:$0xf]  ;;  %v3363_v44 = vor.u32 %v4098_v36, %v3362_v35 }
  0x21   :  { %733 = vmatpush.bf16.msra.mxu3 %v3527_v25  ;;  %v3364_v41 = vld [vmem:[#allocation5 + $0x90] sm:$0xf0]  ;;  %v4128_v42 = vld [vmem:[#allocation5 + $0x184] sm:$0xf]  ;;  %v3491_v45 = vor.u32 %v4130_v39, %v3490_v37  ;;  %v3346_v47 = vld [vmem:[#allocation5 + $0x60] sm:$0xf] }
  0x22   :  { %v3492_v43 = vld [vmem:[#allocation5 + $0x190] sm:$0xf0]  ;;  %587 = vmatpush.bf16.msra.mxu0 %v3379_v29  ;;  %v3367_v46 = vor.u32 %v4096_v40, %v3364_v41  ;;  %v4094_v48 = vld [vmem:[#allocation5 + $0x6c] sm:$0xf0]  ;;  %v3474_v49 = vld [vmem:[#allocation5 + $0x160] sm:$0xf] }
  0x23   :  { %636 = vmatpush.bf16.msra.mxu1 %v3507_v33  ;;  %v3495_v50 = vor.u32 %v4128_v42, %v3492_v43  ;;  %v4126_v51 = vld [vmem:[#allocation5 + $0x16c] sm:$0xf0]  ;;  %v4092_v52 = vld [vmem:[#allocation5 + $0x64] sm:$0xf]  ;;  %v3348_v53 = vld [vmem:[#allocation5 + $0x70] sm:$0xf0]  ;;  %v3347_v56 = vor.u32 %v4094_v48, %v3346_v47 }
  0x24   :  { %685 = vmatpush.bf16.msra.mxu2 %v3383_v34  ;;  %v4124_v54 = vld [vmem:[#allocation5 + $0x164] sm:$0xf]  ;;  %v3476_v55 = vld [vmem:[#allocation5 + $0x170] sm:$0xf0]  ;;  %v3475_v57 = vor.u32 %v4126_v51, %v3474_v49  ;;  %v3351_v58 = vor.u32 %v4092_v52, %v3348_v53  ;;  %v3330_v59 = vld [vmem:[#allocation5 + $0x40] sm:$0xf] }
  0x25   :  { %734 = vmatpush.bf16.msra.mxu3 %v3511_v38  ;;  %v4090_v60 = vld [vmem:[#allocation5 + $0x4c] sm:$0xf0]  ;;  %v3458_v61 = vld [vmem:[#allocation5 + $0x140] sm:$0xf]  ;;  %v3479_v62 = vor.u32 %v4124_v54, %v3476_v55  ;;  %v4088_v0 = vld [vmem:[#allocation5 + $0x44] sm:$0xf] }
  0x26   :  { %588 = vmatpush.bf16.msra.mxu0 %v3363_v44  ;;  %v4122_v63 = vld [vmem:[#allocation5 + $0x14c] sm:$0xf0]  ;;  %v3332_v1 = vld [vmem:[#allocation5 + $0x50] sm:$0xf0]  ;;  %v4120_v2 = vld [vmem:[#allocation5 + $0x144] sm:$0xf]  ;;  %v3331_v4 = vor.u32 %v4090_v60, %v3330_v59 }
  0x27   :  { %637 = vmatpush.bf16.msra.mxu1 %v3491_v45  ;;  %v3460_v3 = vld [vmem:[#allocation5 + $0x150] sm:$0xf0]  ;;  %v3459_v5 = vor.u32 %v4122_v63, %v3458_v61  ;;  %v3335_v6 = vor.u32 %v4088_v0, %v3332_v1  ;;  %v3314_v7 = vld [vmem:[#allocation5 + $0x20] sm:$0xf]  ;;  %v4086_v8 = vld [vmem:[#allocation5 + $0x2c] sm:$0xf0] }
  0x28   :  { %686 = vmatpush.bf16.msra.mxu2 %v3367_v46  ;;  %v3442_v9 = vld [vmem:[#allocation5 + $0x120] sm:$0xf]  ;;  %v3463_v10 = vor.u32 %v4120_v2, %v3460_v3  ;;  %v4118_v11 = vld [vmem:[#allocation5 + $0x12c] sm:$0xf0]  ;;  %v4084_v12 = vld [vmem:[#allocation5 + $0x24] sm:$0xf]  ;;  %v3315_v16 = vor.u32 %v4086_v8, %v3314_v7 }
  0x29   :  { %735 = vmatpush.bf16.msra.mxu3 %v3495_v50  ;;  %v3316_v13 = vld [vmem:[#allocation5 + $0x30] sm:$0xf0]  ;;  %v4116_v14 = vld [vmem:[#allocation5 + $0x124] sm:$0xf]  ;;  %v3298_v17 = vld [vmem:[#allocation5] sm:$0xf]  ;;  %v3443_v19 = vor.u32 %v4118_v11, %v3442_v9 }
  0x2a   :  { %589 = vmatpush.bf16.msra.mxu0 %v3347_v56  ;;  %v3444_v15 = vld [vmem:[#allocation5 + $0x130] sm:$0xf0]  ;;  %v4082_v18 = vld [vmem:[#allocation5 + $0xc] sm:$0xf0]  ;;  %v3319_v20 = vor.u32 %v4084_v12, %v3316_v13  ;;  %v3426_v21 = vld [vmem:[#allocation5 + $0x100] sm:$0xf] }
  0x2b   :  { %638 = vmatpush.bf16.msra.mxu1 %v3475_v57  ;;  %v4114_v22 = vld [vmem:[#allocation5 + $0x10c] sm:$0xf0]  ;;  %v4080_v23 = vld [vmem:[#allocation5 + $0x4] sm:$0xf]  ;;  %v3447_v24 = vor.u32 %v4116_v14, %v3444_v15  ;;  %v3300_v25 = vld [vmem:[#allocation5 + $0x10] sm:$0xf0]  ;;  %v3299_v31 = vor.u32 %v4082_v18, %v3298_v17 }
  0x2c   :  { %687 = vmatpush.bf16.msra.mxu2 %v3351_v58  ;;  %v4112_v26 = vld [vmem:[#allocation5 + $0x104] sm:$0xf]  ;;  %v3428_v27 = vld [vmem:[#allocation5 + $0x110] sm:$0xf0]  ;;  %v3234_v28 = vld [vmem:[#allocation2] sm:$0xf]  ;;  %v3427_v35 = vor.u32 %v4114_v22, %v3426_v21  ;;  %v3303_v36 = vor.u32 %v4080_v23, %v3300_v25 }
  0x2d   :  { %736 = vmatpush.bf16.msra.mxu3 %v3479_v62  ;;  %v4109_v29 = vld [vmem:[#allocation5 + $0xec] sm:$0xf]  ;;  %v3420_v30 = vld [vmem:[#allocation5 + $0xf8] sm:$0xf0]  ;;  %v4065_v32 = vld [vmem:[#allocation2 + $0x4] sm:$0xf0]  ;;  %v3431_v39 = vor.u32 %v4112_v26, %v3428_v27 }
  0x2e   :  { %590 = vmatpush.bf16.msra.mxu0 %v3331_v4  ;;  %v4141_v33 = vld [vmem:[#allocation5 + $0x1ec] sm:$0xf]  ;;  %v3548_v34 = vld [vmem:[#allocation5 + $0x1f8] sm:$0xf0]  ;;  %v4064_v37 = vld [vmem:[#allocation2 + $0x4] sm:$0xf]  ;;  %v3423_v40 = vor.u32 %v4109_v29, %v3420_v30  ;;  %v4625_v44 = vor.u32 %v4065_v32, %v3234_v28 }
  0x2f   :  { %639 = vmatpush.bf16.msra.mxu1 %v3459_v5  ;;  %v3236_v38 = vld [vmem:[#allocation2 + $0x8] sm:$0xf0]  ;;  %v3418_v41 = vld [vmem:[#allocation5 + $0xe8] sm:$0xf]  ;;  %v4111_v42 = vld [vmem:[#allocation5 + $0xf4] sm:$0xf0]  ;;  %v3551_v45 = vor.u32 %v4141_v33, %v3548_v34 }
  0x30   :  { %688 = vmatpush.bf16.msra.mxu2 %v3335_v6  ;;  %v3546_v43 = vld [vmem:[#allocation5 + $0x1e8] sm:$0xf]  ;;  %v4143_v46 = vld [vmem:[#allocation5 + $0x1f4] sm:$0xf0]  ;;  %v4105_v47 = vld [vmem:[#allocation5 + $0xcc] sm:$0xf]  ;;  %v4627_v49 = vor.u32 %v4064_v37, %v3236_v38  ;;  %v3419_v52 = vor.u32 %v4111_v42, %v3418_v41 }
  0x31   :  { %737 = vmatpush.bf16.msra.mxu3 %v3463_v10  ;;  %v3404_v48 = vld [vmem:[#allocation5 + $0xd8] sm:$0xf0]  ;;  %v4137_v50 = vld [vmem:[#allocation5 + $0x1cc] sm:$0xf]  ;;  %v3547_v53 = vor.u32 %v4143_v46, %v3546_v43  ;;  %v3402_v55 = vld [vmem:[#allocation5 + $0xc8] sm:$0xf] }
  0x32   :  { %591 = vmatpush.bf16.msra.mxu0 %v3315_v16  ;;  %v3532_v51 = vld [vmem:[#allocation5 + $0x1d8] sm:$0xf0]  ;;  %v3407_v54 = vor.u32 %v4105_v47, %v3404_v48  ;;  %v4107_v56 = vld [vmem:[#allocation5 + $0xd4] sm:$0xf0]  ;;  %v3530_v58 = vld [vmem:[#allocation5 + $0x1c8] sm:$0xf] }
  0x33   :  { %640 = vmatpush.bf16.msra.mxu1 %v3443_v19  ;;  %v3535_v57 = vor.u32 %v4137_v50, %v3532_v51  ;;  %v4139_v59 = vld [vmem:[#allocation5 + $0x1d4] sm:$0xf0]  ;;  %v3403_v60 = vor.u32 %v4107_v56, %v3402_v55  ;;  %v4101_v61 = vld [vmem:[#allocation5 + $0xac] sm:$0xf]  ;;  %v3388_v62 = vld [vmem:[#allocation5 + $0xb8] sm:$0xf0] }
  0x34   :  { %689 = vmatpush.bf16.msra.mxu2 %v3319_v20  ;;  %v4133_v63 = vld [vmem:[#allocation5 + $0x1ac] sm:$0xf]  ;;  %v3531_v0 = vor.u32 %v4139_v59, %v3530_v58  ;;  %v3391_v1 = vor.u32 %v4101_v61, %v3388_v62  ;;  %v3516_v2 = vld [vmem:[#allocation5 + $0x1b8] sm:$0xf0]  ;;  %v3386_v3 = vld [vmem:[#allocation5 + $0xa8] sm:$0xf] }
  0x35   :  { %738 = vmatpush.bf16.msra.mxu3 %v3447_v24  ;;  %v4103_v4 = vld [vmem:[#allocation5 + $0xb4] sm:$0xf0]  ;;  %v3519_v5 = vor.u32 %v4133_v63, %v3516_v2  ;;  %v3514_v6 = vld [vmem:[#allocation5 + $0x1a8] sm:$0xf]  ;;  %v3242_v10 = vld [vmem:[#allocation2 + $0x10] sm:$0xf] }
  0x36   :  { %592 = vmatpush.bf16.msra.mxu0 %v3299_v31  ;;  %v4135_v7 = vld [vmem:[#allocation5 + $0x1b4] sm:$0xf0]  ;;  %v3387_v8 = vor.u32 %v4103_v4, %v3386_v3  ;;  %v4066_v12 = vld [vmem:[#allocation2 + $0x14] sm:$0xf]  ;;  %v3244_v13 = vld [vmem:[#allocation2 + $0x18] sm:$0xf0] }
  0x37   :  { %641 = vmatpush.bf16.msra.mxu1 %v3427_v35  ;;  %v3515_v9 = vor.u32 %v4135_v7, %v3514_v6  ;;  %v4067_v11 = vld [vmem:[#allocation2 + $0x14] sm:$0xf0]  ;;  %v4635_v15 = vor.u32 %v4066_v12, %v3244_v13  ;;  %v4097_v16 = vld [vmem:[#allocation5 + $0x8c] sm:$0xf]  ;;  %v3372_v17 = vld [vmem:[#allocation5 + $0x98] sm:$0xf0] }
  0x38   :  { %690 = vmatpush.bf16.msra.mxu2 %v3303_v36  ;;  %v4633_v14 = vor.u32 %v4067_v11, %v3242_v10  ;;  %v4129_v18 = vld [vmem:[#allocation5 + $0x18c] sm:$0xf]  ;;  %v3375_v19 = vor.u32 %v4097_v16, %v3372_v17  ;;  %v3500_v20 = vld [vmem:[#allocation5 + $0x198] sm:$0xf0]  ;;  %v3370_v21 = vld [vmem:[#allocation5 + $0x88] sm:$0xf] }
  0x39   :  { %739 = vmatpush.bf16.msra.mxu3 %v3431_v39  ;;  %593 = vmatmul.bf16.vlgmr.msra.gmra.mxu0 %v4625_v44  ;;  %v4099_v22 = vld [vmem:[#allocation5 + $0x94] sm:$0xf0]  ;;  %v3503_v23 = vor.u32 %v4129_v18, %v3500_v20  ;;  %v3498_v25 = vld [vmem:[#allocation5 + $0x188] sm:$0xf]  ;;  %v3250_v28 = vld [vmem:[#allocation2 + $0x20] sm:$0xf] }
  0x3a   :  { %642 = vmatmul.bf16.vlgmr.msra.gmra.mxu1 %v4627_v49  ;;  %781 = vmatpush.bf16.msrb.mxu0 %v3419_v52  ;;  %v3371_v24 = vor.u32 %v4099_v22, %v3370_v21  ;;  %v4131_v26 = vld [vmem:[#allocation5 + $0x194] sm:$0xf0]  ;;  %v4069_v29 = vld [vmem:[#allocation2 + $0x24] sm:$0xf0]  ;;  %v4068_v30 = vld [vmem:[#allocation2 + $0x24] sm:$0xf] }
  0x3b   :  { %691 = vmatmul.bf16.vlgmr.msra.gmra.mxu2 %v4625_v44  ;;  %830 = vmatpush.bf16.msrb.mxu1 %v3547_v53  ;;  %v3499_v27 = vor.u32 %v4131_v26, %v3498_v25  ;;  %v3252_v31 = vld [vmem:[#allocation2 + $0x28] sm:$0xf0]  ;;  %v4641_v32 = vor.u32 %v4069_v29, %v3250_v28  ;;  %v3356_v35 = vld [vmem:[#allocation5 + $0x78] sm:$0xf0]  ;;  %v3354_v39 = vld [vmem:[#allocation5 + $0x68] sm:$0xf] }
  0x3c   :  { %879 = vmatpush.bf16.msrb.mxu2 %v3423_v40  ;;  %740 = vmatmul.bf16.vlgmr.msra.gmra.mxu3 %v4627_v49  ;;  %v4643_v33 = vor.u32 %v4068_v30, %v3252_v31  ;;  %v4093_v34 = vld [vmem:[#allocation5 + $0x6c] sm:$0xf]  ;;  %v3484_v38 = vld [vmem:[#allocation5 + $0x178] sm:$0xf0]  ;;  %v4095_v40 = vld [vmem:[#allocation5 + $0x74] sm:$0xf0] }
  0x3d   :  { %928 = vmatpush.bf16.msrb.mxu3 %v3551_v45  ;;  %v4125_v36 = vld [vmem:[#allocation5 + $0x16c] sm:$0xf]  ;;  %v3359_v37 = vor.u32 %v4093_v34, %v3356_v35  ;;  %v3355_v42 = vor.u32 %v4095_v40, %v3354_v39  ;;  %v3482_v43 = vld [vmem:[#allocation5 + $0x168] sm:$0xf]  ;;  %v4127_v45 = vld [vmem:[#allocation5 + $0x174] sm:$0xf0] }
  0x3e   :  { %782 = vmatpush.bf16.msrb.mxu0 %v3403_v60  ;;  %v3487_v41 = vor.u32 %v4125_v36, %v3484_v38  ;;  %v3483_v46 = vor.u32 %v4127_v45, %v3482_v43  ;;  %v3258_v47 = vld [vmem:[#allocation2 + $0x30] sm:$0xf]  ;;  %v4071_v48 = vld [vmem:[#allocation2 + $0x34] sm:$0xf0]  ;;  %v4070_v50 = vld [vmem:[#allocation2 + $0x34] sm:$0xf] }
  0x3f   :  { %831 = vmatpush.bf16.msrb.mxu1 %v3531_v0  ;;  %v3260_v51 = vld [vmem:[#allocation2 + $0x38] sm:$0xf0]  ;;  %v4649_v52 = vor.u32 %v4071_v48, %v3258_v47  ;;  %v4121_v56 = vld [vmem:[#allocation5 + $0x14c] sm:$0xf]  ;;  %v3338_v59 = vld [vmem:[#allocation5 + $0x48] sm:$0xf] }
  0x40   :  { %880 = vmatpush.bf16.msrb.mxu2 %v3407_v54  ;;  %v4651_v53 = vor.u32 %v4070_v50, %v3260_v51  ;;  %v4089_v54 = vld [vmem:[#allocation5 + $0x4c] sm:$0xf]  ;;  %v3340_v55 = vld [vmem:[#allocation5 + $0x58] sm:$0xf0]  ;;  %v4091_v60 = vld [vmem:[#allocation5 + $0x54] sm:$0xf0] }
  0x41   :  { %929 = vmatpush.bf16.msrb.mxu3 %v3535_v57  ;;  %v3343_v57 = vor.u32 %v4089_v54, %v3340_v55  ;;  %v3468_v58 = vld [vmem:[#allocation5 + $0x158] sm:$0xf0]  ;;  %v3339_v62 = vor.u32 %v4091_v60, %v3338_v59  ;;  %v3466_v63 = vld [vmem:[#allocation5 + $0x148] sm:$0xf]  ;;  %v4123_v0 = vld [vmem:[#allocation5 + $0x154] sm:$0xf0] }
  0x42   :  { %783 = vmatpush.bf16.msrb.mxu0 %v3387_v8  ;;  %v3471_v61 = vor.u32 %v4121_v56, %v3468_v58  ;;  %v3266_v2 = vld [vmem:[#allocation2 + $0x40] sm:$0xf]  ;;  %v4073_v3 = vld [vmem:[#allocation2 + $0x44] sm:$0xf0]  ;;  %v4072_v4 = vld [vmem:[#allocation2 + $0x44] sm:$0xf] }
  0x43   :  { %832 = vmatpush.bf16.msrb.mxu1 %v3515_v9  ;;  %v4657_v6 = vor.u32 %v4073_v3, %v3266_v2  ;;  %v4085_v8 = vld [vmem:[#allocation5 + $0x2c] sm:$0xf]  ;;  %v3324_v9 = vld [vmem:[#allocation5 + $0x38] sm:$0xf0]  ;;  %v3322_v13 = vld [vmem:[#allocation5 + $0x28] sm:$0xf] }
  0x44   :  { %881 = vmatpush.bf16.msrb.mxu2 %v3391_v1  ;;  %v3467_v1 = vor.u32 %v4123_v0, %v3466_v63  ;;  %v4117_v10 = vld [vmem:[#allocation5 + $0x12c] sm:$0xf]  ;;  %v3327_v11 = vor.u32 %v4085_v8, %v3324_v9  ;;  %v3452_v12 = vld [vmem:[#allocation5 + $0x138] sm:$0xf0]  ;;  %v4087_v16 = vld [vmem:[#allocation5 + $0x34] sm:$0xf0] }
  0x45   :  { %930 = vmatpush.bf16.msrb.mxu3 %v3519_v5  ;;  %v3268_v5 = vld [vmem:[#allocation2 + $0x48] sm:$0xf0]  ;;  %v3455_v17 = vor.u32 %v4117_v10, %v3452_v12  ;;  %v3323_v18 = vor.u32 %v4087_v16, %v3322_v13  ;;  %v4119_v20 = vld [vmem:[#allocation5 + $0x134] sm:$0xf0]  ;;  %v3274_v22 = vld [vmem:[#allocation2 + $0x50] sm:$0xf] }
  0x46   :  { %784 = vmatpush.bf16.msrb.mxu0 %v3371_v24  ;;  %v4659_v7 = vor.u32 %v4072_v4, %v3268_v5  ;;  %v4074_v24 = vld [vmem:[#allocation2 + $0x54] sm:$0xf]  ;;  %v3276_v25 = vld [vmem:[#allocation2 + $0x58] sm:$0xf0]  ;;  %v4081_v28 = vld [vmem:[#allocation5 + $0xc] sm:$0xf] }
  0x47   :  { %833 = vmatpush.bf16.msrb.mxu1 %v3499_v27  ;;  %v4667_v27 = vor.u32 %v4074_v24, %v3276_v25  ;;  %v3308_v29 = vld [vmem:[#allocation5 + $0x18] sm:$0xf0]  ;;  %v4113_v30 = vld [vmem:[#allocation5 + $0x10c] sm:$0xf]  ;;  %v3306_v35 = vld [vmem:[#allocation5 + $0x8] sm:$0xf] }
  0x48   :  { %882 = vmatpush.bf16.msrb.mxu2 %v3375_v19  ;;  %v3450_v19 = vld [vmem:[#allocation5 + $0x128] sm:$0xf]  ;;  %v3311_v31 = vor.u32 %v4081_v28, %v3308_v29  ;;  %v3436_v34 = vld [vmem:[#allocation5 + $0x118] sm:$0xf0]  ;;  %v4083_v36 = vld [vmem:[#allocation5 + $0x14] sm:$0xf0] }
  0x49   :  { %598 = vmatmul.bf16.gmra.mxu0 %v4633_v14  ;;  %931 = vmatpush.bf16.msrb.mxu3 %v3503_v23  ;;  %v3451_v21 = vor.u32 %v4119_v20, %v3450_v19  ;;  %v4075_v23 = vld [vmem:[#allocation2 + $0x54] sm:$0xf0]  ;;  %v3307_v38 = vor.u32 %v4083_v36, %v3306_v35  ;;  %v3434_v39 = vld [vmem:[#allocation5 + $0x108] sm:$0xf]  ;;  %v4076_v45 = vld [vmem:[#allocation2 + $0x64] sm:$0xf] }
  0x4a   :  { %647 = vmatmul.bf16.gmra.mxu1 %v4635_v15  ;;  %785 = vmatpush.bf16.msrb.mxu0 %v3355_v42  ;;  %v4665_v26 = vor.u32 %v4075_v23, %v3274_v22  ;;  %v4115_v40 = vld [vmem:[#allocation5 + $0x114] sm:$0xf0]  ;;  %v3282_v42 = vld [vmem:[#allocation2 + $0x60] sm:$0xf]  ;;  %v4077_v43 = vld [vmem:[#allocation2 + $0x64] sm:$0xf0] }
  0x4b   :  { %696 = vmatmul.bf16.gmra.mxu2 %v4633_v14  ;;  %834 = vmatpush.bf16.msrb.mxu1 %v3483_v46  ;;  %v3284_v46 = vld [vmem:[#allocation2 + $0x68] sm:$0xf0]  ;;  %v4673_v47 = vor.u32 %v4077_v43, %v3282_v42  ;;  %v3290_v50 = vld [vmem:[#allocation2 + $0x70] sm:$0xf]  ;;  %v4079_v51 = vld [vmem:[#allocation2 + $0x74] sm:$0xf0] }
  0x4c   :  { %745 = vmatmul.bf16.gmra.mxu3 %v4635_v15  ;;  %883 = vmatpush.bf16.msrb.mxu2 %v3359_v37  ;;  %v3439_v37 = vor.u32 %v4113_v30, %v3436_v34  ;;  %v4675_v48 = vor.u32 %v4076_v45, %v3284_v46  ;;  %v4078_v54 = vld [vmem:[#allocation2 + $0x74] sm:$0xf]  ;;  %v3292_v55 = vld [vmem:[#allocation2 + $0x78] sm:$0xf0]  ;;  %v4681_v56 = vor.u32 %v4079_v51, %v3290_v50  ;;  %v4689_v58 = vld [vmem:[#allocation7] sm:$0xf] }
  0x4d   :  { %932 = vmatpush.bf16.msrb.mxu3 %v3487_v41  ;;  %v3435_v41 = vor.u32 %v4115_v40, %v3434_v39  ;;  %v4692_v59 = vperm.slane %v4689_v58, 0  ;;  %v4701_v0 = vperm.slane %v4689_v58, 1  ;;  %v3922_v39 = vld [vmem:[#allocation8 + $0x2e0] sm:$0xf]  ;;  %v4238_v42 = vld [vmem:[#allocation8 + $0x2ec] sm:$0xf0] }
  0x4e   :  { %786 = vmatpush.bf16.msrb.mxu0 %v3339_v62  ;;  %v3666_v43 = vld [vmem:[#allocation8 + $0xe0] sm:$0xf]  ;;  %v3923_v50 = vor.u32 %v4238_v42, %v3922_v39  ;;  %v4174_v51 = vld [vmem:[#allocation8 + $0xec] sm:$0xf0]  ;;  %s4573_s2 = smov [#allocation11]   ;;  %s3217_s21 = sshll.u32 %s5816_s5, 4  ;;  %s3218_s21 = int_to_ptr.hbm [resolvable:$true] %s3217_s21 }
  0x4f   :  { %835 = vmatpush.bf16.msrb.mxu1 %v3467_v1  ;;  %s3215_s4 = sshll.u32 %s4573_s2, 4  ;;  %s3216_s4 = int_to_ptr.vmem [resolvable:$true] %s3215_s4 }
  0x50   :  { %884 = vmatpush.bf16.msrb.mxu2 %v3343_v57  ;;  %v4683_v57 = vor.u32 %v4078_v54, %v3292_v55  ;;  %v4050_v54 = vld [vmem:[#allocation8 + $0x3e0] sm:$0xf]  ;;  %v4270_v55 = vld [vmem:[#allocation8 + $0x3ec] sm:$0xf0] }
  0x51   :  { %933 = vmatpush.bf16.msrb.mxu3 %v3471_v61 }
  0x52   :  { %787 = vmatpush.bf16.msrb.mxu0 %v3323_v18 }
  0x53   :  { %836 = vmatpush.bf16.msrb.mxu1 %v3451_v21 }
  0x54   :  { %885 = vmatpush.bf16.msrb.mxu2 %v3327_v11 }
  0x55   :  { %934 = vmatpush.bf16.msrb.mxu3 %v3455_v17 }
  0x56   :  { %788 = vmatpush.bf16.msrb.mxu0 %v3307_v38 }
  0x57   :  { %837 = vmatpush.bf16.msrb.mxu1 %v3435_v41 }
  0x58   :  { %886 = vmatpush.bf16.msrb.mxu2 %v3311_v31 }
  0x59   :  { %603 = vmatmul.bf16.gmra.mxu0 %v4641_v32  ;;  %935 = vmatpush.bf16.msrb.mxu3 %v3439_v37 }
  0x5a   :  { %652 = vmatmul.bf16.gmra.mxu1 %v4643_v33 }
  0x5b   :  { %701 = vmatmul.bf16.gmra.mxu2 %v4641_v32 }
  0x5c   :  { %750 = vmatmul.bf16.gmra.mxu3 %v4643_v33  ;;  %2461 = vmatpush.bf16.msra.mxu2 %v3923_v50 }
  0x69   :  { %608 = vmatmul.bf16.gmra.mxu0 %v4649_v52 }
  0x6a   :  { %657 = vmatmul.bf16.gmra.mxu1 %v4651_v53 }
  0x6b   :  { %706 = vmatmul.bf16.gmra.mxu2 %v4649_v52 }
  0x6c   :  { %755 = vmatmul.bf16.gmra.mxu3 %v4651_v53 }
  0x79   :  { %613 = vmatmul.bf16.gmra.mxu0 %v4657_v6 }
  0x7a   :  { %662 = vmatmul.bf16.gmra.mxu1 %v4659_v7 }
  0x7b   :  { %711 = vmatmul.bf16.gmra.mxu2 %v4657_v6 }
  0x7c   :  { %760 = vmatmul.bf16.gmra.mxu3 %v4659_v7 }
  0x89   :  { %618 = vmatmul.bf16.gmra.mxu0 %v4665_v26 }
  0x8a   :  { %667 = vmatmul.bf16.gmra.mxu1 %v4667_v27 }
  0x8b   :  { %716 = vmatmul.bf16.gmra.mxu2 %v4665_v26 }
  0x8c   :  { %765 = vmatmul.bf16.gmra.mxu3 %v4667_v27 }
  0x99   :  { %623 = vmatmul.bf16.gmra.mxu0 %v4673_v47 }
  0x9a   :  { %672 = vmatmul.bf16.gmra.mxu1 %v4675_v48 }
  0x9b   :  { %721 = vmatmul.bf16.gmra.mxu2 %v4673_v47 }
  0x9c   :  { %770 = vmatmul.bf16.gmra.mxu3 %v4675_v48 }
  0xa9   :  { %628 = vmatmul.bf16.gmra.mxu0 %v4681_v56 }
  0xaa   :  { %677 = vmatmul.bf16.gmra.mxu1 %v4683_v57 }
  0xab   :  { %726 = vmatmul.bf16.gmra.mxu2 %v4681_v56 }
  0xac   :  { %775 = vmatmul.bf16.gmra.mxu3 %v4683_v57 }
  0xb6   :  { %v594_v60 = vpop.f32.mrf.mxu0 }
  0xb7   :  { %v595_v61 = vadd.f32 %v594_v60, %v4692_v59  ;;  %v643_v62 = vpop.f32.mrf.mxu1 }
  0xb9   :  { %v4695_v63 = vadd.f32 %v643_v62, %v595_v61  ;;  %789 = vmatmul.bf16.vlgmr.msrb.gmra.mxu0 %v4625_v44  ;;  %v3667_v62 = vor.u32 %v4174_v51, %v3666_v43 }
  0xba   :  { %838 = vmatmul.bf16.vlgmr.msrb.gmra.mxu1 %v4627_v49 }
  0xbb   :  { %887 = vmatmul.bf16.vlgmr.msrb.gmra.mxu2 %v4625_v44  ;;  %v1041_v1 = vmul.f32 0.044715, %v4695_v63  ;;  %2363 = vmatpush.bf16.msra.mxu0 %v3667_v62 }
  0xbc   :  { %936 = vmatmul.bf16.vlgmr.msrb.gmra.mxu3 %v4627_v49 }
  0xbd   :  { %v1105_v2 = vmul.f32 %v1041_v1, %v4695_v63  ;;  %v4051_v1 = vor.u32 %v4270_v55, %v4050_v54 }
  0xbe   :  { %v692_v3 = vpop.f32.mrf.mxu2  ;;  %v596_v8 = vpop.f32.mrf.mxu0 }
  0xbf   :  { %v693_v4 = vadd.f32 %v692_v3, %v4701_v0  ;;  %v741_v5 = vpop.f32.mrf.mxu3  ;;  %v1169_v9 = vmul.f32 %v1105_v2, %v4695_v63  ;;  %v597_v10 = vadd.f32 %v596_v8, %v4692_v59  ;;  %v645_v11 = vpop.f32.mrf.mxu1  ;;  %v3794_v2 = vld [vmem:[#allocation8 + $0x1e0] sm:$0xf]  ;;  %v4206_v3 = vld [vmem:[#allocation8 + $0x1ec] sm:$0xf0]  ;;  %2510 = vmatpush.bf16.msra.mxu3 %v4051_v1 }
  0xc0   :  { %v3650_v1 = vld [vmem:[#allocation8 + $0xc0] sm:$0xf] }
  0xc1   :  { %v4709_v44 = vadd.f32 %v741_v5, %v693_v4  ;;  %v1233_v12 = vadd.f32 %v1169_v9, %v4695_v63  ;;  %v4712_v13 = vadd.f32 %v645_v11, %v597_v10  ;;  %v3795_v9 = vor.u32 %v4206_v3, %v3794_v2 }
  0xc3   :  { %v1042_v49 = vmul.f32 0.044715, %v4709_v44  ;;  %v1045_v16 = vmul.f32 0.044715, %v4712_v13  ;;  %v1297_v18 = vmul.f32 0.7978846, %v1233_v12  ;;  %2412 = vmatpush.bf16.msra.mxu1 %v3795_v9 }
  0xc4   :  { %v978_v50 = vmul.f32 0.5, %v4709_v44 }
  0xc5   :  { %v1106_v17 = vmul.f32 %v1042_v49, %v4709_v44  ;;  %v1109_v19 = vmul.f32 %v1045_v16, %v4712_v13  ;;  %4282 = vtanh.f32 %v1297_v18 }
  0xc6   :  { %v694_v20 = vpop.f32.mrf.mxu2  ;;  %v599_v24 = vpop.f32.mrf.mxu0 }
  0xc7   :  { %v1170_v21 = vmul.f32 %v1106_v17, %v4709_v44  ;;  %v695_v22 = vadd.f32 %v694_v20, %v4701_v0  ;;  %v743_v23 = vpop.f32.mrf.mxu3  ;;  %v1173_v25 = vmul.f32 %v1109_v19, %v4712_v13  ;;  %v600_v28 = vadd.f32 %v599_v24, %v4692_v59  ;;  %v648_v29 = vpop.f32.mrf.mxu1 }
  0xc8   :  { %v977_v20 = vmul.f32 0.5, %v4695_v63 }
  0xc9   :  { %v1234_v30 = vadd.f32 %v1170_v21, %v4709_v44  ;;  %v4723_v31 = vadd.f32 %v743_v23, %v695_v22  ;;  %v1237_v34 = vadd.f32 %v1173_v25, %v4712_v13  ;;  %v4726_v35 = vadd.f32 %v648_v29, %v600_v28  ;;  %794 = vmatmul.bf16.gmra.mxu0 %v4633_v14 }
  0xca   :  { %843 = vmatmul.bf16.gmra.mxu1 %v4635_v15  ;;  %v981_v21 = vmul.f32 0.5, %v4712_v13 }
  0xcb   :  { %v1046_v36 = vmul.f32 0.044715, %v4723_v31  ;;  %892 = vmatmul.bf16.gmra.mxu2 %v4633_v14  ;;  %v1301_v37 = vmul.f32 0.7978846, %v1237_v34  ;;  %v1049_v38 = vmul.f32 0.044715, %v4726_v35  ;;  %v4283_v4 = vpop.eup %4282 }
  0xcc   :  { %941 = vmatmul.bf16.gmra.mxu3 %v4635_v15  ;;  %v1298_v40 = vmul.f32 0.7978846, %v1234_v30  ;;  %v1425_v16 = vadd.f32 1.0, %v4283_v4  ;;  %v982_v54 = vmul.f32 0.5, %v4723_v31  ;;  %v4170_v4 = vld [vmem:[#allocation8 + $0xcc] sm:$0xf0] }
  0xcd   :  { %v1110_v41 = vmul.f32 %v1046_v36, %v4723_v31  ;;  %4284 = vtanh.f32 %v1301_v37  ;;  %v1113_v45 = vmul.f32 %v1049_v38, %v4726_v35 }
  0xce   :  { %v697_v46 = vpop.f32.mrf.mxu2  ;;  %v601_v15 = vpop.f32.mrf.mxu0  ;;  %4286 = vtanh.f32 %v1298_v40  ;;  %v1489_v38 = vmul.f32 %v1425_v16, %v977_v20  ;;  %v3778_v16 = vld [vmem:[#allocation8 + $0x1c0] sm:$0xf] }
  0xcf   :  { %v1174_v14 = vmul.f32 %v1110_v41, %v4723_v31  ;;  %v698_v60 = vadd.f32 %v697_v46, %v4701_v0  ;;  %v746_v61 = vpop.f32.mrf.mxu3  ;;  %v602_v5 = vadd.f32 %v601_v15, %v4692_v59  ;;  %v650_v8 = vpop.f32.mrf.mxu1  ;;  %v1177_v11 = vmul.f32 %v1113_v45, %v4726_v35  ;;  %v3906_v15 = vld [vmem:[#allocation8 + $0x2c0] sm:$0xf] }
  0xd1   :  { %v1238_v10 = vadd.f32 %v1174_v14, %v4723_v31  ;;  %v4741_v12 = vadd.f32 %v746_v61, %v698_v60  ;;  %v4743_v49 = vadd.f32 %v650_v8, %v602_v5  ;;  %v1241_v23 = vadd.f32 %v1177_v11, %v4726_v35  ;;  %v4234_v31 = vld [vmem:[#allocation8 + $0x2cc] sm:$0xf0]  ;;  %v4034_v5 = vld [vmem:[#allocation8 + $0x3c0] sm:$0xf] }
  0xd2   :  { %v3907_v3 = vor.u32 %v4234_v31, %v3906_v15  ;;  %v4266_v8 = vld [vmem:[#allocation8 + $0x3cc] sm:$0xf0] }
  0xd3   :  { %v1302_v17 = vmul.f32 0.7978846, %v1238_v10  ;;  %v1050_v18 = vmul.f32 0.044715, %v4741_v12  ;;  %v4285_v19 = vpop.eup %4284  ;;  %v1053_v22 = vmul.f32 0.044715, %v4743_v49  ;;  %v4035_v11 = vor.u32 %v4266_v8, %v4034_v5 }
  0xd4   :  { %v1429_v25 = vadd.f32 1.0, %v4285_v19  ;;  %v4287_v30 = vpop.eup %4286  ;;  %v1305_v42 = vmul.f32 0.7978846, %v1241_v23  ;;  %2462 = vmatpush.bf16.msra.mxu2 %v3907_v3  ;;  %v986_v31 = vmul.f32 0.5, %v4741_v12 }
  0xd5   :  { %4288 = vtanh.f32 %v1302_v17  ;;  %v1114_v24 = vmul.f32 %v1050_v18, %v4741_v12  ;;  %v1117_v28 = vmul.f32 %v1053_v22, %v4743_v49  ;;  %v1426_v51 = vadd.f32 1.0, %v4287_v30  ;;  %v4202_v17 = vld [vmem:[#allocation8 + $0x1cc] sm:$0xf0]  ;;  %2511 = vmatpush.bf16.msra.mxu3 %v4035_v11 }
  0xd6   :  { %v699_v29 = vpop.f32.mrf.mxu2  ;;  %v604_v63 = vpop.f32.mrf.mxu0  ;;  %v1493_v13 = vmul.f32 %v1429_v25, %v981_v21  ;;  %4290 = vtanh.f32 %v1305_v42  ;;  %v3779_v22 = vor.u32 %v4202_v17, %v3778_v16 }
  0xd7   :  { %v1178_v34 = vmul.f32 %v1114_v24, %v4741_v12  ;;  %v700_v36 = vadd.f32 %v699_v29, %v4701_v0  ;;  %v748_v37 = vpop.f32.mrf.mxu3  ;;  %v1181_v39 = vmul.f32 %v1117_v28, %v4743_v49  ;;  %v605_v40 = vadd.f32 %v604_v63, %v4692_v59  ;;  %v653_v41 = vpop.f32.mrf.mxu1 }
  0xd8   :  { %v4759_v46 = vpack.c.bf16 %v1493_v13, %v1489_v38  ;;  %v1490_v28 = vmul.f32 %v1426_v51, %v978_v50  ;;  %2413 = vmatpush.bf16.msra.mxu1 %v3779_v22 }
  0xd9   :  { %v1242_v43 = vadd.f32 %v1178_v34, %v4741_v12  ;;  %v4757_v45 = vadd.f32 %v748_v37, %v700_v36  ;;  %v4763_v55 = vadd.f32 %v653_v41, %v605_v40  ;;  %799 = vmatmul.bf16.gmra.mxu0 %v4641_v32  ;;  %v1245_v62 = vadd.f32 %v1181_v39, %v4743_v49 }
  0xda   :  { %848 = vmatmul.bf16.gmra.mxu1 %v4643_v33 }
  0xdb   :  { %v4289_v14 = vpop.eup %4288  ;;  %v1306_v60 = vmul.f32 0.7978846, %v1242_v43  ;;  %v1054_v61 = vmul.f32 0.044715, %v4757_v45  ;;  %897 = vmatmul.bf16.gmra.mxu2 %v4641_v32  ;;  %v1057_v44 = vmul.f32 0.044715, %v4763_v55  ;;  %v3651_v32 = vor.u32 %v4170_v4, %v3650_v1 }
  0xdc   :  { %946 = vmatmul.bf16.gmra.mxu3 %v4643_v33  ;;  %v1430_v18 = vadd.f32 1.0, %v4289_v14  ;;  %v1309_v23 = vmul.f32 0.7978846, %v1245_v62  ;;  %v4291_v38 = vpop.eup %4290  ;;  %v989_v4 = vmul.f32 0.5, %v4743_v49  ;;  %v3890_v49 = vld [vmem:[#allocation8 + $0x2a0] sm:$0xf] }
  0xdd   :  { %v1118_v2 = vmul.f32 %v1054_v61, %v4757_v45  ;;  %v1121_v9 = vmul.f32 %v1057_v44, %v4763_v55  ;;  %2364 = vmatpush.bf16.msra.mxu0 %v3651_v32  ;;  %4292 = vtanh.f32 %v1306_v60  ;;  %v985_v44 = vmul.f32 0.5, %v4726_v35 }
  0xde   :  { %v702_v10 = vpop.f32.mrf.mxu2  ;;  %v606_v21 = vpop.f32.mrf.mxu0  ;;  %v1494_v29 = vmul.f32 %v1430_v18, %v982_v54  ;;  %4294 = vtanh.f32 %v1309_v23  ;;  %v1433_v54 = vadd.f32 1.0, %v4291_v38  ;;  %v990_v32 = vmul.f32 0.5, %v4757_v45 }
  0xdf   :  { %v1182_v19 = vmul.f32 %v1118_v2, %v4757_v45  ;;  %v703_v33 = vadd.f32 %v702_v10, %v4701_v0  ;;  %v751_v20 = vpop.f32.mrf.mxu3  ;;  %v607_v24 = vadd.f32 %v606_v21, %v4692_v59  ;;  %v655_v25 = vpop.f32.mrf.mxu1  ;;  %v1185_v30 = vmul.f32 %v1121_v9, %v4763_v55  ;;  %v3634_v21 = vld [vmem:[#allocation8 + $0xa0] sm:$0xf] }
  0xe0   :  { %v4783_v63 = vpack.c.bf16 %v1494_v29, %v1490_v28  ;;  %v1497_v35 = vmul.f32 %v1433_v54, %v985_v44  ;;  %v4018_v28 = vld [vmem:[#allocation8 + $0x3a0] sm:$0xf]  ;;  %v4262_v29 = vld [vmem:[#allocation8 + $0x3ac] sm:$0xf0] }
  0xe1   :  { %v4778_v34 = vadd.f32 %v751_v20, %v703_v33  ;;  %v1246_v36 = vadd.f32 %v1182_v19, %v4757_v45  ;;  %v4781_v37 = vadd.f32 %v655_v25, %v607_v24  ;;  %v1249_v41 = vadd.f32 %v1185_v30, %v4763_v55  ;;  %v4230_v20 = vld [vmem:[#allocation8 + $0x2ac] sm:$0xf0] }
  0xe2   :  { %5833 = vst [vmem:[#allocation16_spill] sm:$0xff] %v4783_v63  ;;  %v3891_v24 = vor.u32 %v4230_v20, %v3890_v49  ;;  %v4166_v25 = vld [vmem:[#allocation8 + $0xac] sm:$0xf0]  ;;  %v4019_v38 = vor.u32 %v4262_v29, %v4018_v28 }
  0xe3   :  { %v1058_v13 = vmul.f32 0.044715, %v4778_v34  ;;  %v1310_v39 = vmul.f32 0.7978846, %v1246_v36  ;;  %v1061_v40 = vmul.f32 0.044715, %v4781_v37  ;;  %v4293_v43 = vpop.eup %4292  ;;  %v3635_v36 = vor.u32 %v4166_v25, %v3634_v21 }
  0xe4   :  { %v4295_v14 = vpop.eup %4294  ;;  %v1313_v8 = vmul.f32 0.7978846, %v1249_v41  ;;  %v1434_v16 = vadd.f32 1.0, %v4293_v43  ;;  %2463 = vmatpush.bf16.msra.mxu2 %v3891_v24  ;;  %2512 = vmatpush.bf16.msra.mxu3 %v4019_v38  ;;  %v994_v20 = vmul.f32 0.5, %v4778_v34  ;;  %v997_v25 = vmul.f32 0.5, %v4781_v37 }
  0xe5   :  { %v1122_v42 = vmul.f32 %v1058_v13, %v4778_v34  ;;  %4296 = vtanh.f32 %v1310_v39  ;;  %v1125_v50 = vmul.f32 %v1061_v40, %v4781_v37  ;;  %v1437_v5 = vadd.f32 1.0, %v4295_v14  ;;  %v3762_v13 = vld [vmem:[#allocation8 + $0x1a0] sm:$0xf]  ;;  %v4198_v39 = vld [vmem:[#allocation8 + $0x1ac] sm:$0xf0]  ;;  %2365 = vmatpush.bf16.msra.mxu0 %v3635_v36 }
  0xe6   :  { %v704_v51 = vpop.f32.mrf.mxu2  ;;  %v609_v62 = vpop.f32.mrf.mxu0  ;;  %4298 = vtanh.f32 %v1313_v8 }
  0xe7   :  { %v1186_v60 = vmul.f32 %v1122_v42, %v4778_v34  ;;  %v705_v61 = vadd.f32 %v704_v51, %v4701_v0  ;;  %v753_v15 = vpop.f32.mrf.mxu3  ;;  %v1189_v1 = vmul.f32 %v1125_v50, %v4781_v37  ;;  %v610_v2 = vadd.f32 %v609_v62, %v4692_v59  ;;  %v658_v3 = vpop.f32.mrf.mxu1 }
  0xe8   :  { %v1501_v12 = vmul.f32 %v1437_v5, %v989_v4  ;;  %v3763_v50 = vor.u32 %v4198_v39, %v3762_v13 }
  0xe9   :  { %v1250_v9 = vadd.f32 %v1186_v60, %v4778_v34  ;;  %v4798_v10 = vadd.f32 %v753_v15, %v705_v61  ;;  %v4801_v11 = vadd.f32 %v658_v3, %v610_v2  ;;  %804 = vmatmul.bf16.gmra.mxu0 %v4649_v52  ;;  %v1253_v33 = vadd.f32 %v1189_v1, %v4781_v37  ;;  %v3874_v37 = vld [vmem:[#allocation8 + $0x280] sm:$0xf] }
  0xea   :  { %853 = vmatmul.bf16.gmra.mxu1 %v4651_v53  ;;  %v4810_v22 = vpack.c.bf16 %v1501_v12, %v1497_v35  ;;  %v1498_v60 = vmul.f32 %v1434_v16, %v986_v31 }
  0xeb   :  { %v4297_v17 = vpop.eup %4296  ;;  %v1314_v18 = vmul.f32 0.7978846, %v1250_v9  ;;  %v1062_v19 = vmul.f32 0.044715, %v4798_v10  ;;  %902 = vmatmul.bf16.gmra.mxu2 %v4649_v52  ;;  %v1065_v45 = vmul.f32 0.044715, %v4801_v11  ;;  %2414 = vmatpush.bf16.msra.mxu1 %v3763_v50 }
  0xec   :  { %951 = vmatmul.bf16.gmra.mxu3 %v4651_v53  ;;  %v1438_v40 = vadd.f32 1.0, %v4297_v17  ;;  %v1317_v51 = vmul.f32 0.7978846, %v1253_v33  ;;  %v4299_v3 = vpop.eup %4298  ;;  %v998_v36 = vmul.f32 0.5, %v4798_v10 }
  0xed   :  { %v1126_v23 = vmul.f32 %v1062_v19, %v4798_v10  ;;  %v1129_v52 = vmul.f32 %v1065_v45, %v4801_v11  ;;  %4300 = vtanh.f32 %v1314_v18  ;;  %v1441_v16 = vadd.f32 1.0, %v4299_v3 }
  0xee   :  { %v707_v30 = vpop.f32.mrf.mxu2  ;;  %v611_v43 = vpop.f32.mrf.mxu0  ;;  %v1502_v61 = vmul.f32 %v1438_v40, %v990_v32  ;;  %4302 = vtanh.f32 %v1317_v51  ;;  %v993_v45 = vmul.f32 0.5, %v4763_v55 }
  0xef   :  { %v1190_v53 = vmul.f32 %v1126_v23, %v4798_v10  ;;  %v708_v41 = vadd.f32 %v707_v30, %v4701_v0  ;;  %v756_v42 = vpop.f32.mrf.mxu3  ;;  %v612_v54 = vadd.f32 %v611_v43, %v4692_v59  ;;  %v660_v14 = vpop.f32.mrf.mxu1  ;;  %v1193_v15 = vmul.f32 %v1129_v52, %v4801_v11  ;;  %v3618_v43 = vld [vmem:[#allocation8 + $0x80] sm:$0xf] }
  0xf0   :  { %v4823_v2 = vpack.c.bf16 %v1502_v61, %v1498_v60  ;;  %v1505_v55 = vmul.f32 %v1441_v16, %v993_v45  ;;  %v4002_v60 = vld [vmem:[#allocation8 + $0x380] sm:$0xf]  ;;  %v4258_v61 = vld [vmem:[#allocation8 + $0x38c] sm:$0xf0] }
  0xf1   :  { %v4818_v62 = vadd.f32 %v756_v42, %v708_v41  ;;  %v1254_v44 = vadd.f32 %v1190_v53, %v4798_v10  ;;  %v4821_v1 = vadd.f32 %v660_v14, %v612_v54  ;;  %v1257_v8 = vadd.f32 %v1193_v15, %v4801_v11  ;;  %v4226_v42 = vld [vmem:[#allocation8 + $0x28c] sm:$0xf0] }
  0xf2   :  { %5834 = vst [vmem:[#allocation17_spill] sm:$0xff] %v4823_v2  ;;  %v3875_v54 = vor.u32 %v4226_v42, %v3874_v37  ;;  %v4162_v14 = vld [vmem:[#allocation8 + $0x8c] sm:$0xf0]  ;;  %v4003_v3 = vor.u32 %v4258_v61, %v4002_v60 }
  0xf3   :  { %v1066_v4 = vmul.f32 0.044715, %v4818_v62  ;;  %v1318_v5 = vmul.f32 0.7978846, %v1254_v44  ;;  %v1069_v31 = vmul.f32 0.044715, %v4821_v1  ;;  %v4301_v32 = vpop.eup %4300  ;;  %v3619_v44 = vor.u32 %v4162_v14, %v3618_v43 }
  0xf4   :  { %v4303_v17 = vpop.eup %4302  ;;  %v1321_v29 = vmul.f32 0.7978846, %v1257_v8  ;;  %v1442_v13 = vadd.f32 1.0, %v4301_v32  ;;  %2464 = vmatpush.bf16.msra.mxu2 %v3875_v54  ;;  %2513 = vmatpush.bf16.msra.mxu3 %v4003_v3  ;;  %v3602_v54 = vld [vmem:[#allocation8 + $0x60] sm:$0xf] }
  0xf5   :  { %v1130_v9 = vmul.f32 %v1066_v4, %v4818_v62  ;;  %4304 = vtanh.f32 %v1318_v5  ;;  %v1133_v35 = vmul.f32 %v1069_v31, %v4821_v1  ;;  %v1445_v28 = vadd.f32 1.0, %v4303_v17  ;;  %v3746_v4 = vld [vmem:[#allocation8 + $0x180] sm:$0xf]  ;;  %v4194_v5 = vld [vmem:[#allocation8 + $0x18c] sm:$0xf0]  ;;  %2366 = vmatpush.bf16.msra.mxu0 %v3619_v44 }
  0xf6   :  { %v709_v12 = vpop.f32.mrf.mxu2  ;;  %v614_v33 = vpop.f32.mrf.mxu0  ;;  %4306 = vtanh.f32 %v1321_v29  ;;  %v4158_v14 = vld [vmem:[#allocation8 + $0x6c] sm:$0xf0]  ;;  %v3730_v44 = vld [vmem:[#allocation8 + $0x160] sm:$0xf] }
  0xf7   :  { %v1194_v18 = vmul.f32 %v1130_v9, %v4818_v62  ;;  %v710_v19 = vadd.f32 %v709_v12, %v4701_v0  ;;  %v758_v49 = vpop.f32.mrf.mxu3  ;;  %v1197_v21 = vmul.f32 %v1133_v35, %v4821_v1  ;;  %v615_v23 = vadd.f32 %v614_v33, %v4692_v59  ;;  %v663_v24 = vpop.f32.mrf.mxu1 }
  0xf8   :  { %v1509_v34 = vmul.f32 %v1445_v28, %v997_v25  ;;  %v3747_v35 = vor.u32 %v4194_v5, %v3746_v4  ;;  %v4222_v5 = vld [vmem:[#allocation8 + $0x26c] sm:$0xf0] }
  0xf9   :  { %v1258_v52 = vadd.f32 %v1194_v18, %v4818_v62  ;;  %v4838_v30 = vadd.f32 %v758_v49, %v710_v19  ;;  %v4841_v38 = vadd.f32 %v663_v24, %v615_v23  ;;  %809 = vmatmul.bf16.gmra.mxu0 %v4657_v6  ;;  %v1261_v41 = vadd.f32 %v1197_v21, %v4821_v1 }
  0xfa   :  { %858 = vmatmul.bf16.gmra.mxu1 %v4659_v7  ;;  %v4850_v50 = vpack.c.bf16 %v1509_v34, %v1505_v55  ;;  %v1506_v18 = vmul.f32 %v1442_v13, %v994_v20 }
  0xfb   :  { %v4305_v39 = vpop.eup %4304  ;;  %v1322_v40 = vmul.f32 0.7978846, %v1258_v52  ;;  %v1070_v53 = vmul.f32 0.044715, %v4838_v30  ;;  %907 = vmatmul.bf16.gmra.mxu2 %v4657_v6  ;;  %v1073_v10 = vmul.f32 0.044715, %v4841_v38  ;;  %2415 = vmatpush.bf16.msra.mxu1 %v3747_v35 }
  0xfc   :  { %956 = vmatmul.bf16.gmra.mxu3 %v4659_v7  ;;  %5835 = vst [vmem:[#allocation18_spill] sm:$0xff] %v4850_v50  ;;  %v1446_v31 = vadd.f32 1.0, %v4305_v39  ;;  %v1325_v12 = vmul.f32 0.7978846, %v1261_v41  ;;  %v4307_v24 = vpop.eup %4306  ;;  %v1001_v39 = vmul.f32 0.5, %v4801_v11  ;;  %v1006_v35 = vmul.f32 0.5, %v4838_v30 }
  0xfd   :  { %v1134_v51 = vmul.f32 %v1070_v53, %v4838_v30  ;;  %v1137_v6 = vmul.f32 %v1073_v10, %v4841_v38  ;;  %v1005_v10 = vmul.f32 0.5, %v4821_v1  ;;  %v3858_v11 = vld [vmem:[#allocation8 + $0x260] sm:$0xf]  ;;  %v1002_v1 = vmul.f32 0.5, %v4818_v62 }
  0xfe   :  { %v712_v15 = vpop.f32.mrf.mxu2  ;;  %v616_v32 = vpop.f32.mrf.mxu0  ;;  %v1510_v19 = vmul.f32 %v1446_v31, %v998_v36  ;;  %4308 = vtanh.f32 %v1325_v12  ;;  %v1449_v36 = vadd.f32 1.0, %v4307_v24  ;;  %v3986_v31 = vld [vmem:[#allocation8 + $0x360] sm:$0xf] }
  0xff   :  { %v1198_v7 = vmul.f32 %v1134_v51, %v4838_v30  ;;  %v713_v8 = vadd.f32 %v712_v15, %v4701_v0  ;;  %v761_v9 = vpop.f32.mrf.mxu3  ;;  %v617_v16 = vadd.f32 %v616_v32, %v4692_v59  ;;  %v665_v17 = vpop.f32.mrf.mxu1  ;;  %v1201_v45 = vmul.f32 %v1137_v6, %v4841_v38  ;;  %v4254_v32 = vld [vmem:[#allocation8 + $0x36c] sm:$0xf0] }
 0x100   :  { %v4863_v23 = vpack.c.bf16 %v1510_v19, %v1506_v18  ;;  %4310 = vtanh.f32 %v1322_v40  ;;  %v1513_v60 = vmul.f32 %v1449_v36, %v1001_v39  ;;  %v3603_v15 = vor.u32 %v4158_v14, %v3602_v54  ;;  %v3586_v19 = vld [vmem:[#allocation8 + $0x40] sm:$0xf]  ;;  %v4182_v14 = vld [vmem:[#allocation8 + $0x12c] sm:$0xf0] }
 0x101   :  { %v4857_v49 = vadd.f32 %v761_v9, %v713_v8  ;;  %v1262_v33 = vadd.f32 %v1198_v7, %v4838_v30  ;;  %v4861_v21 = vadd.f32 %v665_v17, %v617_v16  ;;  %v1265_v20 = vadd.f32 %v1201_v45, %v4841_v38 }
 0x102   :  { %5836 = vst [vmem:[#allocation19_spill] sm:$0xff] %v4863_v23  ;;  %v3859_v9 = vor.u32 %v4222_v5, %v3858_v11  ;;  %2367 = vmatpush.bf16.msra.mxu0 %v3603_v15  ;;  %v3987_v17 = vor.u32 %v4254_v32, %v3986_v31 }
 0x103   :  { %v1326_v25 = vmul.f32 0.7978846, %v1262_v33  ;;  %v1077_v28 = vmul.f32 0.044715, %v4861_v21  ;;  %v1329_v43 = vmul.f32 0.7978846, %v1265_v20 }
 0x104   :  { %v4309_v55 = vpop.eup %4308  ;;  %v3714_v33 = vld [vmem:[#allocation8 + $0x140] sm:$0xf]  ;;  %2465 = vmatpush.bf16.msra.mxu2 %v3859_v9  ;;  %v4186_v20 = vld [vmem:[#allocation8 + $0x14c] sm:$0xf0]  ;;  %2514 = vmatpush.bf16.msra.mxu3 %v3987_v17 }
 0x105   :  { %4312 = vtanh.f32 %v1326_v25  ;;  %v1141_v29 = vmul.f32 %v1077_v28, %v4861_v21  ;;  %v1453_v42 = vadd.f32 1.0, %v4309_v55  ;;  %v3715_v39 = vor.u32 %v4186_v20, %v3714_v33  ;;  %v4178_v9 = vld [vmem:[#allocation8 + $0x10c] sm:$0xf0] }
 0x106   :  { %v4868_v52 = vpop.f32.mrf.mxu2  ;;  %v619_v13 = vpop.f32.mrf.mxu0  ;;  %4314 = vtanh.f32 %v1329_v43  ;;  %v3698_v43 = vld [vmem:[#allocation8 + $0x120] sm:$0xf] }
 0x107   :  { %v4870_v34 = vpop.f32.mrf.mxu3  ;;  %v4311_v53 = vpop.eup %4310  ;;  %v1205_v40 = vmul.f32 %v1141_v29, %v4861_v21  ;;  %v620_v37 = vadd.f32 %v619_v13, %v4692_v59  ;;  %v1517_v61 = vmul.f32 %v1453_v42, %v1005_v10  ;;  %v3570_v10 = vld [vmem:[#allocation8 + $0x20] sm:$0xf]  ;;  %v4150_v42 = vld [vmem:[#allocation8 + $0x2c] sm:$0xf0]  ;;  %v3699_v11 = vor.u32 %v4182_v14, %v3698_v43 }
 0x108   :  { %v668_v41 = vpop.f32.mrf.mxu1  ;;  %v1450_v3 = vadd.f32 1.0, %v4311_v53  ;;  %v3571_v54 = vor.u32 %v4150_v42, %v3570_v10 }
 0x109   :  { %v4876_v51 = vadd.f32 %v668_v41, %v620_v37  ;;  %814 = vmatmul.bf16.gmra.mxu0 %v4665_v26  ;;  %v4884_v7 = vpack.c.bf16 %v1517_v61, %v1513_v60  ;;  %v1269_v8 = vadd.f32 %v1205_v40, %v4861_v21 }
 0x10a   :  { %863 = vmatmul.bf16.gmra.mxu1 %v4667_v27  ;;  %v1514_v29 = vmul.f32 %v1450_v3, %v1002_v1  ;;  %v3554_v1 = vld [vmem:[#allocation8] sm:$0xf]  ;;  %v4146_v3 = vld [vmem:[#allocation8 + $0xc] sm:$0xf0] }
 0x10b   :  { %v4313_v6 = vpop.eup %4312  ;;  %912 = vmatmul.bf16.gmra.mxu2 %v4665_v26  ;;  %v1081_v4 = vmul.f32 0.044715, %v4876_v51  ;;  %v4190_v26 = vld [vmem:[#allocation8 + $0x16c] sm:$0xf0]  ;;  %v1333_v53 = vmul.f32 0.7978846, %v1269_v8  ;;  %v3555_v8 = vor.u32 %v4146_v3, %v3554_v1 }
 0x10c   :  { %961 = vmatmul.bf16.gmra.mxu3 %v4667_v27  ;;  %v1454_v12 = vadd.f32 1.0, %v4313_v6  ;;  %v3731_v18 = vor.u32 %v4190_v26, %v3730_v44  ;;  %v4154_v27 = vld [vmem:[#allocation8 + $0x4c] sm:$0xf0]  ;;  %v4315_v60 = vpop.eup %4314 }
 0x10d   :  { %v1145_v62 = vmul.f32 %v1081_v4, %v4876_v51  ;;  %v3587_v28 = vor.u32 %v4154_v27, %v3586_v19  ;;  %4316 = vtanh.f32 %v1333_v53  ;;  %v3682_v4 = vld [vmem:[#allocation8 + $0x100] sm:$0xf]  ;;  %v1457_v32 = vadd.f32 1.0, %v4315_v60 }
 0x10e   :  { %v717_v16 = vpop.f32.mrf.mxu2  ;;  %v621_v25 = vpop.f32.mrf.mxu0  ;;  %v1518_v36 = vmul.f32 %v1454_v12, %v1006_v35  ;;  %2416 = vmatpush.bf16.msra.mxu1 %v3731_v18  ;;  %v3683_v17 = vor.u32 %v4178_v9, %v3682_v4  ;;  %v1009_v18 = vmul.f32 0.5, %v4841_v38  ;;  %v1013_v19 = vmul.f32 0.5, %v4861_v21  ;;  %v4218_v38 = vld [vmem:[#allocation8 + $0x24c] sm:$0xf0]  ;;  %v3970_v21 = vld [vmem:[#allocation8 + $0x340] sm:$0xf] }
 0x10f   :  { %v718_v45 = vadd.f32 %v717_v16, %v4701_v0  ;;  %v766_v24 = vpop.f32.mrf.mxu3  ;;  %v1209_v30 = vmul.f32 %v1145_v62, %v4876_v51  ;;  %v622_v55 = vadd.f32 %v621_v25, %v4692_v59  ;;  %2368 = vmatpush.bf16.msra.mxu0 %v3587_v28 }
 0x110   :  { %v670_v13 = vpop.f32.mrf.mxu1  ;;  %v4894_v37 = vpack.c.bf16 %v1518_v36, %v1514_v29  ;;  %v1521_v25 = vmul.f32 %v1457_v32, %v1009_v18  ;;  %v4250_v36 = vld [vmem:[#allocation8 + $0x34c] sm:$0xf0]  ;;  %v1017_v32 = vmul.f32 0.5, %v4876_v51 }
 0x111   :  { %v4892_v40 = vadd.f32 %v766_v24, %v718_v45  ;;  %v4896_v41 = vadd.f32 %v670_v13, %v622_v55  ;;  %v1273_v61 = vadd.f32 %v1209_v30, %v4876_v51  ;;  %v3842_v24 = vld [vmem:[#allocation8 + $0x240] sm:$0xf] }
 0x112   :  { %2417 = vmatpush.bf16.msra.mxu1 %v3715_v39  ;;  %v3843_v29 = vor.u32 %v4218_v38, %v3842_v24  ;;  %v3971_v39 = vor.u32 %v4250_v36, %v3970_v21 }
 0x113   :  { %v1085_v6 = vmul.f32 0.044715, %v4896_v41  ;;  %2369 = vmatpush.bf16.msra.mxu0 %v3571_v54  ;;  %v4317_v26 = vpop.eup %4316  ;;  %v1337_v35 = vmul.f32 0.7978846, %v1273_v61 }
 0x114   :  { %v1461_v27 = vadd.f32 1.0, %v4317_v26  ;;  %2466 = vmatpush.bf16.msra.mxu2 %v3843_v29  ;;  %2515 = vmatpush.bf16.msra.mxu3 %v3971_v39  ;;  %v1021_v26 = vmul.f32 0.5, %v4896_v41  ;;  %v4952_v39 = vperm.slane %v4689_v58, 2  ;;  %v1074_v58 = vmul.f32 0.044715, %v4857_v49 }
 0x115   :  { %v1149_v15 = vmul.f32 %v1085_v6, %v4896_v41  ;;  %4318 = vtanh.f32 %v1337_v35 }
 0x116   :  { %v4901_v44 = vpop.f32.mrf.mxu2  ;;  %v624_v31 = vpop.f32.mrf.mxu0  ;;  %2418 = vmatpush.bf16.msra.mxu1 %v3699_v11  ;;  %v1525_v28 = vmul.f32 %v1461_v27, %v1013_v19 }
 0x117   :  { %v4903_v5 = vpop.f32.mrf.mxu3  ;;  %v1213_v12 = vmul.f32 %v1149_v15, %v4896_v41  ;;  %v625_v62 = vadd.f32 %v624_v31, %v4692_v59  ;;  %2370 = vmatpush.bf16.msra.mxu0 %v3555_v8 }
 0x118   :  { %v673_v16 = vpop.f32.mrf.mxu1  ;;  %v4917_v30 = vpack.c.bf16 %v1525_v28, %v1521_v25 }
 0x119   :  { %v4909_v33 = vadd.f32 %v673_v16, %v625_v62  ;;  %819 = vmatmul.bf16.gmra.mxu0 %v4673_v47  ;;  %v1277_v45 = vadd.f32 %v1213_v12, %v4896_v41 }
 0x11a   :  { %868 = vmatmul.bf16.gmra.mxu1 %v4675_v48 }
 0x11b   :  { %917 = vmatmul.bf16.gmra.mxu2 %v4673_v47  ;;  %v1089_v20 = vmul.f32 0.044715, %v4909_v33  ;;  %2419 = vmatpush.bf16.msra.mxu1 %v3683_v17  ;;  %v1341_v47 = vmul.f32 0.7978846, %v1277_v45  ;;  %v4319_v60 = vpop.eup %4318 }
 0x11c   :  { %966 = vmatmul.bf16.gmra.mxu3 %v4675_v48  ;;  %v1465_v15 = vadd.f32 1.0, %v4319_v60  ;;  %v4246_v60 = vld [vmem:[#allocation8 + $0x32c] sm:$0xf0] }
 0x11d   :  { %v1153_v55 = vmul.f32 %v1089_v20, %v4909_v33  ;;  %4320 = vtanh.f32 %v1341_v47 }
 0x11e   :  { %v722_v13 = vpop.f32.mrf.mxu2  ;;  %v626_v42 = vpop.f32.mrf.mxu0  ;;  %v1529_v17 = vmul.f32 %v1465_v15, %v1017_v32 }
 0x11f   :  { %v723_v53 = vadd.f32 %v722_v13, %v4701_v0  ;;  %v771_v10 = vpop.f32.mrf.mxu3  ;;  %v1217_v48 = vmul.f32 %v1153_v55, %v4909_v33  ;;  %v627_v43 = vadd.f32 %v626_v42, %v4692_v59  ;;  %v3826_v42 = vld [vmem:[#allocation8 + $0x220] sm:$0xf] }
 0x120   :  { %v675_v54 = vpop.f32.mrf.mxu1 }
 0x121   :  { %v4923_v14 = vadd.f32 %v771_v10, %v723_v53  ;;  %v1281_v61 = vadd.f32 %v1217_v48, %v4909_v33  ;;  %v676_v6 = vadd.f32 %v675_v54, %v627_v43  ;;  %v1025_v48 = vmul.f32 0.5, %v4909_v33  ;;  %v4214_v54 = vld [vmem:[#allocation8 + $0x22c] sm:$0xf0] }
 0x122   :  { %v3827_v15 = vor.u32 %v4214_v54, %v3826_v42 }
 0x123   :  { %v1093_v11 = vmul.f32 0.044715, %v676_v6  ;;  %v4321_v1 = vpop.eup %4320  ;;  %v1345_v3 = vmul.f32 0.7978846, %v1281_v61  ;;  %v1029_v43 = vmul.f32 0.5, %v676_v6 }
 0x124   :  { %v1469_v35 = vadd.f32 1.0, %v4321_v1  ;;  %2467 = vmatpush.bf16.msra.mxu2 %v3827_v15 }
 0x125   :  { %v1157_v4 = vmul.f32 %v1093_v11, %v676_v6  ;;  %4322 = vtanh.f32 %v1345_v3 }
 0x126   :  { %v4926_v31 = vpop.f32.mrf.mxu2  ;;  %v629_v9 = vpop.f32.mrf.mxu0  ;;  %v1533_v18 = vmul.f32 %v1469_v35, %v1021_v26 }
 0x127   :  { %v4928_v8 = vpop.f32.mrf.mxu3  ;;  %v1221_v12 = vmul.f32 %v1157_v4, %v676_v6  ;;  %v630_v62 = vadd.f32 %v629_v9, %v4692_v59  ;;  %v715_v4 = vadd.f32 %v4868_v52, %v4701_v0 }
 0x128   :  { %v678_v16 = vpop.f32.mrf.mxu1  ;;  %v4938_v51 = vpack.c.bf16 %v1533_v18, %v1529_v17  ;;  %v1138_v18 = vmul.f32 %v1074_v58, %v4857_v49 }
 0x129   :  { %v4933_v19 = vadd.f32 %v678_v16, %v630_v62  ;;  %824 = vmatmul.bf16.gmra.mxu0 %v4681_v56  ;;  %v1285_v27 = vadd.f32 %v1221_v12, %v676_v6 }
 0x12a   :  { %873 = vmatmul.bf16.gmra.mxu1 %v4683_v57 }
 0x12b   :  { %922 = vmatmul.bf16.gmra.mxu2 %v4681_v56  ;;  %v1097_v41 = vmul.f32 0.044715, %v4933_v19  ;;  %v1349_v45 = vmul.f32 0.7978846, %v1285_v27  ;;  %v4323_v21 = vpop.eup %4322  ;;  %v4974_v27 = vadd.f32 %v4870_v34, %v715_v4  ;;  %v1202_v34 = vmul.f32 %v1138_v18, %v4857_v49 }
 0x12c   :  { %971 = vmatmul.bf16.gmra.mxu3 %v4683_v57  ;;  %v1473_v47 = vadd.f32 1.0, %v4323_v21  ;;  %v4242_v21 = vld [vmem:[#allocation8 + $0x30c] sm:$0xf0] }
 0x12d   :  { %v1161_v24 = vmul.f32 %v1097_v41, %v4933_v19  ;;  %4324 = vtanh.f32 %v1349_v45  ;;  %v4410_v41 = vld [vmem:[#allocation7] sm:$0xf] }
 0x12e   :  { %v727_v25 = vpop.f32.mrf.mxu2  ;;  %v631_v38 = vpop.f32.mrf.mxu0  ;;  %v1537_v6 = vmul.f32 %v1473_v47, %v1025_v48  ;;  %v4977_v45 = vperm.slane %v4410_v41, 3  ;;  %v1078_v47 = vmul.f32 0.044715, %v4974_v27 }
 0x12f   :  { %v728_v28 = vadd.f32 %v727_v25, %v4701_v0  ;;  %v776_v20 = vpop.f32.mrf.mxu3  ;;  %v1225_v29 = vmul.f32 %v1161_v24, %v4933_v19  ;;  %v632_v56 = vadd.f32 %v631_v38, %v4692_v59  ;;  %v3954_v59 = vld [vmem:[#allocation8 + $0x320] sm:$0xf] }
 0x130   :  { %v680_v36 = vpop.f32.mrf.mxu1  ;;  %v3955_v1 = vor.u32 %v4246_v60, %v3954_v59  ;;  %v3810_v24 = vld [vmem:[#allocation8 + $0x200] sm:$0xf] }
 0x131   :  { %v4946_v55 = vadd.f32 %v776_v20, %v728_v28  ;;  %v4948_v13 = vadd.f32 %v680_v36, %v632_v56  ;;  %v1289_v57 = vadd.f32 %v1225_v29, %v4933_v19  ;;  %v4210_v28 = vld [vmem:[#allocation8 + $0x20c] sm:$0xf0]  ;;  %v3938_v38 = vld [vmem:[#allocation8 + $0x300] sm:$0xf] }
 0x132   :  { %2516 = vmatpush.bf16.msra.mxu3 %v3955_v1  ;;  %v3811_v20 = vor.u32 %v4210_v28, %v3810_v24  ;;  %v1266_v1 = vadd.f32 %v1202_v34, %v4857_v49 }
 0x133   :  { %v4325_v53 = vpop.eup %4324  ;;  %v1101_v10 = vmul.f32 0.044715, %v4948_v13  ;;  %v1353_v9 = vmul.f32 0.7978846, %v1289_v57  ;;  %v3939_v57 = vor.u32 %v4242_v21, %v3938_v38  ;;  %v1037_v41 = vmul.f32 0.5, %v4948_v13 }
 0x134   :  { %v1477_v3 = vadd.f32 1.0, %v4325_v53  ;;  %2468 = vmatpush.bf16.msra.mxu2 %v3811_v20 }
 0x135   :  { %v1165_v61 = vmul.f32 %v1101_v10, %v4948_v13  ;;  %4326 = vtanh.f32 %v1353_v9 }
 0x136   :  { %v4957_v11 = vpop.f32.mrf.mxu2  ;;  %v790_v33 = vpop.f32.mrf.mxu0  ;;  %v1541_v62 = vmul.f32 %v1477_v3, %v1029_v43  ;;  %2517 = vmatpush.bf16.msra.mxu3 %v3939_v57  ;;  %v1142_v3 = vmul.f32 %v1078_v47, %v4974_v27 }
 0x137   :  { %v4962_v32 = vpop.f32.mrf.mxu3  ;;  %v1229_v26 = vmul.f32 %v1165_v61, %v4948_v13  ;;  %v791_v35 = vadd.f32 %v790_v33, %v4952_v39 }
 0x138   :  { %v839_v12 = vpop.f32.mrf.mxu1  ;;  %v4969_v17 = vpack.c.bf16 %v1541_v62, %v1537_v6  ;;  %v1082_v6 = vmul.f32 0.044715, %v4892_v40  ;;  %v1206_v28 = vmul.f32 %v1142_v3, %v4974_v27 }
 0x139   :  { %v4966_v16 = vadd.f32 %v839_v12, %v791_v35  ;;  %2371 = vmatmul.bf16.vlgmr.msra.gmra.mxu0 %v4759_v46  ;;  %v1293_v52 = vadd.f32 %v1229_v26, %v4948_v13  ;;  %v720_v26 = vadd.f32 %v4901_v44, %v4701_v0  ;;  %v1033_v12 = vmul.f32 0.5, %v4933_v19 }
 0x13a   :  { %2420 = vmatmul.bf16.vlgmr.msra.gmra.mxu1 %v4783_v63  ;;  %v1146_v34 = vmul.f32 %v1082_v6, %v4892_v40 }
 0x13b   :  { %v1043_v25 = vmul.f32 0.044715, %v4966_v16  ;;  %v1357_v29 = vmul.f32 0.7978846, %v1293_v52  ;;  %v4327_v59 = vpop.eup %4326  ;;  %v5009_v13 = vadd.f32 %v4903_v5, %v720_v26 }
 0x13c   :  { %v1481_v9 = vadd.f32 1.0, %v4327_v59 }
 0x13d   :  { %v1107_v56 = vmul.f32 %v1043_v25, %v4966_v16  ;;  %4328 = vtanh.f32 %v1357_v29  ;;  %v1330_v25 = vmul.f32 0.7978846, %v1266_v1  ;;  %v1086_v1 = vmul.f32 0.044715, %v5009_v13 }
 0x13e   :  { %v888_v36 = vpop.f32.mrf.mxu2  ;;  %v792_v42 = vpop.f32.mrf.mxu0 }
 0x13f   :  { %v889_v53 = vadd.f32 %v888_v36, %v4977_v45  ;;  %v937_v10 = vpop.f32.mrf.mxu3  ;;  %v1171_v48 = vmul.f32 %v1107_v56, %v4966_v16  ;;  %v793_v43 = vadd.f32 %v792_v42, %v4952_v39  ;;  %v1545_v36 = vmul.f32 %v1481_v9, %v1033_v12  ;;  %v3668_v12 = vld [vmem:[#allocation8 + $0xf0] sm:$0xf0] }
 0x140   :  { %v841_v54 = vpop.f32.mrf.mxu1  ;;  %v1270_v9 = vadd.f32 %v1206_v28, %v4974_v27  ;;  %v3796_v28 = vld [vmem:[#allocation8 + $0x1f0] sm:$0xf0] }
 0x141   :  { %v4986_v60 = vadd.f32 %v937_v10, %v889_v53  ;;  %v1235_v61 = vadd.f32 %v1171_v48, %v4966_v16  ;;  %v4989_v15 = vadd.f32 %v841_v54, %v793_v43 }
 0x143   :  { %v1044_v58 = vmul.f32 0.044715, %v4986_v60  ;;  %v1047_v4 = vmul.f32 0.044715, %v4989_v15  ;;  %v4329_v33 = vpop.eup %4328  ;;  %v1299_v62 = vmul.f32 0.7978846, %v1235_v61 }
 0x144   :  { %v1485_v24 = vadd.f32 1.0, %v4329_v33  ;;  %v4236_v61 = vld [vmem:[#allocation8 + $0x2e4] sm:$0xf]  ;;  %v1210_v33 = vmul.f32 %v1146_v34, %v4892_v40 }
 0x145   :  { %v1108_v35 = vmul.f32 %v1044_v58, %v4986_v60  ;;  %v1111_v52 = vmul.f32 %v1047_v4, %v4989_v15  ;;  %4330 = vtanh.f32 %v1299_v62  ;;  %v3924_v58 = vld [vmem:[#allocation8 + $0x2f0] sm:$0xf0]  ;;  %v4172_v4 = vld [vmem:[#allocation8 + $0xe4] sm:$0xf] }
 0x146   :  { %v890_v18 = vpop.f32.mrf.mxu2  ;;  %v795_v44 = vpop.f32.mrf.mxu0  ;;  %v1549_v57 = vmul.f32 %v1485_v24, %v1037_v41  ;;  %4332 = vtanh.f32 %v1330_v25  ;;  %v4268_v62 = vld [vmem:[#allocation8 + $0x3e4] sm:$0xf] }
 0x147   :  { %v1172_v20 = vmul.f32 %v1108_v35, %v4986_v60  ;;  %v891_v38 = vadd.f32 %v890_v18, %v4977_v45  ;;  %v939_v21 = vpop.f32.mrf.mxu3  ;;  %v1175_v29 = vmul.f32 %v1111_v52, %v4989_v15  ;;  %v796_v19 = vadd.f32 %v795_v44, %v4952_v39  ;;  %v4052_v52 = vld [vmem:[#allocation8 + $0x3f0] sm:$0xf0] }
 0x148   :  { %v844_v56 = vpop.f32.mrf.mxu1  ;;  %v5018_v48 = vpack.c.bf16 %v1549_v57, %v1545_v36  ;;  %v3927_v35 = vor.u32 %v4236_v61, %v3924_v58  ;;  %v1334_v61 = vmul.f32 0.7978846, %v1270_v9 }
 0x149   :  { %v1236_v47 = vadd.f32 %v1172_v20, %v4986_v60  ;;  %v5012_v53 = vadd.f32 %v939_v21, %v891_v38  ;;  %v1239_v10 = vadd.f32 %v1175_v29, %v4989_v15  ;;  %v5015_v42 = vadd.f32 %v844_v56, %v796_v19  ;;  %2376 = vmatmul.bf16.gmra.mxu0 %v4810_v22  ;;  %v4204_v38 = vld [vmem:[#allocation8 + $0x1e4] sm:$0xf] }
 0x14a   :  { %2425 = vmatmul.bf16.gmra.mxu1 %v4823_v2  ;;  %v3671_v20 = vor.u32 %v4172_v4, %v3668_v12  ;;  %2657 = vmatpush.bf16.msrb.mxu2 %v3927_v35  ;;  %v4055_v56 = vor.u32 %v4268_v62, %v4052_v52  ;;  %v3799_v36 = vor.u32 %v4204_v38, %v3796_v28  ;;  %v983_v62 = vmul.f32 0.5, %v4989_v15 }
 0x14b   :  { %v1300_v43 = vmul.f32 0.7978846, %v1236_v47  ;;  %v1048_v54 = vmul.f32 0.044715, %v5012_v53  ;;  %v1303_v5 = vmul.f32 0.7978846, %v1239_v10  ;;  %v4331_v21 = vpop.eup %4330 }
 0x14c   :  { %v1051_v59 = vmul.f32 0.044715, %v5015_v42  ;;  %v4333_v57 = vpop.eup %4332  ;;  %2559 = vmatpush.bf16.msrb.mxu0 %v3671_v20  ;;  %v1010_v10 = vmul.f32 0.5, %v4857_v49  ;;  %2706 = vmatpush.bf16.msrb.mxu3 %v4055_v56 }
 0x14d   :  { %v1112_v3 = vmul.f32 %v1048_v54, %v5012_v53  ;;  %4334 = vtanh.f32 %v1303_v5  ;;  %v1150_v54 = vmul.f32 %v1086_v1, %v5009_v13  ;;  %2608 = vmatpush.bf16.msrb.mxu1 %v3799_v36  ;;  %v1458_v35 = vadd.f32 1.0, %v4333_v57 }
 0x14e   :  { %v1115_v6 = vmul.f32 %v1051_v59, %v5015_v42  ;;  %v893_v26 = vpop.f32.mrf.mxu2  ;;  %4336 = vtanh.f32 %v1300_v43  ;;  %v797_v25 = vpop.f32.mrf.mxu0  ;;  %v5037_v43 = vmul.f32 0.5, %v4974_v27  ;;  %v1274_v27 = vadd.f32 %v1210_v33, %v4892_v40 }
 0x14f   :  { %v1176_v18 = vmul.f32 %v1112_v3, %v5012_v53  ;;  %v894_v41 = vadd.f32 %v893_v26, %v4977_v45  ;;  %v942_v24 = vpop.f32.mrf.mxu3  ;;  %v798_v29 = vadd.f32 %v797_v25, %v4952_v39  ;;  %v1427_v3 = vadd.f32 1.0, %v4331_v21 }
 0x150   :  { %v1179_v44 = vmul.f32 %v1115_v6, %v5015_v42  ;;  %v846_v19 = vpop.f32.mrf.mxu1  ;;  %v5045_v6 = vmul.f32 0.5, %v4892_v40  ;;  %v979_v26 = vmul.f32 0.5, %v4966_v16  ;;  %v5056_v15 = vmul.f32 0.7978846, %v1274_v27 }
 0x151   :  { %v1240_v34 = vadd.f32 %v1176_v18, %v5012_v53  ;;  %v5033_v47 = vadd.f32 %v942_v24, %v894_v41  ;;  %v5041_v59 = vadd.f32 %v846_v19, %v798_v29  ;;  %v1214_v18 = vmul.f32 %v1150_v54, %v5009_v13 }
 0x152   :  { %v1243_v5 = vadd.f32 %v1179_v44, %v5015_v42  ;;  %v1491_v38 = vmul.f32 %v1427_v3, %v979_v26  ;;  %v725_v21 = vadd.f32 %v4926_v31, %v4701_v0  ;;  %v980_v54 = vmul.f32 0.5, %v4986_v60 }
 0x153   :  { %v1304_v58 = vmul.f32 0.7978846, %v1240_v34  ;;  %v1052_v4 = vmul.f32 0.044715, %v5033_v47  ;;  %v4335_v49 = vpop.eup %4334  ;;  %v1055_v1 = vmul.f32 0.044715, %v5041_v59  ;;  %v1278_v60 = vadd.f32 %v1214_v18, %v5009_v13 }
 0x154   :  { %v4337_v12 = vpop.eup %4336  ;;  %v1431_v52 = vadd.f32 1.0, %v4335_v49  ;;  %v1307_v41 = vmul.f32 0.7978846, %v1243_v5  ;;  %v5075_v49 = vmul.f32 %v1458_v35, %v1010_v10  ;;  %v984_v26 = vmul.f32 0.5, %v5012_v53  ;;  %v4168_v10 = vld [vmem:[#allocation8 + $0xc4] sm:$0xf] }
 0x155   :  { %4338 = vtanh.f32 %v1304_v58  ;;  %v1116_v9 = vmul.f32 %v1052_v4, %v5033_v47  ;;  %v1119_v24 = vmul.f32 %v1055_v1, %v5041_v59  ;;  %v1428_v56 = vadd.f32 1.0, %v4337_v12  ;;  %v4232_v4 = vld [vmem:[#allocation8 + $0x2c4] sm:$0xf] }
 0x156   :  { %v895_v25 = vpop.f32.mrf.mxu2  ;;  %4340 = vtanh.f32 %v1334_v61  ;;  %v800_v20 = vpop.f32.mrf.mxu0  ;;  %v1495_v28 = vmul.f32 %v1431_v52, %v983_v62  ;;  %v5082_v52 = vadd.f32 %v4928_v8, %v725_v21 }
 0x157   :  { %v1180_v40 = vmul.f32 %v1116_v9, %v5033_v47  ;;  %v896_v16 = vadd.f32 %v895_v25, %v4977_v45  ;;  %v944_v33 = vpop.f32.mrf.mxu3  ;;  %v1183_v44 = vmul.f32 %v1119_v24, %v5041_v59  ;;  %v801_v29 = vadd.f32 %v800_v20, %v4952_v39  ;;  %v3908_v25 = vld [vmem:[#allocation8 + $0x2d0] sm:$0xf0] }
 0x158   :  { %v849_v19 = vpop.f32.mrf.mxu1  ;;  %v5065_v34 = vpack.c.bf16 %v1495_v28, %v1491_v38  ;;  %4342 = vtanh.f32 %v1307_v41  ;;  %v1090_v9 = vmul.f32 0.044715, %v4923_v14  ;;  %v1492_v24 = vmul.f32 %v1428_v56, %v980_v54  ;;  %v4036_v20 = vld [vmem:[#allocation8 + $0x3d0] sm:$0xf0] }
 0x159   :  { %v1244_v36 = vadd.f32 %v1180_v40, %v5033_v47  ;;  %v5063_v57 = vadd.f32 %v944_v33, %v896_v16  ;;  %v5068_v5 = vadd.f32 %v849_v19, %v801_v29  ;;  %2381 = vmatmul.bf16.gmra.mxu0 %v4850_v50  ;;  %v1247_v31 = vadd.f32 %v1183_v44, %v5041_v59  ;;  %v3652_v16 = vld [vmem:[#allocation8 + $0xd0] sm:$0xf0]  ;;  %v4264_v33 = vld [vmem:[#allocation8 + $0x3c4] sm:$0xf] }
 0x15a   :  { %5837 = vst [vmem:[#allocation20_spill] sm:$0xff] %v5065_v34  ;;  %2430 = vmatmul.bf16.gmra.mxu1 %v4863_v23  ;;  %2469 = vmatmul.bf16.vlgmr.msra.gmra.mxu2 %v5065_v34  ;;  %v3911_v53 = vor.u32 %v4232_v4, %v3908_v25  ;;  %v3655_v44 = vor.u32 %v4168_v10, %v3652_v16  ;;  %v4200_v29 = vld [vmem:[#allocation8 + $0x1c4] sm:$0xf]  ;;  %v3780_v19 = vld [vmem:[#allocation8 + $0x1d0] sm:$0xf0]  ;;  %v987_v16 = vmul.f32 0.5, %v5015_v42 }
 0x15b   :  { %v4339_v61 = vpop.eup %4338  ;;  %v1308_v3 = vmul.f32 0.7978846, %v1244_v36  ;;  %v1056_v58 = vmul.f32 0.044715, %v5063_v57  ;;  %v1059_v1 = vmul.f32 0.044715, %v5068_v5 }
 0x15c   :  { %v4341_v27 = vpop.eup %4340  ;;  %v1432_v12 = vadd.f32 1.0, %v4339_v61  ;;  %v1311_v62 = vmul.f32 0.7978846, %v1247_v31  ;;  %2658 = vmatpush.bf16.msrb.mxu2 %v3911_v53  ;;  %2560 = vmatpush.bf16.msrb.mxu0 %v3655_v44 }
 0x15d   :  { %v1120_v41 = vmul.f32 %v1056_v58, %v5063_v57  ;;  %v1123_v35 = vmul.f32 %v1059_v1, %v5068_v5  ;;  %v4039_v58 = vor.u32 %v4264_v33, %v4036_v20  ;;  %v3783_v1 = vor.u32 %v4200_v29, %v3780_v19 }
 0x15e   :  { %v898_v18 = vpop.f32.mrf.mxu2  ;;  %v1496_v40 = vmul.f32 %v1432_v12, %v984_v26  ;;  %4344 = vtanh.f32 %v1311_v62  ;;  %v802_v21 = vpop.f32.mrf.mxu0  ;;  %v991_v33 = vmul.f32 0.5, %v5041_v59 }
 0x15f   :  { %v1184_v38 = vmul.f32 %v1120_v41, %v5063_v57  ;;  %v899_v28 = vadd.f32 %v898_v18, %v4977_v45  ;;  %v947_v8 = vpop.f32.mrf.mxu3  ;;  %4346 = vtanh.f32 %v1308_v3  ;;  %v4343_v56 = vpop.eup %4342  ;;  %v1187_v36 = vmul.f32 %v1123_v35, %v5068_v5  ;;  %2707 = vmatpush.bf16.msrb.mxu3 %v4039_v58  ;;  %2609 = vmatpush.bf16.msrb.mxu1 %v3783_v1 }
 0x160   :  { %v803_v54 = vadd.f32 %v802_v21, %v4952_v39  ;;  %v851_v31 = vpop.f32.mrf.mxu1  ;;  %v5090_v61 = vpack.c.bf16 %v1496_v40, %v1492_v24  ;;  %v1462_v3 = vadd.f32 1.0, %v4341_v27  ;;  %v5100_v41 = vmul.f32 0.5, %v5009_v13 }
 0x161   :  { %v5092_v4 = vadd.f32 %v947_v8, %v899_v28  ;;  %v1248_v26 = vadd.f32 %v1184_v38, %v5063_v57  ;;  %v1251_v12 = vadd.f32 %v1187_v36, %v5068_v5  ;;  %v1342_v24 = vmul.f32 0.7978846, %v1278_v60 }
 0x162   :  { %5838 = vst [vmem:[#allocation21_spill] sm:$0xff] %v5090_v61  ;;  %v5096_v62 = vadd.f32 %v851_v31, %v803_v54  ;;  %2518 = vmatmul.bf16.vlgmr.msra.gmra.mxu3 %v5090_v61  ;;  %v1435_v10 = vadd.f32 1.0, %v4343_v56  ;;  %4348 = vtanh.f32 %v5056_v15  ;;  %v1154_v27 = vmul.f32 %v1090_v9, %v4923_v14 }
 0x163   :  { %v1060_v25 = vmul.f32 0.044715, %v5092_v4  ;;  %v1312_v35 = vmul.f32 0.7978846, %v1248_v26  ;;  %v1094_v40 = vmul.f32 0.044715, %v5082_v52  ;;  %v1526_v8 = vmul.f32 %v1462_v3, %v5037_v43 }
 0x164   :  { %v4345_v18 = vpop.eup %4344  ;;  %v1063_v53 = vmul.f32 0.044715, %v5096_v62  ;;  %v1315_v38 = vmul.f32 0.7978846, %v1251_v12  ;;  %v1499_v29 = vmul.f32 %v1435_v10, %v987_v16  ;;  %v1218_v56 = vmul.f32 %v1154_v27, %v4923_v14 }
 0x165   :  { %v4347_v13 = vpop.eup %4346  ;;  %v1124_v60 = vmul.f32 %v1060_v25, %v5092_v4  ;;  %v1439_v20 = vadd.f32 1.0, %v4345_v18  ;;  %4350 = vtanh.f32 %v1312_v35  ;;  %v1158_v59 = vmul.f32 %v1094_v40, %v5082_v52  ;;  %v4228_v40 = vld [vmem:[#allocation8 + $0x2a4] sm:$0xf] }
 0x166   :  { %v1127_v28 = vmul.f32 %v1063_v53, %v5096_v62  ;;  %v900_v15 = vpop.f32.mrf.mxu2  ;;  %4352 = vtanh.f32 %v1342_v24  ;;  %v805_v42 = vpop.f32.mrf.mxu0  ;;  %v1436_v3 = vadd.f32 1.0, %v4347_v13  ;;  %v988_v24 = vmul.f32 0.5, %v5033_v47 }
 0x167   :  { %v1188_v9 = vmul.f32 %v1124_v60, %v5092_v4  ;;  %v901_v21 = vadd.f32 %v900_v15, %v4977_v45  ;;  %v949_v44 = vpop.f32.mrf.mxu3  ;;  %v1503_v19 = vmul.f32 %v1439_v20, %v991_v33  ;;  %v806_v54 = vadd.f32 %v805_v42, %v4952_v39  ;;  %v3892_v15 = vld [vmem:[#allocation8 + $0x2b0] sm:$0xf0] }
 0x168   :  { %v1191_v36 = vmul.f32 %v1127_v28, %v5096_v62  ;;  %v854_v31 = vpop.f32.mrf.mxu1  ;;  %v4349_v58 = vpop.eup %4348  ;;  %4354 = vtanh.f32 %v1315_v38  ;;  %v5132_v27 = vpack.c.bf16 %v1526_v8, %v5075_v49  ;;  %v992_v47 = vmul.f32 0.5, %v5063_v57  ;;  %v3636_v42 = vld [vmem:[#allocation8 + $0xb0] sm:$0xf0] }
 0x169   :  { %v1252_v43 = vadd.f32 %v1188_v9, %v5092_v4  ;;  %v5119_v26 = vadd.f32 %v949_v44, %v901_v21  ;;  %v5121_v1 = vpack.c.bf16 %v1503_v19, %v1499_v29  ;;  %v5123_v12 = vadd.f32 %v854_v31, %v806_v54  ;;  %2386 = vmatmul.bf16.gmra.mxu0 %v4884_v7  ;;  %v4164_v9 = vld [vmem:[#allocation8 + $0xa4] sm:$0xf]  ;;  %v4020_v57 = vld [vmem:[#allocation8 + $0x3b0] sm:$0xf0] }
 0x16a   :  { %v1255_v25 = vadd.f32 %v1191_v36, %v5096_v62  ;;  %2435 = vmatmul.bf16.gmra.mxu1 %v4894_v37  ;;  %v1282_v33 = vadd.f32 %v1218_v56, %v4923_v14  ;;  %v1222_v20 = vmul.f32 %v1158_v59, %v5082_v52  ;;  %v1500_v28 = vmul.f32 %v1436_v3, %v988_v24  ;;  %v4260_v29 = vld [vmem:[#allocation8 + $0x3a4] sm:$0xf] }
 0x16b   :  { %v4351_v10 = vpop.eup %4350  ;;  %v1316_v35 = vmul.f32 0.7978846, %v1252_v43  ;;  %v1064_v18 = vmul.f32 0.044715, %v5119_v26  ;;  %2474 = vmatmul.bf16.gmra.mxu2 %v5121_v1  ;;  %v1067_v16 = vmul.f32 0.044715, %v5123_v12  ;;  %v3895_v44 = vor.u32 %v4228_v40, %v3892_v15 }
 0x16c   :  { %v4353_v53 = vpop.eup %4352  ;;  %v1440_v13 = vadd.f32 1.0, %v4351_v10  ;;  %v1319_v60 = vmul.f32 0.7978846, %v1255_v25  ;;  %v3639_v54 = vor.u32 %v4164_v9, %v3636_v42  ;;  %v4196_v31 = vld [vmem:[#allocation8 + $0x1a4] sm:$0xf]  ;;  %v4023_v40 = vor.u32 %v4260_v29, %v4020_v57 }
 0x16d   :  { %v1128_v38 = vmul.f32 %v1064_v18, %v5119_v26  ;;  %v1131_v49 = vmul.f32 %v1067_v16, %v5123_v12  ;;  %v3764_v43 = vld [vmem:[#allocation8 + $0x1b0] sm:$0xf0]  ;;  %2659 = vmatpush.bf16.msrb.mxu2 %v3895_v44  ;;  %v995_v42 = vmul.f32 0.5, %v5068_v5  ;;  %v1286_v29 = vadd.f32 %v1222_v20, %v5082_v52 }
 0x16e   :  { %v903_v8 = vpop.f32.mrf.mxu2  ;;  %v1504_v21 = vmul.f32 %v1440_v13, %v992_v47  ;;  %4356 = vtanh.f32 %v1319_v60  ;;  %v807_v59 = vpop.f32.mrf.mxu0  ;;  %2561 = vmatpush.bf16.msrb.mxu0 %v3639_v54  ;;  %v3767_v13 = vor.u32 %v4196_v31, %v3764_v43  ;;  %v1346_v60 = vmul.f32 0.7978846, %v1282_v33  ;;  %2708 = vmatpush.bf16.msrb.mxu3 %v4023_v40 }
 0x16f   :  { %v1192_v19 = vmul.f32 %v1128_v38, %v5119_v26  ;;  %v904_v56 = vadd.f32 %v903_v8, %v4977_v45  ;;  %v952_v36 = vpop.f32.mrf.mxu3  ;;  %4358 = vtanh.f32 %v1316_v35  ;;  %v4355_v3 = vpop.eup %4354  ;;  %v1195_v24 = vmul.f32 %v1131_v49, %v5123_v12 }
 0x170   :  { %v808_v25 = vadd.f32 %v807_v59, %v4952_v39  ;;  %v856_v10 = vpop.f32.mrf.mxu1  ;;  %v5144_v18 = vpack.c.bf16 %v1504_v21, %v1500_v28  ;;  %v5150_v35 = vmul.f32 0.5, %v4923_v14  ;;  %v5156_v28 = vadd.f32 1.0, %v4349_v58  ;;  %2610 = vmatpush.bf16.msrb.mxu1 %v3767_v13 }
 0x171   :  { %v5146_v16 = vadd.f32 %v952_v36, %v904_v56  ;;  %v1256_v47 = vadd.f32 %v1192_v19, %v5119_v26  ;;  %v1259_v38 = vadd.f32 %v1195_v24, %v5123_v12  ;;  %v1443_v49 = vadd.f32 1.0, %v4355_v3 }
 0x172   :  { %v5153_v15 = vadd.f32 %v856_v10, %v808_v25  ;;  %2523 = vmatmul.bf16.gmra.mxu3 %v5144_v18  ;;  %v1470_v21 = vadd.f32 1.0, %v4353_v53  ;;  %v730_v14 = vadd.f32 %v4957_v11, %v4701_v0  ;;  %v999_v19 = vmul.f32 0.5, %v5096_v62 }
 0x173   :  { %v1068_v9 = vmul.f32 0.044715, %v5146_v16  ;;  %v1320_v8 = vmul.f32 0.7978846, %v1256_v47  ;;  %v1098_v36 = vmul.f32 0.044715, %v4946_v55  ;;  %v1507_v31 = vmul.f32 %v1443_v49, %v995_v42 }
 0x174   :  { %v4357_v44 = vpop.eup %4356  ;;  %v1071_v33 = vmul.f32 0.044715, %v5153_v15  ;;  %v1323_v53 = vmul.f32 0.7978846, %v1259_v38  ;;  %v5171_v3 = vadd.f32 %v4962_v32, %v730_v14  ;;  %v1350_v10 = vmul.f32 0.7978846, %v1286_v29 }
 0x175   :  { %v4359_v57 = vpop.eup %4358  ;;  %v1132_v58 = vmul.f32 %v1068_v9, %v5146_v16  ;;  %v1447_v56 = vadd.f32 1.0, %v4357_v44  ;;  %4360 = vtanh.f32 %v1320_v8  ;;  %v996_v32 = vmul.f32 0.5, %v5092_v4  ;;  %v4224_v42 = vld [vmem:[#allocation8 + $0x284] sm:$0xf] }
 0x176   :  { %v1135_v59 = vmul.f32 %v1071_v33, %v5153_v15  ;;  %v905_v54 = vpop.f32.mrf.mxu2  ;;  %4362 = vtanh.f32 %v1346_v60  ;;  %v810_v20 = vpop.f32.mrf.mxu0  ;;  %v1444_v60 = vadd.f32 1.0, %v4359_v57  ;;  %v1162_v8 = vmul.f32 %v1098_v36, %v4946_v55 }
 0x177   :  { %v1196_v0 = vmul.f32 %v1132_v58, %v5146_v16  ;;  %v906_v11 = vadd.f32 %v905_v54, %v4977_v45  ;;  %v954_v5 = vpop.f32.mrf.mxu3  ;;  %v1511_v43 = vmul.f32 %v1447_v56, %v999_v19  ;;  %v811_v24 = vadd.f32 %v810_v20, %v4952_v39  ;;  %v4160_v54 = vld [vmem:[#allocation8 + $0x84] sm:$0xf] }
 0x178   :  { %v1199_v62 = vmul.f32 %v1135_v59, %v5153_v15  ;;  %v859_v25 = vpop.f32.mrf.mxu1  ;;  %4364 = vtanh.f32 %v1323_v53  ;;  %v1534_v33 = vmul.f32 %v1470_v21, %v5100_v41  ;;  %v1000_v57 = vmul.f32 0.5, %v5119_v26  ;;  %v3876_v59 = vld [vmem:[#allocation8 + $0x290] sm:$0xf0]  ;;  %v4256_v20 = vld [vmem:[#allocation8 + $0x384] sm:$0xf] }
 0x179   :  { %v1260_v40 = vadd.f32 %v1196_v0, %v5146_v16  ;;  %v5176_v47 = vadd.f32 %v954_v5, %v906_v11  ;;  %v5178_v13 = vpack.c.bf16 %v1511_v43, %v1507_v31  ;;  %v5180_v38 = vadd.f32 %v859_v25, %v811_v24  ;;  %2391 = vmatmul.bf16.gmra.mxu0 %v4917_v30  ;;  %v3620_v5 = vld [vmem:[#allocation8 + $0x90] sm:$0xf0] }
 0x17a   :  { %v1263_v9 = vadd.f32 %v1199_v62, %v5153_v15  ;;  %2440 = vmatmul.bf16.gmra.mxu1 %v5132_v27  ;;  %v1102_v56 = vmul.f32 0.044715, %v5171_v3  ;;  %v1508_v53 = vmul.f32 %v1444_v60, %v996_v32  ;;  %4366 = vtanh.f32 %v1350_v10  ;;  %v4004_v31 = vld [vmem:[#allocation8 + $0x390] sm:$0xf0] }
 0x17b   :  { %v4361_v49 = vpop.eup %4360  ;;  %v1324_v44 = vmul.f32 0.7978846, %v1260_v40  ;;  %v1072_v14 = vmul.f32 0.044715, %v5176_v47  ;;  %2479 = vmatmul.bf16.gmra.mxu2 %v5178_v13  ;;  %v1075_v4 = vmul.f32 0.044715, %v5180_v38  ;;  %v3879_v11 = vor.u32 %v4224_v42, %v3876_v59 }
 0x17c   :  { %v5190_v29 = vpop.eup %4362  ;;  %v1448_v58 = vadd.f32 1.0, %v4361_v49  ;;  %v1327_v19 = vmul.f32 0.7978846, %v1263_v9  ;;  %v3623_v25 = vor.u32 %v4160_v54, %v3620_v5  ;;  %v4192_v40 = vld [vmem:[#allocation8 + $0x184] sm:$0xf]  ;;  %v4007_v42 = vor.u32 %v4256_v20, %v4004_v31 }
 0x17d   :  { %v1136_v36 = vmul.f32 %v1072_v14, %v5176_v47  ;;  %v1139_v0 = vmul.f32 %v1075_v4, %v5180_v38  ;;  %v3748_v60 = vld [vmem:[#allocation8 + $0x190] sm:$0xf0]  ;;  %2660 = vmatpush.bf16.msrb.mxu2 %v3879_v11  ;;  %v1007_v5 = vmul.f32 0.5, %v5153_v15 }
 0x17e   :  { %v908_v41 = vpop.f32.mrf.mxu2  ;;  %v1512_v21 = vmul.f32 %v1448_v58, %v1000_v57  ;;  %4368 = vtanh.f32 %v1327_v19  ;;  %v812_v24 = vpop.f32.mrf.mxu0  ;;  %v1530_v57 = vmul.f32 %v5156_v28, %v5045_v6  ;;  %2562 = vmatpush.bf16.msrb.mxu0 %v3623_v25  ;;  %v3751_v58 = vor.u32 %v4192_v40, %v3748_v60  ;;  %2709 = vmatpush.bf16.msrb.mxu3 %v4007_v42 }
 0x17f   :  { %v1200_v26 = vmul.f32 %v1136_v36, %v5176_v47  ;;  %v909_v43 = vadd.f32 %v908_v41, %v4977_v45  ;;  %v957_v62 = vpop.f32.mrf.mxu3  ;;  %4370 = vtanh.f32 %v1324_v44  ;;  %v4365_v10 = vpop.eup %4364  ;;  %v1203_v32 = vmul.f32 %v1139_v0, %v5180_v38 }
 0x180   :  { %v813_v9 = vadd.f32 %v812_v24, %v4952_v39  ;;  %v861_v49 = vpop.f32.mrf.mxu1  ;;  %v5201_v14 = vpack.c.bf16 %v1512_v21, %v1508_v53  ;;  %v1226_v19 = vmul.f32 %v1162_v8, %v4946_v55  ;;  %v1166_v36 = vmul.f32 %v1102_v56, %v5171_v3  ;;  %v4367_v53 = vpop.eup %4366  ;;  %2611 = vmatpush.bf16.msrb.mxu1 %v3751_v58 }
 0x181   :  { %v5203_v4 = vadd.f32 %v957_v62, %v909_v43  ;;  %v1264_v44 = vadd.f32 %v1200_v26, %v5176_v47  ;;  %v1267_v59 = vadd.f32 %v1203_v32, %v5180_v38  ;;  %v1451_v41 = vadd.f32 1.0, %v4365_v10 }
 0x182   :  { %v5211_v54 = vadd.f32 %v861_v49, %v813_v9  ;;  %2528 = vmatmul.bf16.gmra.mxu3 %v5201_v14  ;;  %v1030_v6 = vmul.f32 0.5, %v5082_v52  ;;  %v5217_v11 = vpack.c.bf16 %v1534_v33, %v1530_v57  ;;  %v1003_v56 = vmul.f32 0.5, %v5123_v12 }
 0x183   :  { %v1076_v0 = vmul.f32 0.044715, %v5203_v4  ;;  %v1328_v21 = vmul.f32 0.7978846, %v1264_v44  ;;  %v1331_v31 = vmul.f32 0.7978846, %v1267_v59  ;;  %v1290_v62 = vadd.f32 %v1226_v19, %v4946_v55 }
 0x184   :  { %v4369_v28 = vpop.eup %4368  ;;  %v1079_v8 = vmul.f32 0.044715, %v5211_v54  ;;  %v1230_v24 = vmul.f32 %v1166_v36, %v5171_v3  ;;  %v1474_v33 = vadd.f32 1.0, %v5190_v29  ;;  %v1515_v10 = vmul.f32 %v1451_v41, %v1003_v56 }
 0x185   :  { %v4371_v20 = vpop.eup %4370  ;;  %v1140_v26 = vmul.f32 %v1076_v0, %v5203_v4  ;;  %v1455_v43 = vadd.f32 1.0, %v4369_v28  ;;  %4372 = vtanh.f32 %v1328_v21  ;;  %v1478_v44 = vadd.f32 1.0, %v4367_v53 }
 0x186   :  { %v1143_v52 = vmul.f32 %v1079_v8, %v5211_v54  ;;  %v910_v25 = vpop.f32.mrf.mxu2  ;;  %v815_v60 = vpop.f32.mrf.mxu0  ;;  %v1452_v57 = vadd.f32 1.0, %v4371_v20  ;;  %4374 = vtanh.f32 %v1331_v31  ;;  %v1354_v36 = vmul.f32 0.7978846, %v1290_v62  ;;  %v4220_v8 = vld [vmem:[#allocation8 + $0x264] sm:$0xf] }
 0x187   :  { %v1204_v40 = vmul.f32 %v1140_v26, %v5203_v4  ;;  %v911_v12 = vadd.f32 %v910_v25, %v4977_v45  ;;  %v959_v15 = vpop.f32.mrf.mxu3  ;;  %v1519_v32 = vmul.f32 %v1455_v43, %v1007_v5  ;;  %v816_v49 = vadd.f32 %v815_v60, %v4952_v39  ;;  %v4156_v25 = vld [vmem:[#allocation8 + $0x64] sm:$0xf] }
 0x188   :  { %v1207_v9 = vmul.f32 %v1143_v52, %v5211_v54  ;;  %v864_v42 = vpop.f32.mrf.mxu1  ;;  %v1004_v0 = vmul.f32 0.5, %v5146_v16  ;;  %v1294_v56 = vadd.f32 %v1230_v24, %v5171_v3  ;;  %v1008_v20 = vmul.f32 0.5, %v5176_v47  ;;  %v3860_v52 = vld [vmem:[#allocation8 + $0x270] sm:$0xf0] }
 0x189   :  { %v1268_v58 = vadd.f32 %v1204_v40, %v5203_v4  ;;  %v5231_v19 = vadd.f32 %v959_v15, %v911_v12  ;;  %v5233_v29 = vpack.c.bf16 %v1519_v32, %v1515_v10  ;;  %v5235_v59 = vadd.f32 %v864_v42, %v816_v49  ;;  %2396 = vmatmul.bf16.gmra.mxu0 %v4938_v51  ;;  %v3604_v24 = vld [vmem:[#allocation8 + $0x70] sm:$0xf0]  ;;  %v4252_v10 = vld [vmem:[#allocation8 + $0x364] sm:$0xf] }
 0x18a   :  { %v1271_v41 = vadd.f32 %v1207_v9, %v5211_v54  ;;  %2445 = vmatmul.bf16.gmra.mxu1 %v5217_v11  ;;  %v1516_v43 = vmul.f32 %v1452_v57, %v1004_v0  ;;  %v1542_v62 = vmul.f32 %v1478_v44, %v1030_v6  ;;  %v3863_v60 = vor.u32 %v4220_v8, %v3860_v52  ;;  %v3988_v32 = vld [vmem:[#allocation8 + $0x370] sm:$0xf0]  ;;  %v4188_v44 = vld [vmem:[#allocation8 + $0x164] sm:$0xf] }
 0x18b   :  { %v4373_v21 = vpop.eup %4372  ;;  %v1332_v28 = vmul.f32 0.7978846, %v1268_v58  ;;  %v1080_v53 = vmul.f32 0.044715, %v5231_v19  ;;  %2484 = vmatmul.bf16.gmra.mxu2 %v5233_v29  ;;  %v1083_v5 = vmul.f32 0.044715, %v5235_v59  ;;  %v3607_v6 = vor.u32 %v4156_v25, %v3604_v24 }
 0x18c   :  { %v1456_v31 = vadd.f32 1.0, %v4373_v21  ;;  %v1335_v26 = vmul.f32 0.7978846, %v1271_v41  ;;  %v4375_v9 = vpop.eup %4374  ;;  %v3732_v58 = vld [vmem:[#allocation8 + $0x170] sm:$0xf0]  ;;  %2661 = vmatpush.bf16.msrb.mxu2 %v3863_v60  ;;  %v3991_v8 = vor.u32 %v4252_v10, %v3988_v32  ;;  %v1011_v24 = vmul.f32 0.5, %v5180_v38 }
 0x18d   :  { %v1144_v16 = vmul.f32 %v1080_v53, %v5231_v19  ;;  %4376 = vtanh.f32 %v1332_v28  ;;  %v1147_v40 = vmul.f32 %v1083_v5, %v5235_v59  ;;  %v1358_v0 = vmul.f32 0.7978846, %v1294_v56  ;;  %2563 = vmatpush.bf16.msrb.mxu0 %v3607_v6 }
 0x18e   :  { %v913_v12 = vpop.f32.mrf.mxu2  ;;  %v1520_v15 = vmul.f32 %v1456_v31, %v1008_v20  ;;  %4378 = vtanh.f32 %v1335_v26  ;;  %v817_v57 = vpop.f32.mrf.mxu0  ;;  %v1538_v20 = vmul.f32 %v1474_v33, %v5150_v35  ;;  %v3735_v26 = vor.u32 %v4188_v44, %v3732_v58  ;;  %2710 = vmatpush.bf16.msrb.mxu3 %v3991_v8  ;;  %v4152_v35 = vld [vmem:[#allocation8 + $0x44] sm:$0xf]  ;;  %v3716_v44 = vld [vmem:[#allocation8 + $0x150] sm:$0xf0] }
 0x18f   :  { %v1208_v47 = vmul.f32 %v1144_v16, %v5231_v19  ;;  %v914_v49 = vadd.f32 %v913_v12, %v4977_v45  ;;  %v962_v42 = vpop.f32.mrf.mxu3  ;;  %v1211_v41 = vmul.f32 %v1147_v40, %v5235_v59  ;;  %v818_v21 = vadd.f32 %v817_v57, %v4952_v39  ;;  %v3572_v8 = vld [vmem:[#allocation8 + $0x30] sm:$0xf0] }
 0x190   :  { %v866_v28 = vpop.f32.mrf.mxu1  ;;  %v5252_v53 = vpack.c.bf16 %v1520_v15, %v1516_v43  ;;  %v1459_v52 = vadd.f32 1.0, %v4375_v9  ;;  %v5263_v40 = vpack.c.bf16 %v1542_v62, %v1538_v20  ;;  %2612 = vmatpush.bf16.msrb.mxu1 %v3735_v26  ;;  %4380 = vtanh.f32 %v1354_v36  ;;  %v3588_v62 = vld [vmem:[#allocation8 + $0x50] sm:$0xf0]  ;;  %v4180_v20 = vld [vmem:[#allocation8 + $0x124] sm:$0xf] }
 0x191   :  { %v5254_v5 = vadd.f32 %v962_v42, %v914_v49  ;;  %v1272_v31 = vadd.f32 %v1208_v47, %v5231_v19  ;;  %v1275_v16 = vadd.f32 %v1211_v41, %v5235_v59  ;;  %v5259_v56 = vadd.f32 %v866_v28, %v818_v21  ;;  %v4184_v47 = vld [vmem:[#allocation8 + $0x144] sm:$0xf] }
 0x192   :  { %5839 = vst [vmem:[#allocation22_spill] sm:$0xff] %v5252_v53  ;;  %2533 = vmatmul.bf16.gmra.mxu3 %v5252_v53  ;;  %4382 = vtanh.f32 %v1358_v0  ;;  %v1015_v32 = vmul.f32 0.5, %v5211_v54  ;;  %v1523_v36 = vmul.f32 %v1459_v52, %v1011_v24  ;;  %v3591_v6 = vor.u32 %v4152_v35, %v3588_v62  ;;  %v4148_v54 = vld [vmem:[#allocation8 + $0x24] sm:$0xf] }
 0x193   :  { %v4377_v25 = vpop.eup %4376  ;;  %v1084_v43 = vmul.f32 0.044715, %v5254_v5  ;;  %v1336_v12 = vmul.f32 0.7978846, %v1272_v31  ;;  %v1339_v15 = vmul.f32 0.7978846, %v1275_v16  ;;  %v3719_v28 = vor.u32 %v4184_v47, %v3716_v44 }
 0x194   :  { %v4379_v33 = vpop.eup %4378  ;;  %v1087_v60 = vmul.f32 0.044715, %v5259_v56  ;;  %v1460_v57 = vadd.f32 1.0, %v4377_v25  ;;  %2564 = vmatpush.bf16.msrb.mxu0 %v3591_v6  ;;  %v3575_v52 = vor.u32 %v4148_v54, %v3572_v8  ;;  %v3700_v25 = vld [vmem:[#allocation8 + $0x130] sm:$0xf0]  ;;  %v1016_v6 = vmul.f32 0.5, %v5231_v19 }
 0x195   :  { %v1148_v10 = vmul.f32 %v1084_v43, %v5254_v5  ;;  %v1463_v9 = vadd.f32 1.0, %v4379_v33  ;;  %4384 = vtanh.f32 %v1336_v12  ;;  %2613 = vmatpush.bf16.msrb.mxu1 %v3719_v28  ;;  %v3972_v19 = vld [vmem:[#allocation8 + $0x350] sm:$0xf0] }
 0x196   :  { %v1151_v49 = vmul.f32 %v1087_v60, %v5259_v56  ;;  %v915_v42 = vpop.f32.mrf.mxu2  ;;  %v820_v41 = vpop.f32.mrf.mxu0  ;;  %4386 = vtanh.f32 %v1339_v15  ;;  %v3703_v60 = vor.u32 %v4180_v20, %v3700_v25  ;;  %v5284_v15 = vmul.f32 0.5, %v4946_v55 }
 0x197   :  { %v1212_v58 = vmul.f32 %v1148_v10, %v5254_v5  ;;  %v916_v38 = vadd.f32 %v915_v42, %v4977_v45  ;;  %v964_v0 = vpop.f32.mrf.mxu3  ;;  %v1527_v21 = vmul.f32 %v1463_v9, %v1015_v32  ;;  %v821_v26 = vadd.f32 %v820_v41, %v4952_v39  ;;  %v4381_v43 = vpop.eup %4380  ;;  %v4216_v42 = vld [vmem:[#allocation8 + $0x244] sm:$0xf]  ;;  %v3844_v41 = vld [vmem:[#allocation8 + $0x250] sm:$0xf0] }
 0x198   :  { %v1215_v31 = vmul.f32 %v1151_v49, %v5259_v56  ;;  %v869_v16 = vpop.f32.mrf.mxu1  ;;  %v4383_v24 = vpop.eup %4382  ;;  %v1012_v32 = vmul.f32 0.5, %v5203_v4  ;;  %2565 = vmatpush.bf16.msrb.mxu0 %v3575_v52 }
 0x199   :  { %v1276_v12 = vadd.f32 %v1212_v58, %v5254_v5  ;;  %v5275_v35 = vadd.f32 %v964_v0, %v916_v38  ;;  %v5277_v33 = vpack.c.bf16 %v1527_v21, %v1523_v36  ;;  %v5279_v10 = vadd.f32 %v869_v16, %v821_v26  ;;  %2401 = vmatmul.bf16.gmra.mxu0 %v4969_v17  ;;  %v4248_v21 = vld [vmem:[#allocation8 + $0x344] sm:$0xf] }
 0x19a   :  { %v1279_v9 = vadd.f32 %v1215_v31, %v5259_v56  ;;  %2450 = vmatmul.bf16.gmra.mxu1 %v5263_v40  ;;  %v1524_v58 = vmul.f32 %v1460_v57, %v1012_v32  ;;  %v1038_v38 = vmul.f32 0.5, %v5171_v3  ;;  %v1486_v0 = vadd.f32 1.0, %v4383_v24  ;;  %v4144_v26 = vld [vmem:[#allocation8 + $0x4] sm:$0xf]  ;;  %v3684_v32 = vld [vmem:[#allocation8 + $0x110] sm:$0xf0] }
 0x19b   :  { %v4385_v62 = vpop.eup %4384  ;;  %v1340_v47 = vmul.f32 0.7978846, %v1276_v12  ;;  %v1088_v49 = vmul.f32 0.044715, %v5275_v35  ;;  %2489 = vmatmul.bf16.gmra.mxu2 %v5277_v33  ;;  %v1091_v36 = vmul.f32 0.044715, %v5279_v10  ;;  %2614 = vmatpush.bf16.msrb.mxu1 %v3703_v60  ;;  %v3847_v31 = vor.u32 %v4216_v42, %v3844_v41 }
 0x19c   :  { %v1464_v44 = vadd.f32 1.0, %v4385_v62  ;;  %v1343_v4 = vmul.f32 0.7978846, %v1279_v9  ;;  %v4387_v28 = vpop.eup %4386  ;;  %v3975_v3 = vor.u32 %v4248_v21, %v3972_v19  ;;  %v3556_v12 = vld [vmem:[#allocation8 + $0x10] sm:$0xf0]  ;;  %v1482_v41 = vadd.f32 1.0, %v4381_v43 }
 0x19d   :  { %v1152_v55 = vmul.f32 %v1088_v49, %v5275_v35  ;;  %v1155_v54 = vmul.f32 %v1091_v36, %v5279_v10  ;;  %v4176_v24 = vld [vmem:[#allocation8 + $0x104] sm:$0xf]  ;;  %2662 = vmatpush.bf16.msrb.mxu2 %v3847_v31  ;;  %v1467_v21 = vadd.f32 1.0, %v4387_v28 }
 0x19e   :  { %v918_v8 = vpop.f32.mrf.mxu2  ;;  %v1528_v20 = vmul.f32 %v1464_v44, %v1016_v6  ;;  %4388 = vtanh.f32 %v1343_v4  ;;  %v822_v25 = vpop.f32.mrf.mxu0  ;;  %2711 = vmatpush.bf16.msrb.mxu3 %v3975_v3  ;;  %v3559_v6 = vor.u32 %v4144_v26, %v3556_v12  ;;  %v3687_v44 = vor.u32 %v4176_v24, %v3684_v32  ;;  %v4244_v31 = vld [vmem:[#allocation8 + $0x324] sm:$0xf]  ;;  %v3956_v3 = vld [vmem:[#allocation8 + $0x330] sm:$0xf0] }
 0x19f   :  { %v1216_v16 = vmul.f32 %v1152_v55, %v5275_v35  ;;  %v919_v52 = vadd.f32 %v918_v8, %v4977_v45  ;;  %v967_v57 = vpop.f32.mrf.mxu3  ;;  %v1219_v60 = vmul.f32 %v1155_v54, %v5279_v10  ;;  %v823_v9 = vadd.f32 %v822_v25, %v4952_v39  ;;  %v4212_v54 = vld [vmem:[#allocation8 + $0x224] sm:$0xf] }
 0x1a0   :  { %v871_v62 = vpop.f32.mrf.mxu1  ;;  %v5299_v49 = vpack.c.bf16 %v1528_v20, %v1524_v58  ;;  %4390 = vtanh.f32 %v1340_v47  ;;  %v3828_v58 = vld [vmem:[#allocation8 + $0x230] sm:$0xf0]  ;;  %2566 = vmatpush.bf16.msrb.mxu0 %v3559_v6  ;;  %2615 = vmatpush.bf16.msrb.mxu1 %v3687_v44 }
 0x1a1   :  { %v5301_v42 = vadd.f32 %v967_v57, %v919_v52  ;;  %v1280_v36 = vadd.f32 %v1216_v16, %v5275_v35  ;;  %v1283_v4 = vadd.f32 %v1219_v60, %v5279_v10  ;;  %v5305_v55 = vadd.f32 %v871_v62, %v823_v9 }
 0x1a2   :  { %2538 = vmatmul.bf16.gmra.mxu3 %v5299_v49  ;;  %v3831_v20 = vor.u32 %v4212_v54, %v3828_v58  ;;  %v1550_v16 = vmul.f32 %v1486_v0, %v1038_v38  ;;  %v1019_v52 = vmul.f32 0.5, %v5235_v59  ;;  %v1023_v57 = vmul.f32 0.5, %v5259_v56 }
 0x1a3   :  { %v1092_v8 = vmul.f32 0.044715, %v5301_v42  ;;  %v1344_v47 = vmul.f32 0.7978846, %v1280_v36  ;;  %v1095_v26 = vmul.f32 0.044715, %v5305_v55  ;;  %v1546_v60 = vmul.f32 %v1482_v41, %v5284_v15 }
 0x1a4   :  { %v4389_v19 = vpop.eup %4388  ;;  %v1347_v25 = vmul.f32 0.7978846, %v1283_v4  ;;  %2663 = vmatpush.bf16.msrb.mxu2 %v3831_v20  ;;  %v3959_v9 = vor.u32 %v4244_v31, %v3956_v3  ;;  %v1531_v62 = vmul.f32 %v1467_v21, %v1019_v52 }
 0x1a5   :  { %v1156_v43 = vmul.f32 %v1092_v8, %v5301_v42  ;;  %v1471_v28 = vadd.f32 1.0, %v4389_v19  ;;  %4392 = vtanh.f32 %v1344_v47  ;;  %v1159_v24 = vmul.f32 %v1095_v26, %v5305_v55 }
 0x1a6   :  { %v4391_v12 = vpop.eup %4390  ;;  %v920_v32 = vpop.f32.mrf.mxu2  ;;  %v5319_v54 = vpack.c.bf16 %v1550_v16, %v1546_v60  ;;  %2712 = vmatpush.bf16.msrb.mxu3 %v3959_v9  ;;  %4394 = vtanh.f32 %v1347_v25  ;;  %v1020_v19 = vmul.f32 0.5, %v5254_v5  ;;  %v1024_v16 = vmul.f32 0.5, %v5275_v35 }
 0x1a7   :  { %v1220_v38 = vmul.f32 %v1156_v43, %v5301_v42  ;;  %v921_v59 = vadd.f32 %v920_v32, %v4977_v45  ;;  %v969_v0 = vpop.f32.mrf.mxu3  ;;  %v825_v56 = vpop.f32.mrf.mxu0  ;;  %v1535_v36 = vmul.f32 %v1471_v28, %v1023_v57  ;;  %v1223_v6 = vmul.f32 %v1159_v24, %v5305_v55 }
 0x1a8   :  { %v826_v44 = vadd.f32 %v825_v56, %v4952_v39  ;;  %v874_v4 = vpop.f32.mrf.mxu1  ;;  %v1468_v21 = vadd.f32 1.0, %v4391_v12 }
 0x1a9   :  { %v1284_v58 = vadd.f32 %v1220_v38, %v5301_v42  ;;  %v5322_v15 = vadd.f32 %v969_v0, %v921_v59  ;;  %v5324_v41 = vpack.c.bf16 %v1535_v36, %v1531_v62  ;;  %2406 = vmatmul.bf16.gmra.mxu0 %v5018_v48  ;;  %v1287_v47 = vadd.f32 %v1223_v6, %v5305_v55  ;;  %v5346_v36 = vld [vmem:[#allocation10] sm:$0xf] }
 0x1aa   :  { %v5326_v8 = vadd.f32 %v874_v4, %v826_v44  ;;  %2455 = vmatmul.bf16.gmra.mxu1 %v5319_v54  ;;  %v1532_v12 = vmul.f32 %v1468_v21, %v1020_v19  ;;  %v4208_v21 = vld [vmem:[#allocation8 + $0x204] sm:$0xf] }
 0x1ab   :  { %v4393_v20 = vpop.eup %4392  ;;  %v1096_v31 = vmul.f32 0.044715, %v5322_v15  ;;  %2494 = vmatmul.bf16.gmra.mxu2 %v5324_v41  ;;  %v1351_v57 = vmul.f32 0.7978846, %v1287_v47  ;;  %v1348_v25 = vmul.f32 0.7978846, %v1284_v58 }
 0x1ac   :  { %v1099_v26 = vmul.f32 0.044715, %v5326_v8  ;;  %v1472_v52 = vadd.f32 1.0, %v4393_v20  ;;  %v4395_v32 = vpop.eup %4394  ;;  %v3812_v47 = vld [vmem:[#allocation8 + $0x210] sm:$0xf0] }
 0x1ad   :  { %v1160_v43 = vmul.f32 %v1096_v31, %v5322_v15  ;;  %4396 = vtanh.f32 %v1351_v57  ;;  %v1475_v58 = vadd.f32 1.0, %v4395_v32  ;;  %v3815_v31 = vor.u32 %v4208_v21, %v3812_v47  ;;  %v4240_v19 = vld [vmem:[#allocation8 + $0x304] sm:$0xf] }
 0x1ae   :  { %v1163_v28 = vmul.f32 %v1099_v26, %v5326_v8  ;;  %v923_v3 = vpop.f32.mrf.mxu2  ;;  %v1536_v24 = vmul.f32 %v1472_v52, %v1024_v16  ;;  %4398 = vtanh.f32 %v1348_v25  ;;  %v5356_v57 = vperm.slane %v5346_v36, 0 }
 0x1af   :  { %v1224_v60 = vmul.f32 %v1160_v43, %v5322_v15  ;;  %v924_v5 = vadd.f32 %v923_v3, %v4977_v45  ;;  %v972_v9 = vpop.f32.mrf.mxu3  ;;  %v827_v38 = vpop.f32.mrf.mxu0  ;;  %v1027_v25 = vmul.f32 0.5, %v5279_v10  ;;  %2664 = vmatpush.bf16.msrb.mxu2 %v3815_v31 }
 0x1b0   :  { %v1227_v35 = vmul.f32 %v1163_v28, %v5326_v8  ;;  %v828_v59 = vadd.f32 %v827_v38, %v4952_v39  ;;  %v876_v0 = vpop.f32.mrf.mxu1  ;;  %v5342_v56 = vpack.c.bf16 %v1536_v24, %v1532_v12  ;;  %v1031_v28 = vmul.f32 0.5, %v5305_v55  ;;  %v3940_v12 = vld [vmem:[#allocation8 + $0x310] sm:$0xf0] }
 0x1b1   :  { %v5344_v62 = vadd.f32 %v972_v9, %v924_v5  ;;  %v1288_v6 = vadd.f32 %v1224_v60, %v5322_v15  ;;  %v3943_v60 = vor.u32 %v4240_v19, %v3940_v12 }
 0x1b2   :  { %v1291_v44 = vadd.f32 %v1227_v35, %v5326_v8  ;;  %v5350_v4 = vadd.f32 %v876_v0, %v828_v59  ;;  %2543 = vmatmul.bf16.gmra.mxu3 %v5342_v56  ;;  %v1539_v59 = vmul.f32 %v1475_v58, %v1027_v25 }
 0x1b3   :  { %v1100_v39 = vmul.f32 0.044715, %v5344_v62  ;;  %v1352_v20 = vmul.f32 0.7978846, %v1288_v6  ;;  %v4397_v26 = vpop.eup %4396  ;;  %2713 = vmatpush.bf16.msrb.mxu3 %v3943_v60 }
 0x1b4   :  { %v1355_v16 = vmul.f32 0.7978846, %v1291_v44  ;;  %v1103_v52 = vmul.f32 0.044715, %v5350_v4  ;;  %v1479_v3 = vadd.f32 1.0, %v4397_v26  ;;  %v4399_v5 = vpop.eup %4398  ;;  %v1028_v26 = vmul.f32 0.5, %v5301_v42 }
 0x1b5   :  { %v1164_v43 = vmul.f32 %v1100_v39, %v5344_v62  ;;  %4400 = vtanh.f32 %v1352_v20 }
 0x1b6   :  { %v1167_v24 = vmul.f32 %v1103_v52, %v5350_v4  ;;  %v925_v32 = vpop.f32.mrf.mxu2  ;;  %v1543_v10 = vmul.f32 %v1479_v3, %v1031_v28  ;;  %4402 = vtanh.f32 %v1355_v16  ;;  %v1032_v16 = vmul.f32 0.5, %v5322_v15 }
 0x1b7   :  { %v1228_v9 = vmul.f32 %v1164_v43, %v5344_v62  ;;  %v926_v38 = vadd.f32 %v925_v32, %v4977_v45  ;;  %v2372_v35 = vpop.f32.mrf.mxu0  ;;  %v974_v6 = vpop.f32.mrf.mxu3  ;;  %v1476_v45 = vadd.f32 1.0, %v4399_v5 }
 0x1b8   :  { %v1231_v0 = vmul.f32 %v1167_v24, %v5350_v4  ;;  %v2373_v55 = vadd.f32 %v2372_v35, %v5356_v57  ;;  %v2421_v44 = vpop.f32.mrf.mxu1  ;;  %v5369_v39 = vpack.c.bf16 %v1543_v10, %v1539_v59  ;;  %v3930_v59 = vld [vmem:[#allocation8 + $0x2e8] sm:$0xf]  ;;  %v4239_v10 = vld [vmem:[#allocation8 + $0x2f4] sm:$0xf0] }
 0x1b9   :  { %v1292_v21 = vadd.f32 %v1228_v9, %v5344_v62  ;;  %v5367_v47 = vadd.f32 %v974_v6, %v926_v38  ;;  %2567 = vmatmul.bf16.vlgmr.msrb.gmra.mxu0 %v4759_v46  ;;  %v1540_v12 = vmul.f32 %v1476_v45, %v1028_v26  ;;  %v3802_v26 = vld [vmem:[#allocation8 + $0x1e8] sm:$0xf] }
 0x1ba   :  { %5840 = vst [vmem:[#allocation23_spill] sm:$0xff] %v5369_v39  ;;  %v5371_v20 = vadd.f32 %v2421_v44, %v2373_v55  ;;  %v1295_v58 = vadd.f32 %v1231_v0, %v5350_v4  ;;  %2616 = vmatmul.bf16.vlgmr.msrb.gmra.mxu1 %v4783_v63  ;;  %v3674_v0 = vld [vmem:[#allocation8 + $0xe8] sm:$0xf]  ;;  %v3931_v55 = vor.u32 %v4239_v10, %v3930_v59  ;;  %v4175_v44 = vld [vmem:[#allocation8 + $0xf4] sm:$0xf0] }
 0x1bb   :  { %v4401_v31 = vpop.eup %4400  ;;  %v1104_v19 = vmul.f32 0.044715, %v5367_v47  ;;  %2499 = vmatmul.bf16.gmra.mxu2 %v5369_v39  ;;  %v1356_v43 = vmul.f32 0.7978846, %v1292_v21  ;;  %v4058_v21 = vld [vmem:[#allocation8 + $0x3e8] sm:$0xf] }
 0x1bc   :  { %v1480_v52 = vadd.f32 1.0, %v4401_v31  ;;  %v1359_v25 = vmul.f32 0.7978846, %v1295_v58  ;;  %v4403_v3 = vpop.eup %4402  ;;  %v1035_v58 = vmul.f32 0.5, %v5326_v8  ;;  %v3675_v31 = vor.u32 %v4175_v44, %v3674_v0  ;;  %2853 = vmatpush.bf16.msra.mxu2 %v3931_v55 }
 0x1bd   :  { %v1168_v28 = vmul.f32 %v1104_v19, %v5367_v47  ;;  %v1483_v42 = vadd.f32 1.0, %v4403_v3  ;;  %v4271_v19 = vld [vmem:[#allocation8 + $0x3f4] sm:$0xf0]  ;;  %v1040_v59 = vmul.f32 0.5, %v5367_v47 }
 0x1be   :  { %v1544_v24 = vmul.f32 %v1480_v52, %v1032_v16  ;;  %4404 = vtanh.f32 %v1359_v25  ;;  %v1039_v16 = vmul.f32 0.5, %v5350_v4  ;;  %v4059_v25 = vor.u32 %v4271_v19, %v4058_v21  ;;  %2755 = vmatpush.bf16.msra.mxu0 %v3675_v31  ;;  %v3914_v31 = vld [vmem:[#allocation8 + $0x2c8] sm:$0xf]  ;;  %v4235_v19 = vld [vmem:[#allocation8 + $0x2d4] sm:$0xf0] }
 0x1bf   :  { %v1232_v32 = vmul.f32 %v1168_v28, %v5367_v47  ;;  %v2374_v60 = vpop.f32.mrf.mxu0  ;;  %4406 = vtanh.f32 %v1356_v43  ;;  %v4207_v43 = vld [vmem:[#allocation8 + $0x1f4] sm:$0xf0] }
 0x1c0   :  { %v2375_v5 = vadd.f32 %v2374_v60, %v5356_v57  ;;  %v2423_v9 = vpop.f32.mrf.mxu1  ;;  %v5383_v38 = vpack.c.bf16 %v1544_v24, %v1540_v12  ;;  %v3803_v28 = vor.u32 %v4207_v43, %v3802_v26  ;;  %v1547_v24 = vmul.f32 %v1483_v42, %v1035_v58  ;;  %2902 = vmatpush.bf16.msra.mxu3 %v4059_v25  ;;  %v3658_v26 = vld [vmem:[#allocation8 + $0xc8] sm:$0xf] }
 0x1c1   :  { %v1296_v15 = vadd.f32 %v1232_v32, %v5367_v47  ;;  %v1036_v42 = vmul.f32 0.5, %v5344_v62  ;;  %v4171_v62 = vld [vmem:[#allocation8 + $0xd4] sm:$0xf0] }
 0x1c2   :  { %5841 = vst [vmem:[#allocation24_spill] sm:$0xff] %v5383_v38  ;;  %v5386_v35 = vadd.f32 %v2423_v9, %v2375_v5  ;;  %2548 = vmatmul.bf16.gmra.mxu3 %v5383_v38  ;;  %2804 = vmatpush.bf16.msra.mxu1 %v3803_v28  ;;  %v4267_v47 = vld [vmem:[#allocation8 + $0x3d4] sm:$0xf0]  ;;  %v3659_v25 = vor.u32 %v4171_v62, %v3658_v26  ;;  %v3786_v28 = vld [vmem:[#allocation8 + $0x1c8] sm:$0xf] }
 0x1c3   :  { %v1360_v6 = vmul.f32 0.7978846, %v1296_v15  ;;  %v4263_v26 = vld [vmem:[#allocation8 + $0x3b4] sm:$0xf0] }
 0x1c4   :  { %v4405_v45 = vpop.eup %4404  ;;  %2756 = vmatpush.bf16.msra.mxu0 %v3659_v25 }
 0x1c5   :  { %v1487_v52 = vadd.f32 1.0, %v4405_v45  ;;  %4408 = vtanh.f32 %v1360_v6  ;;  %v4407_v3 = vpop.eup %4406 }
 0x1c6   :  { %v1484_v4 = vadd.f32 1.0, %v4407_v3  ;;  %v4203_v3 = vld [vmem:[#allocation8 + $0x1d4] sm:$0xf0] }
 0x1c7   :  { %v2377_v12 = vpop.f32.mrf.mxu0  ;;  %v1551_v32 = vmul.f32 %v1487_v52, %v1039_v16  ;;  %v3915_v16 = vor.u32 %v4235_v19, %v3914_v31  ;;  %v4042_v52 = vld [vmem:[#allocation8 + $0x3c8] sm:$0xf]  ;;  %v4167_v31 = vld [vmem:[#allocation8 + $0xb4] sm:$0xf0] }
 0x1c8   :  { %v2378_v60 = vadd.f32 %v2377_v12, %v5356_v57  ;;  %v2426_v8 = vpop.f32.mrf.mxu1  ;;  %v1548_v0 = vmul.f32 %v1484_v4, %v1036_v42  ;;  %v4043_v43 = vor.u32 %v4267_v47, %v4042_v52  ;;  %v3787_v12 = vor.u32 %v4203_v3, %v3786_v28  ;;  %v4026_v19 = vld [vmem:[#allocation8 + $0x3a8] sm:$0xf]  ;;  %v4199_v47 = vld [vmem:[#allocation8 + $0x1b4] sm:$0xf0] }
 0x1c9   :  { %v5392_v5 = vpack.c.bf16 %v1551_v32, %v1547_v24  ;;  %2572 = vmatmul.bf16.gmra.mxu0 %v4810_v22  ;;  %2854 = vmatpush.bf16.msra.mxu2 %v3915_v16  ;;  %v4027_v62 = vor.u32 %v4263_v26, %v4026_v19  ;;  %v3770_v52 = vld [vmem:[#allocation8 + $0x1a8] sm:$0xf]  ;;  %v4163_v26 = vld [vmem:[#allocation8 + $0x94] sm:$0xf0] }
 0x1ca   :  { %v5394_v9 = vadd.f32 %v2426_v8, %v2378_v60  ;;  %2621 = vmatmul.bf16.gmra.mxu1 %v4823_v2  ;;  %2903 = vmatpush.bf16.msra.mxu3 %v4043_v43  ;;  %v3771_v25 = vor.u32 %v4199_v47, %v3770_v52 }
 0x1cb   :  { %5842 = vst [vmem:[#allocation25_spill] sm:$0xff] %v5392_v5  ;;  %v4409_v15 = vpop.eup %4408  ;;  %2504 = vmatmul.bf16.gmra.mxu2 %v5392_v5  ;;  %2805 = vmatpush.bf16.msra.mxu1 %v3787_v12 }
 0x1cc   :  { %v1488_v10 = vadd.f32 1.0, %v4409_v15 }
 0x1ce   :  { %v1552_v6 = vmul.f32 %v1488_v10, %v1040_v59  ;;  %2904 = vmatpush.bf16.msra.mxu3 %v4027_v62  ;;  %v4259_v62 = vld [vmem:[#allocation8 + $0x394] sm:$0xf0] }
 0x1cf   :  { %v2379_v55 = vpop.f32.mrf.mxu0  ;;  %2806 = vmatpush.bf16.msra.mxu1 %v3771_v25  ;;  %v4195_v25 = vld [vmem:[#allocation8 + $0x194] sm:$0xf0] }
 0x1d0   :  { %v2380_v44 = vadd.f32 %v2379_v55, %v5356_v57  ;;  %v2428_v21 = vpop.f32.mrf.mxu1  ;;  %v5402_v45 = vpack.c.bf16 %v1552_v6, %v1548_v0  ;;  %v3898_v6 = vld [vmem:[#allocation8 + $0x2a8] sm:$0xf]  ;;  %v4231_v55 = vld [vmem:[#allocation8 + $0x2b4] sm:$0xf0] }
 0x1d2   :  { %5843 = vst [vmem:[#allocation26_spill] sm:$0xff] %v5402_v45  ;;  %v5404_v58 = vadd.f32 %v2428_v21, %v2380_v44  ;;  %2553 = vmatmul.bf16.gmra.mxu3 %v5402_v45  ;;  %v3642_v44 = vld [vmem:[#allocation8 + $0xa8] sm:$0xf]  ;;  %v3899_v21 = vor.u32 %v4231_v55, %v3898_v6 }
 0x1d3   :  { %v3643_v16 = vor.u32 %v4167_v31, %v3642_v44  ;;  %v3882_v44 = vld [vmem:[#allocation8 + $0x288] sm:$0xf] }
 0x1d4   :  { %2855 = vmatpush.bf16.msra.mxu2 %v3899_v21  ;;  %v4227_v21 = vld [vmem:[#allocation8 + $0x294] sm:$0xf0]  ;;  %v3626_v31 = vld [vmem:[#allocation8 + $0x88] sm:$0xf] }
 0x1d5   :  { %2757 = vmatpush.bf16.msra.mxu0 %v3643_v16  ;;  %v3883_v19 = vor.u32 %v4227_v21, %v3882_v44  ;;  %v4010_v16 = vld [vmem:[#allocation8 + $0x388] sm:$0xf]  ;;  %v3627_v52 = vor.u32 %v4163_v26, %v3626_v31 }
 0x1d6   :  { %v4011_v47 = vor.u32 %v4259_v62, %v4010_v16  ;;  %v3866_v26 = vld [vmem:[#allocation8 + $0x268] sm:$0xf]  ;;  %v4223_v16 = vld [vmem:[#allocation8 + $0x274] sm:$0xf0] }
 0x1d7   :  { %v2382_v24 = vpop.f32.mrf.mxu0  ;;  %v3610_v62 = vld [vmem:[#allocation8 + $0x68] sm:$0xf] }
 0x1d8   :  { %v2383_v32 = vadd.f32 %v2382_v24, %v5356_v57  ;;  %v2431_v60 = vpop.f32.mrf.mxu1  ;;  %2856 = vmatpush.bf16.msra.mxu2 %v3883_v19  ;;  %2905 = vmatpush.bf16.msra.mxu3 %v4011_v47  ;;  %v4159_v47 = vld [vmem:[#allocation8 + $0x74] sm:$0xf0] }
 0x1d9   :  { %2577 = vmatmul.bf16.gmra.mxu0 %v4850_v50 }
 0x1da   :  { %v5408_v8 = vadd.f32 %v2431_v60, %v2383_v32  ;;  %2626 = vmatmul.bf16.gmra.mxu1 %v4863_v23  ;;  %2758 = vmatpush.bf16.msra.mxu0 %v3627_v52  ;;  %v3867_v52 = vor.u32 %v4223_v16, %v3866_v26 }
 0x1db   :  { %2665 = vmatmul.bf16.vlgmr.msrb.gmra.mxu2 %v5065_v34 }
 0x1dc   :  { %2857 = vmatpush.bf16.msra.mxu2 %v3867_v52 }
 0x1dd   :  { %v2470_v4 = vpop.f32.mrf.mxu2 }
 0x1de   :  { %v2471_v15 = vadd.f32 %v2470_v4, %v5371_v20 }
 0x1df   :  { %v2384_v42 = vpop.f32.mrf.mxu0 }
 0x1e0   :  { %v2385_v59 = vadd.f32 %v2384_v42, %v5356_v57  ;;  %v2433_v10 = vpop.f32.mrf.mxu1 }
 0x1e2   :  { %v5415_v0 = vadd.f32 %v2433_v10, %v2385_v59  ;;  %2714 = vmatmul.bf16.vlgmr.msrb.gmra.mxu3 %v5090_v61 }
 0x1e5   :  { %v2519_v20 = vpop.f32.mrf.mxu3  ;;  %v2472_v28 = vpop.f32.mrf.mxu2 }
 0x1e6   :  { %v5418_v43 = vadd.f32 %v2519_v20, %v2471_v15  ;;  %v2473_v3 = vadd.f32 %v2472_v28, %v5386_v35  ;;  %v3754_v20 = vld [vmem:[#allocation8 + $0x188] sm:$0xf] }
 0x1e7   :  { %v2387_v12 = vpop.f32.mrf.mxu0  ;;  %v3755_v28 = vor.u32 %v4195_v25, %v3754_v20  ;;  %v3994_v20 = vld [vmem:[#allocation8 + $0x368] sm:$0xf]  ;;  %v4255_v25 = vld [vmem:[#allocation8 + $0x374] sm:$0xf0] }
 0x1e8   :  { %v2388_v24 = vadd.f32 %v2387_v12, %v5356_v57  ;;  %v2436_v32 = vpop.f32.mrf.mxu1 }
 0x1e9   :  { %2582 = vmatmul.bf16.gmra.mxu0 %v4884_v7  ;;  %2807 = vmatpush.bf16.msra.mxu1 %v3755_v28  ;;  %v3995_v28 = vor.u32 %v4255_v25, %v3994_v20  ;;  %v3594_v25 = vld [vmem:[#allocation8 + $0x48] sm:$0xf] }
 0x1ea   :  { %v5422_v60 = vadd.f32 %v2436_v32, %v2388_v24  ;;  %2631 = vmatmul.bf16.gmra.mxu1 %v4894_v37 }
 0x1eb   :  { %2670 = vmatmul.bf16.gmra.mxu2 %v5121_v1  ;;  %2906 = vmatpush.bf16.msra.mxu3 %v3995_v28  ;;  %v3722_v28 = vld [vmem:[#allocation8 + $0x148] sm:$0xf] }
 0x1ed   :  { %v2521_v4 = vpop.f32.mrf.mxu3 }
 0x1ee   :  { %v5427_v15 = vadd.f32 %v2521_v4, %v2473_v3  ;;  %v2475_v42 = vpop.f32.mrf.mxu2 }
 0x1ef   :  { %v2476_v59 = vadd.f32 %v2475_v42, %v5394_v9  ;;  %v2389_v35 = vpop.f32.mrf.mxu0 }
 0x1f0   :  { %v2390_v10 = vadd.f32 %v2389_v35, %v5356_v57  ;;  %v2438_v6 = vpop.f32.mrf.mxu1 }
 0x1f2   :  { %v5431_v55 = vadd.f32 %v2438_v6, %v2390_v10  ;;  %2719 = vmatmul.bf16.gmra.mxu3 %v5144_v18 }
 0x1f5   :  { %v2524_v9 = vpop.f32.mrf.mxu3 }
 0x1f6   :  { %v5434_v3 = vadd.f32 %v2524_v9, %v2476_v59  ;;  %v2477_v12 = vpop.f32.mrf.mxu2  ;;  %v3611_v9 = vor.u32 %v4159_v47, %v3610_v62 }
 0x1f7   :  { %v2478_v24 = vadd.f32 %v2477_v12, %v5404_v58  ;;  %v2392_v32 = vpop.f32.mrf.mxu0  ;;  %v3738_v12 = vld [vmem:[#allocation8 + $0x168] sm:$0xf] }
 0x1f8   :  { %v2393_v4 = vadd.f32 %v2392_v32, %v5356_v57  ;;  %v2441_v42 = vpop.f32.mrf.mxu1  ;;  %2759 = vmatpush.bf16.msra.mxu0 %v3611_v9  ;;  %v4155_v9 = vld [vmem:[#allocation8 + $0x54] sm:$0xf0] }
 0x1f9   :  { %2587 = vmatmul.bf16.gmra.mxu0 %v4917_v30 }
 0x1fa   :  { %v5438_v35 = vadd.f32 %v2441_v42, %v2393_v4  ;;  %2636 = vmatmul.bf16.gmra.mxu1 %v5132_v27 }
 0x1fb   :  { %2675 = vmatmul.bf16.gmra.mxu2 %v5178_v13 }
 0x1fd   :  { %v2526_v59 = vpop.f32.mrf.mxu3 }
 0x1fe   :  { %v5443_v10 = vadd.f32 %v2526_v59, %v2478_v24  ;;  %v2480_v6 = vpop.f32.mrf.mxu2  ;;  %v4191_v24 = vld [vmem:[#allocation8 + $0x174] sm:$0xf0] }
 0x1ff   :  { %v2481_v44 = vadd.f32 %v2480_v6, %v5408_v8  ;;  %v2394_v58 = vpop.f32.mrf.mxu0  ;;  %v3739_v32 = vor.u32 %v4191_v24, %v3738_v12  ;;  %v3595_v12 = vor.u32 %v4155_v9, %v3594_v25  ;;  %v4187_v24 = vld [vmem:[#allocation8 + $0x154] sm:$0xf0] }
 0x200   :  { %v2395_v21 = vadd.f32 %v2394_v58, %v5356_v57  ;;  %v2443_v31 = vpop.f32.mrf.mxu1 }
 0x201   :  { %2808 = vmatpush.bf16.msra.mxu1 %v3739_v32  ;;  %v4219_v32 = vld [vmem:[#allocation8 + $0x254] sm:$0xf0]  ;;  %2760 = vmatpush.bf16.msra.mxu0 %v3595_v12 }
 0x202   :  { %v5447_v19 = vadd.f32 %v2443_v31, %v2395_v21  ;;  %2724 = vmatmul.bf16.gmra.mxu3 %v5201_v14 }
 0x205   :  { %v2529_v8 = vpop.f32.mrf.mxu3 }
 0x206   :  { %v5450_v4 = vadd.f32 %v2529_v8, %v2481_v44  ;;  %v2482_v42 = vpop.f32.mrf.mxu2  ;;  %v3850_v8 = vld [vmem:[#allocation8 + $0x248] sm:$0xf] }
 0x207   :  { %v2483_v59 = vadd.f32 %v2482_v42, %v5415_v0  ;;  %v2397_v6 = vpop.f32.mrf.mxu0  ;;  %v3723_v42 = vor.u32 %v4187_v24, %v3722_v28 }
 0x208   :  { %v2398_v58 = vadd.f32 %v2397_v6, %v5356_v57  ;;  %v2446_v21 = vpop.f32.mrf.mxu1  ;;  %v3978_v6 = vld [vmem:[#allocation8 + $0x348] sm:$0xf] }
 0x209   :  { %2592 = vmatmul.bf16.gmra.mxu0 %v4938_v51  ;;  %2809 = vmatpush.bf16.msra.mxu1 %v3723_v42 }
 0x20a   :  { %v5454_v31 = vadd.f32 %v2446_v21, %v2398_v58  ;;  %2641 = vmatmul.bf16.gmra.mxu1 %v5217_v11  ;;  %v4251_v58 = vld [vmem:[#allocation8 + $0x354] sm:$0xf0] }
 0x20b   :  { %2680 = vmatmul.bf16.gmra.mxu2 %v5233_v29 }
 0x20d   :  { %v2531_v44 = vpop.f32.mrf.mxu3 }
 0x20e   :  { %v5459_v26 = vadd.f32 %v2531_v44, %v2483_v59  ;;  %v2485_v16 = vpop.f32.mrf.mxu2  ;;  %v3851_v59 = vor.u32 %v4219_v32, %v3850_v8  ;;  %v3979_v44 = vor.u32 %v4251_v58, %v3978_v6  ;;  %v4147_v32 = vld [vmem:[#allocation8 + $0x14] sm:$0xf0]  ;;  %v3690_v6 = vld [vmem:[#allocation8 + $0x108] sm:$0xf] }
 0x20f   :  { %v2486_v62 = vadd.f32 %v2485_v16, %v5422_v60  ;;  %v2399_v0 = vpop.f32.mrf.mxu0  ;;  %v3578_v60 = vld [vmem:[#allocation8 + $0x28] sm:$0xf]  ;;  %v4151_v16 = vld [vmem:[#allocation8 + $0x34] sm:$0xf0] }
 0x210   :  { %5844 = vst [vmem:[#allocation27_spill] sm:$0xff] %v5459_v26  ;;  %v2400_v52 = vadd.f32 %v2399_v0, %v5356_v57  ;;  %v2448_v47 = vpop.f32.mrf.mxu1  ;;  %v3706_v0 = vld [vmem:[#allocation8 + $0x128] sm:$0xf]  ;;  %2858 = vmatpush.bf16.msra.mxu2 %v3851_v59  ;;  %v3579_v25 = vor.u32 %v4151_v16, %v3578_v60  ;;  %2907 = vmatpush.bf16.msra.mxu3 %v3979_v44 }
 0x212   :  { %v5463_v20 = vadd.f32 %v2448_v47, %v2400_v52  ;;  %2729 = vmatmul.bf16.gmra.mxu3 %v5252_v53  ;;  %v4183_v52 = vld [vmem:[#allocation8 + $0x134] sm:$0xf0]  ;;  %2761 = vmatpush.bf16.msra.mxu0 %v3579_v25  ;;  %v3834_v25 = vld [vmem:[#allocation8 + $0x228] sm:$0xf] }
 0x213   :  { %v3707_v9 = vor.u32 %v4183_v52, %v3706_v0 }
 0x215   :  { %v2534_v21 = vpop.f32.mrf.mxu3  ;;  %2810 = vmatpush.bf16.msra.mxu1 %v3707_v9  ;;  %v4215_v9 = vld [vmem:[#allocation8 + $0x234] sm:$0xf0] }
 0x216   :  { %v5466_v47 = vadd.f32 %v2534_v21, %v2486_v62  ;;  %v2487_v53 = vpop.f32.mrf.mxu2  ;;  %v3562_v62 = vld [vmem:[#allocation8 + $0x8] sm:$0xf] }
 0x217   :  { %v2488_v26 = vadd.f32 %v2487_v53, %v5431_v55  ;;  %v2402_v28 = vpop.f32.mrf.mxu0  ;;  %v3563_v42 = vor.u32 %v4147_v32, %v3562_v62  ;;  %v4179_v53 = vld [vmem:[#allocation8 + $0x114] sm:$0xf0] }
 0x218   :  { %v2403_v24 = vadd.f32 %v2402_v28, %v5356_v57  ;;  %v2451_v8 = vpop.f32.mrf.mxu1  ;;  %v3691_v55 = vor.u32 %v4179_v53, %v3690_v6  ;;  %v3962_v28 = vld [vmem:[#allocation8 + $0x328] sm:$0xf] }
 0x219   :  { %2597 = vmatmul.bf16.gmra.mxu0 %v4969_v17 }
 0x21a   :  { %v5470_v12 = vadd.f32 %v2451_v8, %v2403_v24  ;;  %2646 = vmatmul.bf16.gmra.mxu1 %v5263_v40  ;;  %2762 = vmatpush.bf16.msra.mxu0 %v3563_v42  ;;  %v3835_v24 = vor.u32 %v4215_v9, %v3834_v25  ;;  %v4247_v8 = vld [vmem:[#allocation8 + $0x334] sm:$0xf0] }
 0x21b   :  { %2685 = vmatmul.bf16.gmra.mxu2 %v5277_v33  ;;  %2811 = vmatpush.bf16.msra.mxu1 %v3691_v55  ;;  %v3963_v62 = vor.u32 %v4247_v8, %v3962_v28  ;;  %v3818_v28 = vld [vmem:[#allocation8 + $0x208] sm:$0xf] }
 0x21c   :  { %2859 = vmatpush.bf16.msra.mxu2 %v3835_v24  ;;  %v4211_v24 = vld [vmem:[#allocation8 + $0x214] sm:$0xf0]  ;;  %v3946_v8 = vld [vmem:[#allocation8 + $0x308] sm:$0xf] }
 0x21d   :  { %v2536_v59 = vpop.f32.mrf.mxu3  ;;  %2908 = vmatpush.bf16.msra.mxu3 %v3963_v62  ;;  %v3819_v62 = vor.u32 %v4211_v24, %v3818_v28  ;;  %v3932_v28 = vld [vmem:[#allocation8 + $0x2f8] sm:$0xf0]  ;;  %v4173_v24 = vld [vmem:[#allocation8 + $0xec] sm:$0xf] }
 0x21e   :  { %v5475_v58 = vadd.f32 %v2536_v59, %v2488_v26  ;;  %v2490_v60 = vpop.f32.mrf.mxu2 }
 0x21f   :  { %v2491_v21 = vadd.f32 %v2490_v60, %v5438_v35  ;;  %v2404_v44 = vpop.f32.mrf.mxu0 }
 0x220   :  { %v2405_v16 = vadd.f32 %v2404_v44, %v5356_v57  ;;  %v2453_v0 = vpop.f32.mrf.mxu1  ;;  %2860 = vmatpush.bf16.msra.mxu2 %v3819_v62  ;;  %v3676_v62 = vld [vmem:[#allocation8 + $0xf8] sm:$0xf0] }
 0x222   :  { %v5479_v52 = vadd.f32 %v2453_v0, %v2405_v16  ;;  %2734 = vmatmul.bf16.gmra.mxu3 %v5299_v49 }
 0x225   :  { %v2539_v26 = vpop.f32.mrf.mxu3 }
 0x226   :  { %v5482_v32 = vadd.f32 %v2539_v26, %v2491_v21  ;;  %v2492_v6 = vpop.f32.mrf.mxu2  ;;  %v4243_v26 = vld [vmem:[#allocation8 + $0x314] sm:$0xf0] }
 0x227   :  { %v2493_v35 = vadd.f32 %v2492_v6, %v5447_v19  ;;  %v2407_v42 = vpop.f32.mrf.mxu0  ;;  %v3947_v6 = vor.u32 %v4243_v26, %v3946_v8  ;;  %v4269_v26 = vld [vmem:[#allocation8 + $0x3ec] sm:$0xf] }
 0x228   :  { %v2408_v53 = vadd.f32 %v2407_v42, %v5356_v57  ;;  %v2456_v55 = vpop.f32.mrf.mxu1 }
 0x229   :  { %2602 = vmatmul.bf16.gmra.mxu0 %v5018_v48  ;;  %2909 = vmatpush.bf16.msra.mxu3 %v3947_v6  ;;  %v4060_v6 = vld [vmem:[#allocation8 + $0x3f8] sm:$0xf0] }
 0x22a   :  { %v5486_v59 = vadd.f32 %v2456_v55, %v2408_v53  ;;  %2651 = vmatmul.bf16.gmra.mxu1 %v5319_v54 }
 0x22b   :  { %2690 = vmatmul.bf16.gmra.mxu2 %v5324_v41 }
 0x22d   :  { %v2541_v60 = vpop.f32.mrf.mxu3 }
 0x22e   :  { %v5491_v44 = vadd.f32 %v2541_v60, %v2493_v35  ;;  %v2495_v21 = vpop.f32.mrf.mxu2 }
 0x22f   :  { %v2496_v16 = vadd.f32 %v2495_v21, %v5454_v31  ;;  %v2409_v0 = vpop.f32.mrf.mxu0 }
 0x230   :  { %v2410_v19 = vadd.f32 %v2409_v0, %v5356_v57  ;;  %v2458_v25 = vpop.f32.mrf.mxu1 }
 0x232   :  { %v5495_v9 = vadd.f32 %v2458_v25, %v2410_v19  ;;  %2739 = vmatmul.bf16.gmra.mxu3 %v5342_v56 }
 0x235   :  { %v2544_v42 = vpop.f32.mrf.mxu3 }
 0x236   :  { %v5498_v35 = vadd.f32 %v2544_v42, %v2496_v16  ;;  %v2497_v53 = vpop.f32.mrf.mxu2  ;;  %v3679_v42 = vor.u32 %v4173_v24, %v3676_v62  ;;  %v3916_v62 = vld [vmem:[#allocation8 + $0x2d8] sm:$0xf0] }
 0x237   :  { %v2498_v31 = vadd.f32 %v2497_v53, %v5463_v20  ;;  %v5501_v57 = vpop.f32.mrf.mxu0  ;;  %v4237_v20 = vld [vmem:[#allocation8 + $0x2ec] sm:$0xf]  ;;  %v4063_v53 = vor.u32 %v4269_v26, %v4060_v6 }
 0x238   :  { %v5503_v55 = vpop.f32.mrf.mxu1  ;;  %v3935_v8 = vor.u32 %v4237_v20, %v3932_v28  ;;  %2951 = vmatpush.bf16.msrb.mxu0 %v3679_v42  ;;  %v4169_v26 = vld [vmem:[#allocation8 + $0xcc] sm:$0xf]  ;;  %v3660_v42 = vld [vmem:[#allocation8 + $0xd8] sm:$0xf0] }
 0x239   :  { %2763 = vmatmul.bf16.vlgmr.msra.gmra.mxu0 %v4759_v46  ;;  %3098 = vmatpush.bf16.msrb.mxu3 %v4063_v53  ;;  %v4265_v53 = vld [vmem:[#allocation8 + $0x3cc] sm:$0xf] }
 0x23a   :  { %2812 = vmatmul.bf16.vlgmr.msra.gmra.mxu1 %v4783_v63  ;;  %3049 = vmatpush.bf16.msrb.mxu2 %v3935_v8 }
 0x23b   :  { %2695 = vmatmul.bf16.gmra.mxu2 %v5369_v39 }
 0x23d   :  { %v2546_v60 = vpop.f32.mrf.mxu3 }
 0x23e   :  { %v5508_v21 = vadd.f32 %v2546_v60, %v2498_v31  ;;  %v2500_v0 = vpop.f32.mrf.mxu2  ;;  %v4205_v31 = vld [vmem:[#allocation8 + $0x1ec] sm:$0xf]  ;;  %v3804_v60 = vld [vmem:[#allocation8 + $0x1f8] sm:$0xf0] }
 0x23f   :  { %v2501_v16 = vadd.f32 %v2500_v0, %v5470_v12  ;;  %v5511_v19 = vpop.f32.mrf.mxu0  ;;  %v3807_v12 = vor.u32 %v4205_v31, %v3804_v60  ;;  %v4044_v31 = vld [vmem:[#allocation8 + $0x3d8] sm:$0xf0]  ;;  %v3663_v60 = vor.u32 %v4169_v26, %v3660_v42  ;;  %v4229_v42 = vld [vmem:[#allocation8 + $0x2ac] sm:$0xf] }
 0x240   :  { %5845 = vst [vmem:[#allocation28_spill] sm:$0xff] %v5508_v21  ;;  %v5513_v25 = vpop.f32.mrf.mxu1 }
 0x241   :  { %3000 = vmatpush.bf16.msrb.mxu1 %v3807_v12  ;;  %v4047_v12 = vor.u32 %v4265_v53, %v4044_v31  ;;  %2952 = vmatpush.bf16.msrb.mxu0 %v3663_v60  ;;  %v3900_v53 = vld [vmem:[#allocation8 + $0x2b8] sm:$0xf0]  ;;  %v4165_v31 = vld [vmem:[#allocation8 + $0xac] sm:$0xf] }
 0x242   :  { %2744 = vmatmul.bf16.gmra.mxu3 %v5383_v38  ;;  %v3903_v60 = vor.u32 %v4229_v42, %v3900_v53 }
 0x243   :  { %3099 = vmatpush.bf16.msrb.mxu3 %v4047_v12  ;;  %v3644_v12 = vld [vmem:[#allocation8 + $0xb8] sm:$0xf0] }
 0x245   :  { %v2549_v21 = vpop.f32.mrf.mxu3 }
 0x246   :  { %v5516_v0 = vadd.f32 %v2549_v21, %v2501_v16  ;;  %v2502_v39 = vpop.f32.mrf.mxu2 }
 0x247   :  { %v2503_v38 = vadd.f32 %v2502_v39, %v5479_v52  ;;  %v5519_v63 = vpop.f32.mrf.mxu0  ;;  %v4233_v52 = vld [vmem:[#allocation8 + $0x2cc] sm:$0xf] }
 0x248   :  { %v5521_v20 = vpop.f32.mrf.mxu1  ;;  %v3919_v6 = vor.u32 %v4233_v52, %v3916_v62  ;;  %v5542_v62 = vperm.slane %v5346_v36, 1 }
 0x249   :  { %2768 = vmatmul.bf16.gmra.mxu0 %v4810_v22 }
 0x24a   :  { %2817 = vmatmul.bf16.gmra.mxu1 %v4823_v2  ;;  %3050 = vmatpush.bf16.msrb.mxu2 %v3919_v6 }
 0x24b   :  { %2700 = vmatmul.bf16.gmra.mxu2 %v5392_v5 }
 0x24d   :  { %v2551_v28 = vpop.f32.mrf.mxu3 }
 0x24e   :  { %v5526_v24 = vadd.f32 %v2551_v28, %v2503_v38  ;;  %v2505_v21 = vpop.f32.mrf.mxu2  ;;  %v4201_v38 = vld [vmem:[#allocation8 + $0x1cc] sm:$0xf]  ;;  %v3788_v28 = vld [vmem:[#allocation8 + $0x1d8] sm:$0xf0]  ;;  %3051 = vmatpush.bf16.msrb.mxu2 %v3903_v60 }
 0x24f   :  { %v2506_v16 = vadd.f32 %v2505_v21, %v5486_v59  ;;  %v5529_v8 = vpop.f32.mrf.mxu0  ;;  %v3791_v59 = vor.u32 %v4201_v38, %v3788_v28  ;;  %v4261_v38 = vld [vmem:[#allocation8 + $0x3ac] sm:$0xf]  ;;  %v4028_v28 = vld [vmem:[#allocation8 + $0x3b8] sm:$0xf0] }
 0x250   :  { %5846 = vst [vmem:[#allocation29_spill] sm:$0xff] %v5526_v24  ;;  %v5531_v39 = vpop.f32.mrf.mxu1 }
 0x251   :  { %3001 = vmatpush.bf16.msrb.mxu1 %v3791_v59 }
 0x252   :  { %2749 = vmatmul.bf16.gmra.mxu3 %v5402_v45 }
 0x255   :  { %v2554_v24 = vpop.f32.mrf.mxu3 }
 0x256   :  { %v5534_v21 = vadd.f32 %v2554_v24, %v2506_v16  ;;  %v2507_v5 = vpop.f32.mrf.mxu2  ;;  %v2569_v16 = vadd.f32 %v5501_v57, %v5542_v62  ;;  %v3647_v57 = vor.u32 %v4165_v31, %v3644_v12  ;;  %v4225_v12 = vld [vmem:[#allocation8 + $0x28c] sm:$0xf] }
 0x257   :  { %v2508_v45 = vadd.f32 %v2507_v5, %v5495_v9  ;;  %v5537_v2 = vpop.f32.mrf.mxu0 }
 0x258   :  { %v5539_v52 = vpop.f32.mrf.mxu1  ;;  %v2618_v36 = vadd.f32 %v5503_v55, %v2569_v16  ;;  %v2571_v55 = vadd.f32 %v5511_v19, %v5542_v62  ;;  %2953 = vmatpush.bf16.msrb.mxu0 %v3647_v57  ;;  %v4257_v57 = vld [vmem:[#allocation8 + $0x38c] sm:$0xf] }
 0x259   :  { %2773 = vmatmul.bf16.gmra.mxu0 %v4850_v50 }
 0x25a   :  { %2822 = vmatmul.bf16.gmra.mxu1 %v4863_v23 }
 0x25b   :  { %2861 = vmatmul.bf16.vlgmr.msra.gmra.mxu2 %v5065_v34 }
 0x25d   :  { %v2556_v24 = vpop.f32.mrf.mxu3 }
 0x25e   :  { %v5549_v26 = vadd.f32 %v2556_v24, %v2508_v45  ;;  %v2666_v5 = vpop.f32.mrf.mxu2  ;;  %v4031_v45 = vor.u32 %v4261_v38, %v4028_v28  ;;  %v4197_v24 = vld [vmem:[#allocation8 + $0x1ac] sm:$0xf]  ;;  %v3884_v38 = vld [vmem:[#allocation8 + $0x298] sm:$0xf0] }
 0x25f   :  { %v5551_v9 = vpop.f32.mrf.mxu0  ;;  %v2667_v59 = vadd.f32 %v2666_v5, %v2618_v36  ;;  %v2620_v36 = vadd.f32 %v5513_v25, %v2571_v55  ;;  %v4161_v28 = vld [vmem:[#allocation8 + $0x8c] sm:$0xf] }
 0x260   :  { %5847 = vst [vmem:[#allocation30_spill] sm:$0xff] %v5549_v26  ;;  %v5553_v6 = vpop.f32.mrf.mxu1  ;;  %v3772_v26 = vld [vmem:[#allocation8 + $0x1b8] sm:$0xf0]  ;;  %3100 = vmatpush.bf16.msrb.mxu3 %v4031_v45  ;;  %v4193_v55 = vld [vmem:[#allocation8 + $0x18c] sm:$0xf] }
 0x261   :  { %v3775_v23 = vor.u32 %v4197_v24, %v3772_v26  ;;  %v2574_v26 = vadd.f32 %v5519_v63, %v5542_v62  ;;  %v4012_v24 = vld [vmem:[#allocation8 + $0x398] sm:$0xf0] }
 0x262   :  { %2910 = vmatmul.bf16.vlgmr.msra.gmra.mxu3 %v5090_v61 }
 0x263   :  { %3002 = vmatpush.bf16.msrb.mxu1 %v3775_v23  ;;  %v2623_v25 = vadd.f32 %v5521_v20, %v2574_v26  ;;  %v2576_v20 = vadd.f32 %v5529_v8, %v5542_v62 }
 0x265   :  { %v2715_v34 = vpop.f32.mrf.mxu3 }
 0x266   :  { %v2716_v16 = vadd.f32 %v2715_v34, %v2667_v59  ;;  %v2668_v61 = vpop.f32.mrf.mxu2  ;;  %v3628_v59 = vld [vmem:[#allocation8 + $0x98] sm:$0xf0] }
 0x267   :  { %v5559_v50 = vpop.f32.mrf.mxu0  ;;  %v2669_v34 = vadd.f32 %v2668_v61, %v2620_v36  ;;  %v3887_v61 = vor.u32 %v4225_v12, %v3884_v38  ;;  %v3631_v45 = vor.u32 %v4161_v28, %v3628_v59  ;;  %v2579_v12 = vadd.f32 %v5537_v2, %v5542_v62 }
 0x268   :  { %v3147_v42 = vpack.c.bf16 %v2716_v16, %v5418_v43  ;;  %v5562_v5 = vpop.f32.mrf.mxu1  ;;  %v3756_v16 = vld [vmem:[#allocation8 + $0x198] sm:$0xf0] }
 0x269   :  { %2778 = vmatmul.bf16.gmra.mxu0 %v4884_v7  ;;  %3052 = vmatpush.bf16.msrb.mxu2 %v3887_v61  ;;  %v3759_v36 = vor.u32 %v4193_v55, %v3756_v16  ;;  %v3612_v55 = vld [vmem:[#allocation8 + $0x78] sm:$0xf0]  ;;  %v4253_v16 = vld [vmem:[#allocation8 + $0x36c] sm:$0xf] }
 0x26a   :  { %3179 = vst [vmem:[#allocation11] sm:$0xff] %v3147_v42  ;;  %2827 = vmatmul.bf16.gmra.mxu1 %v4894_v37  ;;  %2954 = vmatpush.bf16.msrb.mxu0 %v3631_v45 }
 0x26b   :  { %2866 = vmatmul.bf16.gmra.mxu2 %v5121_v1  ;;  %3003 = vmatpush.bf16.msrb.mxu1 %v3759_v36  ;;  %v4189_v36 = vld [vmem:[#allocation8 + $0x16c] sm:$0xf] }
 0x26d   :  { %v2717_v19 = vpop.f32.mrf.mxu3 }
 0x26e   :  { %v2718_v53 = vadd.f32 %v2717_v19, %v2669_v34  ;;  %v2671_v23 = vpop.f32.mrf.mxu2 }
 0x26f   :  { %v5570_v31 = vpop.f32.mrf.mxu0  ;;  %v2672_v63 = vadd.f32 %v2671_v23, %v2623_v25 }
 0x270   :  { %v3149_v43 = vpack.c.bf16 %v2718_v53, %v5427_v15  ;;  %v5573_v60 = vpop.f32.mrf.mxu1  ;;  %v4015_v15 = vor.u32 %v4257_v57, %v4012_v24  ;;  %v4221_v57 = vld [vmem:[#allocation8 + $0x26c] sm:$0xf] }
 0x271   :  { %v4157_v24 = vld [vmem:[#allocation8 + $0x6c] sm:$0xf] }
 0x272   :  { %3181 = vst [vmem:[#allocation11 + $0x10] sm:$0xff] %v3149_v43  ;;  %2915 = vmatmul.bf16.gmra.mxu3 %v5144_v18  ;;  %v2625_v43 = vadd.f32 %v5531_v39, %v2576_v20  ;;  %v2628_v39 = vadd.f32 %v5539_v52, %v2579_v12  ;;  %v3740_v20 = vld [vmem:[#allocation8 + $0x178] sm:$0xf0]  ;;  %v2581_v52 = vadd.f32 %v5551_v9, %v5542_v62 }
 0x273   :  { %3101 = vmatpush.bf16.msrb.mxu3 %v4015_v15  ;;  %v3996_v15 = vld [vmem:[#allocation8 + $0x378] sm:$0xf0] }
 0x275   :  { %v2720_v42 = vpop.f32.mrf.mxu3 }
 0x276   :  { %v2721_v34 = vadd.f32 %v2720_v42, %v2672_v63  ;;  %v2673_v19 = vpop.f32.mrf.mxu2  ;;  %v3868_v63 = vld [vmem:[#allocation8 + $0x278] sm:$0xf0]  ;;  %v3615_v42 = vor.u32 %v4157_v24, %v3612_v55  ;;  %v5849_v55 = vld [vmem:[#allocation22_spill] sm:$0xff] }
 0x277   :  { %v5579_v26 = vpop.f32.mrf.mxu0  ;;  %v2674_v8 = vadd.f32 %v2673_v19, %v2625_v43  ;;  %v3871_v45 = vor.u32 %v4221_v57, %v3868_v63  ;;  %v3743_v19 = vor.u32 %v4189_v36, %v3740_v20  ;;  %v3724_v36 = vld [vmem:[#allocation8 + $0x158] sm:$0xf0]  ;;  %v4217_v20 = vld [vmem:[#allocation8 + $0x24c] sm:$0xf] }
 0x278   :  { %v3151_v53 = vpack.c.bf16 %v2721_v34, %v5434_v3  ;;  %v5582_v23 = vpop.f32.mrf.mxu1  ;;  %2955 = vmatpush.bf16.msrb.mxu0 %v3615_v42 }
 0x279   :  { %2783 = vmatmul.bf16.gmra.mxu0 %v4917_v30  ;;  %3053 = vmatpush.bf16.msrb.mxu2 %v3871_v45 }
 0x27a   :  { %3183 = vst [vmem:[#allocation11 + $0x20] sm:$0xff] %v3151_v53  ;;  %2832 = vmatmul.bf16.gmra.mxu1 %v5132_v27 }
 0x27b   :  { %2871 = vmatmul.bf16.gmra.mxu2 %v5178_v13  ;;  %3004 = vmatpush.bf16.msrb.mxu1 %v3743_v19  ;;  %v4249_v19 = vld [vmem:[#allocation8 + $0x34c] sm:$0xf] }
 0x27d   :  { %v2722_v25 = vpop.f32.mrf.mxu3 }
 0x27e   :  { %v2723_v38 = vadd.f32 %v2722_v25, %v2674_v8  ;;  %v2676_v61 = vpop.f32.mrf.mxu2 }
 0x27f   :  { %v5590_v28 = vpop.f32.mrf.mxu0  ;;  %v2677_v2 = vadd.f32 %v2676_v61, %v2628_v39 }
 0x280   :  { %v3153_v3 = vpack.c.bf16 %v2723_v38, %v5443_v10  ;;  %v5593_v59 = vpop.f32.mrf.mxu1  ;;  %v3999_v10 = vor.u32 %v4253_v16, %v3996_v15  ;;  %v2630_v38 = vadd.f32 %v5553_v6, %v2581_v52  ;;  %v4153_v16 = vld [vmem:[#allocation8 + $0x4c] sm:$0xf]  ;;  %v3980_v52 = vld [vmem:[#allocation8 + $0x358] sm:$0xf0] }
 0x281   :  { %v4185_v15 = vld [vmem:[#allocation8 + $0x14c] sm:$0xf] }
 0x282   :  { %3185 = vst [vmem:[#allocation11 + $0x30] sm:$0xff] %v3153_v3  ;;  %2920 = vmatmul.bf16.gmra.mxu3 %v5201_v14  ;;  %v2584_v3 = vadd.f32 %v5559_v50, %v5542_v62 }
 0x283   :  { %3102 = vmatpush.bf16.msrb.mxu3 %v3999_v10  ;;  %v3852_v10 = vld [vmem:[#allocation8 + $0x258] sm:$0xf0] }
 0x284   :  { %v2633_v6 = vadd.f32 %v5562_v5, %v2584_v3  ;;  %v3580_v5 = vld [vmem:[#allocation8 + $0x38] sm:$0xf0] }
 0x285   :  { %v2725_v34 = vpop.f32.mrf.mxu3 }
 0x286   :  { %v2726_v53 = vadd.f32 %v2725_v34, %v2677_v2  ;;  %v2678_v43 = vpop.f32.mrf.mxu2  ;;  %v3596_v2 = vld [vmem:[#allocation8 + $0x58] sm:$0xf0]  ;;  %v3727_v34 = vor.u32 %v4185_v15, %v3724_v36 }
 0x287   :  { %v5599_v8 = vpop.f32.mrf.mxu0  ;;  %v2679_v9 = vadd.f32 %v2678_v43, %v2630_v38  ;;  %v3599_v42 = vor.u32 %v4153_v16, %v3596_v2  ;;  %v3855_v43 = vor.u32 %v4217_v20, %v3852_v10  ;;  %v4149_v38 = vld [vmem:[#allocation8 + $0x2c] sm:$0xf]  ;;  %v3564_v15 = vld [vmem:[#allocation8 + $0x18] sm:$0xf0] }
 0x288   :  { %v3155_v25 = vpack.c.bf16 %v2726_v53, %v5450_v4  ;;  %v5602_v12 = vpop.f32.mrf.mxu1  ;;  %v5848_v4 = vld [vmem:[#allocation27_spill] sm:$0xff]  ;;  %3005 = vmatpush.bf16.msrb.mxu1 %v3727_v34  ;;  %v4177_v20 = vld [vmem:[#allocation8 + $0x10c] sm:$0xf] }
 0x289   :  { %2788 = vmatmul.bf16.gmra.mxu0 %v4938_v51  ;;  %3054 = vmatpush.bf16.msrb.mxu2 %v3855_v43 }
 0x28a   :  { %3187 = vst [vmem:[#allocation11 + $0x40] sm:$0xff] %v3155_v25  ;;  %2837 = vmatmul.bf16.gmra.mxu1 %v5217_v11  ;;  %2956 = vmatpush.bf16.msrb.mxu0 %v3599_v42  ;;  %v3983_v25 = vor.u32 %v4249_v19, %v3980_v52 }
 0x28b   :  { %2876 = vmatmul.bf16.gmra.mxu2 %v5233_v29 }
 0x28c   :  { %3103 = vmatpush.bf16.msrb.mxu3 %v3983_v25 }
 0x28d   :  { %v2727_v61 = vpop.f32.mrf.mxu3 }
 0x28e   :  { %v2728_v39 = vadd.f32 %v2727_v61, %v2679_v9  ;;  %v2681_v57 = vpop.f32.mrf.mxu2  ;;  %v4181_v9 = vld [vmem:[#allocation8 + $0x12c] sm:$0xf]  ;;  %v2586_v61 = vadd.f32 %v5570_v31, %v5542_v62 }
 0x28f   :  { %v5610_v63 = vpop.f32.mrf.mxu0  ;;  %v2682_v50 = vadd.f32 %v2681_v57, %v2633_v6  ;;  %v4145_v31 = vld [vmem:[#allocation8 + $0xc] sm:$0xf] }
 0x290   :  { %v3157_v45 = vpack.c.bf16 %v2728_v39, %v5848_v4  ;;  %v5613_v24 = vpop.f32.mrf.mxu1  ;;  %v3583_v4 = vor.u32 %v4149_v38, %v3580_v5  ;;  %v2635_v42 = vadd.f32 %v5573_v60, %v2586_v61  ;;  %v3567_v36 = vor.u32 %v4145_v31, %v3564_v15  ;;  %v4213_v5 = vld [vmem:[#allocation8 + $0x22c] sm:$0xf] }
 0x291   :  { %v2589_v60 = vadd.f32 %v5579_v26, %v5542_v62 }
 0x292   :  { %3189 = vst [vmem:[#allocation11 + $0x50] sm:$0xff] %v3157_v45  ;;  %2925 = vmatmul.bf16.gmra.mxu3 %v5849_v55  ;;  %v3708_v45 = vld [vmem:[#allocation8 + $0x138] sm:$0xf0]  ;;  %2957 = vmatpush.bf16.msrb.mxu0 %v3583_v4 }
 0x293   :  { %v3711_v6 = vor.u32 %v4181_v9, %v3708_v45  ;;  %v2638_v38 = vadd.f32 %v5582_v23, %v2589_v60  ;;  %v3836_v9 = vld [vmem:[#allocation8 + $0x238] sm:$0xf0]  ;;  %v4209_v60 = vld [vmem:[#allocation8 + $0x20c] sm:$0xf] }
 0x294   :  { %v3839_v61 = vor.u32 %v4213_v5, %v3836_v9 }
 0x295   :  { %v2730_v53 = vpop.f32.mrf.mxu3  ;;  %3006 = vmatpush.bf16.msrb.mxu1 %v3711_v6  ;;  %v2591_v6 = vadd.f32 %v5590_v28, %v5542_v62 }
 0x296   :  { %v2731_v3 = vadd.f32 %v2730_v53, %v2682_v50  ;;  %v2683_v39 = vpop.f32.mrf.mxu2  ;;  %v3692_v50 = vld [vmem:[#allocation8 + $0x118] sm:$0xf0]  ;;  %2958 = vmatpush.bf16.msrb.mxu0 %v3567_v36  ;;  %3055 = vmatpush.bf16.msrb.mxu2 %v3839_v61 }
 0x297   :  { %v5619_v57 = vpop.f32.mrf.mxu0  ;;  %v2684_v34 = vadd.f32 %v2683_v39, %v2635_v42  ;;  %v3964_v39 = vld [vmem:[#allocation8 + $0x338] sm:$0xf0]  ;;  %v2640_v15 = vadd.f32 %v5593_v59, %v2591_v6 }
 0x298   :  { %v3159_v16 = vpack.c.bf16 %v2731_v3, %v5466_v47  ;;  %v5622_v2 = vpop.f32.mrf.mxu1  ;;  %v3695_v47 = vor.u32 %v4177_v20, %v3692_v50  ;;  %v4245_v3 = vld [vmem:[#allocation8 + $0x32c] sm:$0xf]  ;;  %v2594_v20 = vadd.f32 %v5599_v8, %v5542_v62  ;;  %v5657_v8 = vld [vmem:[#allocation10] sm:$0xf] }
 0x299   :  { %2793 = vmatmul.bf16.gmra.mxu0 %v4969_v17  ;;  %v3967_v4 = vor.u32 %v4245_v3, %v3964_v39  ;;  %v5660_v9 = vperm.slane %v5657_v8, 2 }
 0x29a   :  { %3191 = vst [vmem:[#allocation11 + $0x60] sm:$0xff] %v3159_v16  ;;  %2842 = vmatmul.bf16.gmra.mxu1 %v5263_v40  ;;  %v2643_v59 = vadd.f32 %v5602_v12, %v2594_v20  ;;  %v2596_v12 = vadd.f32 %v5610_v63, %v5542_v62 }
 0x29b   :  { %2881 = vmatmul.bf16.gmra.mxu2 %v5277_v33  ;;  %3007 = vmatpush.bf16.msrb.mxu1 %v3695_v47 }
 0x29c   :  { %3104 = vmatpush.bf16.msrb.mxu3 %v3967_v4 }
 0x29d   :  { %v2732_v10 = vpop.f32.mrf.mxu3 }
 0x29e   :  { %v2733_v19 = vadd.f32 %v2732_v10, %v2684_v34  ;;  %v2686_v52 = vpop.f32.mrf.mxu2 }
 0x29f   :  { %v5630_v53 = vpop.f32.mrf.mxu0  ;;  %v2687_v26 = vadd.f32 %v2686_v52, %v2638_v38  ;;  %v3948_v38 = vld [vmem:[#allocation8 + $0x318] sm:$0xf0] }
 0x2a0   :  { %v3161_v43 = vpack.c.bf16 %v2733_v19, %v5475_v58  ;;  %v5633_v25 = vpop.f32.mrf.mxu1  ;;  %v3820_v19 = vld [vmem:[#allocation8 + $0x218] sm:$0xf0] }
 0x2a1   :  { %v3823_v52 = vor.u32 %v4209_v60, %v3820_v19  ;;  %v5853_v19 = vld [vmem:[#allocation24_spill] sm:$0xff] }
 0x2a2   :  { %3193 = vst [vmem:[#allocation11 + $0x70] sm:$0xff] %v3161_v43  ;;  %2930 = vmatmul.bf16.gmra.mxu3 %v5299_v49  ;;  %v4241_v43 = vld [vmem:[#allocation8 + $0x30c] sm:$0xf] }
 0x2a3   :  { %v3951_v61 = vor.u32 %v4241_v43, %v3948_v38  ;;  %3056 = vmatpush.bf16.msrb.mxu2 %v3823_v52  ;;  %v2601_v38 = vadd.f32 %v5630_v53, %v5542_v62 }
 0x2a5   :  { %v2735_v45 = vpop.f32.mrf.mxu3  ;;  %3105 = vmatpush.bf16.msrb.mxu3 %v3951_v61 }
 0x2a6   :  { %v2736_v58 = vadd.f32 %v2735_v45, %v2687_v26  ;;  %v2688_v16 = vpop.f32.mrf.mxu2 }
 0x2a7   :  { %v5639_v42 = vpop.f32.mrf.mxu0  ;;  %v2689_v36 = vadd.f32 %v2688_v16, %v2640_v15  ;;  %v5851_v15 = vld [vmem:[#allocation23_spill] sm:$0xff] }
 0x2a8   :  { %v3163_v23 = vpack.c.bf16 %v2736_v58, %v5482_v32  ;;  %v5642_v31 = vpop.f32.mrf.mxu1  ;;  %v2645_v58 = vadd.f32 %v5613_v24, %v2596_v12 }
 0x2a9   :  { %2798 = vmatmul.bf16.gmra.mxu0 %v5018_v48 }
 0x2aa   :  { %3195 = vst [vmem:[#allocation11 + $0x80] sm:$0xff] %v3163_v23  ;;  %2847 = vmatmul.bf16.gmra.mxu1 %v5319_v54  ;;  %v5850_v23 = vld [vmem:[#allocation16_spill] sm:$0xff] }
 0x2ab   :  { %2886 = vmatmul.bf16.gmra.mxu2 %v5324_v41 }
 0x2ad   :  { %v2737_v28 = vpop.f32.mrf.mxu3 }
 0x2ae   :  { %v2738_v50 = vadd.f32 %v2737_v28, %v2689_v36  ;;  %v2691_v34 = vpop.f32.mrf.mxu2  ;;  %v2599_v28 = vadd.f32 %v5619_v57, %v5542_v62 }
 0x2af   :  { %v5650_v47 = vpop.f32.mrf.mxu0  ;;  %v2692_v5 = vadd.f32 %v2691_v34, %v2643_v59  ;;  %v5852_v34 = vld [vmem:[#allocation28_spill] sm:$0xff] }
 0x2b0   :  { %v3165_v32 = vpack.c.bf16 %v2738_v50, %v5491_v44  ;;  %v5653_v10 = vpop.f32.mrf.mxu1  ;;  %v2648_v60 = vadd.f32 %v5622_v2, %v2599_v28 }
 0x2b2   :  { %3197 = vst [vmem:[#allocation11 + $0x90] sm:$0xff] %v3165_v32  ;;  %2935 = vmatmul.bf16.gmra.mxu3 %v5342_v56 }
 0x2b5   :  { %v2740_v44 = vpop.f32.mrf.mxu3 }
 0x2b6   :  { %v2741_v3 = vadd.f32 %v2740_v44, %v2692_v5  ;;  %v2693_v39 = vpop.f32.mrf.mxu2 }
 0x2b7   :  { %v2764_v26 = vpop.f32.mrf.mxu0  ;;  %v2694_v63 = vadd.f32 %v2693_v39, %v2645_v58  ;;  %v2650_v39 = vadd.f32 %v5633_v25, %v2601_v38 }
 0x2b8   :  { %v3167_v4 = vpack.c.bf16 %v2741_v3, %v5498_v35  ;;  %v2765_v45 = vadd.f32 %v2764_v26, %v5660_v9  ;;  %v2813_v6 = vpop.f32.mrf.mxu1  ;;  %v5854_v26 = vld [vmem:[#allocation17_spill] sm:$0xff] }
 0x2b9   :  { %2959 = vmatmul.bf16.vlgmr.msrb.gmra.mxu0 %v4759_v46 }
 0x2ba   :  { %3199 = vst [vmem:[#allocation11 + $0xa0] sm:$0xff] %v3167_v4  ;;  %v5667_v16 = vadd.f32 %v2813_v6, %v2765_v45  ;;  %3008 = vmatmul.bf16.vlgmr.msrb.gmra.mxu1 %v5850_v23  ;;  %v5855_v4 = vld [vmem:[#allocation25_spill] sm:$0xff]  ;;  %v2604_v6 = vadd.f32 %v5639_v42, %v5542_v62 }
 0x2bb   :  { %2891 = vmatmul.bf16.gmra.mxu2 %v5851_v15 }
 0x2bd   :  { %v2742_v36 = vpop.f32.mrf.mxu3 }
 0x2be   :  { %v2743_v35 = vadd.f32 %v2742_v36, %v2694_v63  ;;  %v2696_v20 = vpop.f32.mrf.mxu2  ;;  %v5856_v63 = vld [vmem:[#allocation29_spill] sm:$0xff] }
 0x2bf   :  { %v2766_v50 = vpop.f32.mrf.mxu0  ;;  %v2697_v52 = vadd.f32 %v2696_v20, %v2648_v60  ;;  %v5857_v20 = vld [vmem:[#allocation26_spill] sm:$0xff] }
 0x2c0   :  { %v3169_v32 = vpack.c.bf16 %v2743_v35, %v5852_v34  ;;  %v2767_v24 = vadd.f32 %v2766_v50, %v5660_v9  ;;  %v2815_v59 = vpop.f32.mrf.mxu1  ;;  %v2653_v35 = vadd.f32 %v5642_v31, %v2604_v6  ;;  %v5862_v6 = vld [vmem:[#allocation21_spill] sm:$0xff] }
 0x2c2   :  { %3201 = vst [vmem:[#allocation11 + $0xb0] sm:$0xff] %v3169_v32  ;;  %v2816_v46 = vadd.f32 %v2815_v59, %v2767_v24  ;;  %2940 = vmatmul.bf16.gmra.mxu3 %v5853_v19  ;;  %v2606_v32 = vadd.f32 %v5650_v47, %v5542_v62 }
 0x2c4   :  { %v2655_v38 = vadd.f32 %v5653_v10, %v2606_v32 }
 0x2c5   :  { %v2745_v43 = vpop.f32.mrf.mxu3 }
 0x2c6   :  { %v2746_v57 = vadd.f32 %v2745_v43, %v2697_v52  ;;  %v2698_v5 = vpop.f32.mrf.mxu2 }
 0x2c7   :  { %v2769_v61 = vpop.f32.mrf.mxu0  ;;  %v2699_v45 = vadd.f32 %v2698_v5, %v2650_v39  ;;  %v5859_v5 = vld [vmem:[#allocation19_spill] sm:$0xff]  ;;  %v5861_v39 = vld [vmem:[#allocation30_spill] sm:$0xff] }
 0x2c8   :  { %v3171_v44 = vpack.c.bf16 %v2746_v57, %v5516_v0  ;;  %v2770_v12 = vadd.f32 %v2769_v61, %v5660_v9  ;;  %v2818_v3 = vpop.f32.mrf.mxu1  ;;  %v5858_v57 = vld [vmem:[#allocation18_spill] sm:$0xff]  ;;  %v5860_v61 = vld [vmem:[#allocation20_spill] sm:$0xff] }
 0x2c9   :  { %2964 = vmatmul.bf16.gmra.mxu0 %v4810_v22 }
 0x2ca   :  { %3203 = vst [vmem:[#allocation11 + $0xc0] sm:$0xff] %v3171_v44  ;;  %v2819_v2 = vadd.f32 %v2818_v3, %v2770_v12  ;;  %3013 = vmatmul.bf16.gmra.mxu1 %v5854_v26 }
 0x2cb   :  { %2896 = vmatmul.bf16.gmra.mxu2 %v5855_v4 }
 0x2cd   :  { %v2747_v53 = vpop.f32.mrf.mxu3 }
 0x2ce   :  { %v2748_v58 = vadd.f32 %v2747_v53, %v2699_v45  ;;  %v2701_v0 = vpop.f32.mrf.mxu2 }
 0x2cf   :  { %v2771_v23 = vpop.f32.mrf.mxu0  ;;  %v2702_v50 = vadd.f32 %v2701_v0, %v2653_v35 }
 0x2d0   :  { %v3173_v36 = vpack.c.bf16 %v2748_v58, %v5856_v63  ;;  %v2772_v25 = vadd.f32 %v2771_v23, %v5660_v9  ;;  %v2820_v28 = vpop.f32.mrf.mxu1 }
 0x2d2   :  { %3205 = vst [vmem:[#allocation11 + $0xd0] sm:$0xff] %v3173_v36  ;;  %v2821_v22 = vadd.f32 %v2820_v28, %v2772_v25  ;;  %2945 = vmatmul.bf16.gmra.mxu3 %v5857_v20 }
 0x2d5   :  { %v2750_v34 = vpop.f32.mrf.mxu3 }
 0x2d6   :  { %v2751_v42 = vadd.f32 %v2750_v34, %v2702_v50  ;;  %v2703_v24 = vpop.f32.mrf.mxu2 }
 0x2d7   :  { %v2774_v59 = vpop.f32.mrf.mxu0  ;;  %v2704_v44 = vadd.f32 %v2703_v24, %v2655_v38 }
 0x2d8   :  { %v3175_v60 = vpack.c.bf16 %v2751_v42, %v5534_v21  ;;  %v2775_v52 = vadd.f32 %v2774_v59, %v5660_v9  ;;  %v2823_v43 = vpop.f32.mrf.mxu1 }
 0x2d9   :  { %2969 = vmatmul.bf16.gmra.mxu0 %v5858_v57 }
 0x2da   :  { %3207 = vst [vmem:[#allocation11 + $0xe0] sm:$0xff] %v3175_v60  ;;  %v2824_v31 = vadd.f32 %v2823_v43, %v2775_v52  ;;  %3018 = vmatmul.bf16.gmra.mxu1 %v5859_v5 }
 0x2db   :  { %3057 = vmatmul.bf16.vlgmr.msrb.gmra.mxu2 %v5860_v61 }
 0x2dd   :  { %v2752_v62 = vpop.f32.mrf.mxu3 }
 0x2de   :  { %v2753_v47 = vadd.f32 %v2752_v62, %v2704_v44  ;;  %v2862_v12 = vpop.f32.mrf.mxu2 }
 0x2df   :  { %v2863_v3 = vadd.f32 %v2862_v12, %v5667_v16  ;;  %v2776_v21 = vpop.f32.mrf.mxu0 }
 0x2e0   :  { %v3177_v26 = vpack.c.bf16 %v2753_v47, %v5861_v39  ;;  %v2777_v45 = vadd.f32 %v2776_v21, %v5660_v9  ;;  %v2825_v10 = vpop.f32.mrf.mxu1 }
 0x2e2   :  { %3209 = vst [vmem:[#allocation11 + $0xf0] sm:$0xff] %v3177_v26  ;;  %v2826_v53 = vadd.f32 %v2825_v10, %v2777_v45  ;;  %3106 = vmatmul.bf16.vlgmr.msrb.gmra.mxu3 %v5862_v6 }
 0x2e5   :  { %v2911_v58 = vpop.f32.mrf.mxu3 }
 0x2e6   :  { %v5704_v0 = vadd.f32 %v2911_v58, %v2863_v3  ;;  %v2864_v23 = vpop.f32.mrf.mxu2 }
 0x2e7   :  { %v2865_v63 = vadd.f32 %v2864_v23, %v2816_v46  ;;  %v2779_v36 = vpop.f32.mrf.mxu0 }
 0x2e8   :  { %v2780_v25 = vadd.f32 %v2779_v36, %v5660_v9  ;;  %v2828_v28 = vpop.f32.mrf.mxu1 }
 0x2e9   :  { %2974 = vmatmul.bf16.gmra.mxu0 %v4884_v7 }
 0x2ea   :  { %v2829_v16 = vadd.f32 %v2828_v28, %v2780_v25  ;;  %3023 = vmatmul.bf16.gmra.mxu1 %v4894_v37 }
 0x2eb   :  { %3062 = vmatmul.bf16.gmra.mxu2 %v5121_v1 }
 0x2ed   :  { %v2913_v35 = vpop.f32.mrf.mxu3 }
 0x2ee   :  { %v5710_v50 = vadd.f32 %v2913_v35, %v2865_v63  ;;  %v2867_v34 = vpop.f32.mrf.mxu2 }
 0x2ef   :  { %v2868_v32 = vadd.f32 %v2867_v34, %v2819_v2  ;;  %v2781_v42 = vpop.f32.mrf.mxu0 }
 0x2f0   :  { %v2782_v24 = vadd.f32 %v2781_v42, %v5660_v9  ;;  %v2830_v46 = vpop.f32.mrf.mxu1 }
 0x2f2   :  { %v2831_v59 = vadd.f32 %v2830_v46, %v2782_v24  ;;  %3111 = vmatmul.bf16.gmra.mxu3 %v5144_v18 }
 0x2f5   :  { %v2916_v60 = vpop.f32.mrf.mxu3 }
 0x2f6   :  { %v5714_v52 = vadd.f32 %v2916_v60, %v2868_v32  ;;  %v2869_v7 = vpop.f32.mrf.mxu2 }
 0x2f7   :  { %v2870_v43 = vadd.f32 %v2869_v7, %v2821_v22  ;;  %v2784_v37 = vpop.f32.mrf.mxu0 }
 0x2f8   :  { %v2785_v1 = vadd.f32 %v2784_v37, %v5660_v9  ;;  %v2833_v38 = vpop.f32.mrf.mxu1 }
 0x2f9   :  { %2979 = vmatmul.bf16.gmra.mxu0 %v4917_v30 }
 0x2fa   :  { %v2834_v57 = vadd.f32 %v2833_v38, %v2785_v1  ;;  %3028 = vmatmul.bf16.gmra.mxu1 %v5132_v27 }
 0x2fb   :  { %3067 = vmatmul.bf16.gmra.mxu2 %v5178_v13 }
 0x2fd   :  { %v2918_v2 = vpop.f32.mrf.mxu3 }
 0x2fe   :  { %v5720_v5 = vadd.f32 %v2918_v2, %v2870_v43  ;;  %v2872_v18 = vpop.f32.mrf.mxu2 }
 0x2ff   :  { %v2873_v61 = vadd.f32 %v2872_v18, %v2824_v31  ;;  %v2786_v44 = vpop.f32.mrf.mxu0 }
 0x300   :  { %v2787_v62 = vadd.f32 %v2786_v44, %v5660_v9  ;;  %v2835_v22 = vpop.f32.mrf.mxu1 }
 0x302   :  { %v2836_v47 = vadd.f32 %v2835_v22, %v2787_v62  ;;  %3116 = vmatmul.bf16.gmra.mxu3 %v5201_v14 }
 0x305   :  { %v2921_v12 = vpop.f32.mrf.mxu3 }
 0x306   :  { %v5724_v3 = vadd.f32 %v2921_v12, %v2873_v61  ;;  %v2874_v30 = vpop.f32.mrf.mxu2 }
 0x307   :  { %v2875_v21 = vadd.f32 %v2874_v30, %v2826_v53  ;;  %v2789_v27 = vpop.f32.mrf.mxu0 }
 0x308   :  { %v2790_v13 = vadd.f32 %v2789_v27, %v5660_v9  ;;  %v2838_v39 = vpop.f32.mrf.mxu1 }
 0x309   :  { %2984 = vmatmul.bf16.gmra.mxu0 %v4938_v51 }
 0x30a   :  { %v2839_v26 = vadd.f32 %v2838_v39, %v2790_v13  ;;  %3033 = vmatmul.bf16.gmra.mxu1 %v5217_v11 }
 0x30b   :  { %3072 = vmatmul.bf16.gmra.mxu2 %v5233_v29 }
 0x30d   :  { %v2923_v31 = vpop.f32.mrf.mxu3 }
 0x30e   :  { %v5730_v45 = vadd.f32 %v2923_v31, %v2875_v21  ;;  %v2877_v14 = vpop.f32.mrf.mxu2 }
 0x30f   :  { %v2878_v10 = vadd.f32 %v2877_v14, %v2829_v16  ;;  %v2791_v6 = vpop.f32.mrf.mxu0 }
 0x310   :  { %v2792_v58 = vadd.f32 %v2791_v6, %v5660_v9  ;;  %v2840_v53 = vpop.f32.mrf.mxu1 }
 0x312   :  { %v2841_v23 = vadd.f32 %v2840_v53, %v2792_v58  ;;  %3121 = vmatmul.bf16.gmra.mxu3 %v5849_v55 }
 0x315   :  { %v2926_v63 = vpop.f32.mrf.mxu3 }
 0x316   :  { %v5734_v36 = vadd.f32 %v2926_v63, %v2878_v10  ;;  %v2879_v51 = vpop.f32.mrf.mxu2 }
 0x317   :  { %v2880_v25 = vadd.f32 %v2879_v51, %v2831_v59  ;;  %v2794_v11 = vpop.f32.mrf.mxu0 }
 0x318   :  { %v2795_v29 = vadd.f32 %v2794_v11, %v5660_v9  ;;  %v2843_v28 = vpop.f32.mrf.mxu1  ;;  %v5769_v11 = vperm.slane %v5657_v8, 3 }
 0x319   :  { %2989 = vmatmul.bf16.gmra.mxu0 %v4969_v17 }
 0x31a   :  { %v2844_v35 = vadd.f32 %v2843_v28, %v2795_v29  ;;  %3038 = vmatmul.bf16.gmra.mxu1 %v5263_v40 }
 0x31b   :  { %3077 = vmatmul.bf16.gmra.mxu2 %v5277_v33 }
 0x31d   :  { %v2928_v16 = vpop.f32.mrf.mxu3 }
 0x31e   :  { %v5740_v34 = vadd.f32 %v2928_v16, %v2880_v25  ;;  %v2882_v55 = vpop.f32.mrf.mxu2 }
 0x31f   :  { %v2883_v32 = vadd.f32 %v2882_v55, %v2834_v57  ;;  %v2796_v42 = vpop.f32.mrf.mxu0 }
 0x320   :  { %v2797_v24 = vadd.f32 %v2796_v42, %v5660_v9  ;;  %v2845_v46 = vpop.f32.mrf.mxu1 }
 0x322   :  { %v2846_v59 = vadd.f32 %v2845_v46, %v2797_v24  ;;  %3126 = vmatmul.bf16.gmra.mxu3 %v5299_v49 }
 0x325   :  { %v2931_v60 = vpop.f32.mrf.mxu3 }
 0x326   :  { %v5744_v7 = vadd.f32 %v2931_v60, %v2883_v32  ;;  %v2884_v17 = vpop.f32.mrf.mxu2 }
 0x327   :  { %v2885_v43 = vadd.f32 %v2884_v17, %v2836_v47  ;;  %v2799_v40 = vpop.f32.mrf.mxu0 }
 0x328   :  { %v2800_v33 = vadd.f32 %v2799_v40, %v5660_v9  ;;  %v2848_v37 = vpop.f32.mrf.mxu1 }
 0x329   :  { %2994 = vmatmul.bf16.gmra.mxu0 %v5018_v48 }
 0x32a   :  { %v2849_v1 = vadd.f32 %v2848_v37, %v2800_v33  ;;  %3043 = vmatmul.bf16.gmra.mxu1 %v5319_v54 }
 0x32b   :  { %3082 = vmatmul.bf16.gmra.mxu2 %v5324_v41 }
 0x32d   :  { %v2933_v38 = vpop.f32.mrf.mxu3 }
 0x32e   :  { %v5750_v57 = vadd.f32 %v2933_v38, %v2885_v43  ;;  %v2887_v49 = vpop.f32.mrf.mxu2 }
 0x32f   :  { %v2888_v2 = vadd.f32 %v2887_v49, %v2839_v26  ;;  %v2801_v18 = vpop.f32.mrf.mxu0 }
 0x330   :  { %v2802_v61 = vadd.f32 %v2801_v18, %v5660_v9  ;;  %v2850_v44 = vpop.f32.mrf.mxu1 }
 0x332   :  { %v2851_v62 = vadd.f32 %v2850_v44, %v2802_v61  ;;  %3131 = vmatmul.bf16.gmra.mxu3 %v5342_v56 }
 0x335   :  { %v2936_v22 = vpop.f32.mrf.mxu3 }
 0x336   :  { %v5754_v47 = vadd.f32 %v2936_v22, %v2888_v2  ;;  %v2889_v48 = vpop.f32.mrf.mxu2 }
 0x337   :  { %v2890_v12 = vadd.f32 %v2889_v48, %v2841_v23  ;;  %v2960_v54 = vpop.f32.mrf.mxu0 }
 0x338   :  { %v3009_v9 = vpop.f32.mrf.mxu1  ;;  %v2961_v28 = vadd.f32 %v2960_v54, %v5769_v11 }
 0x33a   :  { %v3010_v32 = vadd.f32 %v3009_v9, %v2961_v28 }
 0x33b   :  { %3087 = vmatmul.bf16.gmra.mxu2 %v5851_v15 }
 0x33d   :  { %v2938_v41 = vpop.f32.mrf.mxu3 }
 0x33e   :  { %v5757_v30 = vadd.f32 %v2938_v41, %v2890_v12  ;;  %v2892_v21 = vpop.f32.mrf.mxu2 }
 0x33f   :  { %v2893_v27 = vadd.f32 %v2892_v21, %v2844_v35  ;;  %v2962_v26 = vpop.f32.mrf.mxu0 }
 0x340   :  { %v3011_v14 = vpop.f32.mrf.mxu1  ;;  %v2963_v46 = vadd.f32 %v2962_v26, %v5769_v11 }
 0x342   :  { %3136 = vmatmul.bf16.gmra.mxu3 %v5853_v19  ;;  %v3012_v8 = vadd.f32 %v3011_v14, %v2963_v46 }
 0x345   :  { %v2941_v13 = vpop.f32.mrf.mxu3 }
 0x346   :  { %v5760_v39 = vadd.f32 %v2941_v13, %v2893_v27  ;;  %v2894_v56 = vpop.f32.mrf.mxu2 }
 0x347   :  { %v2895_v31 = vadd.f32 %v2894_v56, %v2846_v59  ;;  %v2965_v53 = vpop.f32.mrf.mxu0 }
 0x348   :  { %v3014_v51 = vpop.f32.mrf.mxu1  ;;  %v2966_v37 = vadd.f32 %v2965_v53, %v5769_v11 }
 0x34a   :  { %v3015_v18 = vadd.f32 %v3014_v51, %v2966_v37 }
 0x34b   :  { %3092 = vmatmul.bf16.gmra.mxu2 %v5855_v4 }
 0x34d   :  { %v2943_v10 = vpop.f32.mrf.mxu3 }
 0x34e   :  { %v5763_v15 = vadd.f32 %v2943_v10, %v2895_v31  ;;  %v2897_v6 = vpop.f32.mrf.mxu2 }
 0x34f   :  { %v2898_v58 = vadd.f32 %v2897_v6, %v2849_v1  ;;  %v2967_v29 = vpop.f32.mrf.mxu0 }
 0x350   :  { %v3016_v55 = vpop.f32.mrf.mxu1  ;;  %v2968_v22 = vadd.f32 %v2967_v29, %v5769_v11 }
 0x352   :  { %3141 = vmatmul.bf16.gmra.mxu3 %v5857_v20  ;;  %v3017_v41 = vadd.f32 %v3016_v55, %v2968_v22 }
 0x355   :  { %v2946_v23 = vpop.f32.mrf.mxu3 }
 0x356   :  { %v5766_v19 = vadd.f32 %v2946_v23, %v2898_v58  ;;  %v2899_v63 = vpop.f32.mrf.mxu2 }
 0x357   :  { %v2900_v25 = vadd.f32 %v2899_v63, %v2851_v62  ;;  %v2970_v20 = vpop.f32.mrf.mxu0 }
 0x358   :  { %v3019_v43 = vpop.f32.mrf.mxu1  ;;  %v2971_v9 = vadd.f32 %v2970_v20, %v5769_v11 }
 0x35a   :  { %v3020_v31 = vadd.f32 %v3019_v43, %v2971_v9 }
 0x35d   :  { %v2948_v4 = vpop.f32.mrf.mxu3 }
 0x35e   :  { %v5772_v35 = vadd.f32 %v2948_v4, %v2900_v25  ;;  %v3058_v16 = vpop.f32.mrf.mxu2 }
 0x35f   :  { %v3059_v42 = vadd.f32 %v3058_v16, %v3010_v32  ;;  %v2972_v49 = vpop.f32.mrf.mxu0 }
 0x360   :  { %v3021_v44 = vpop.f32.mrf.mxu1  ;;  %v2973_v58 = vadd.f32 %v2972_v49, %v5769_v11 }
 0x362   :  { %v3022_v51 = vadd.f32 %v3021_v44, %v2973_v58 }
 0x365   :  { %v3107_v24 = vpop.f32.mrf.mxu3 }
 0x366   :  { %v3108_v59 = vadd.f32 %v3107_v24, %v3059_v42  ;;  %v3060_v60 = vpop.f32.mrf.mxu2 }
 0x367   :  { %v3061_v40 = vadd.f32 %v3060_v60, %v3012_v8  ;;  %v2975_v54 = vpop.f32.mrf.mxu0 }
 0x368   :  { %v3148_v17 = vpack.c.bf16 %v3108_v59, %v5704_v0  ;;  %v3024_v56 = vpop.f32.mrf.mxu1  ;;  %v2976_v28 = vadd.f32 %v2975_v54, %v5769_v11 }
 0x36a   :  { %3180 = vst [vmem:[#allocation11 + $0x8] sm:$0xff] %v3148_v17  ;;  %v3025_v32 = vadd.f32 %v3024_v56, %v2976_v28 }
 0x36d   :  { %v3109_v33 = vpop.f32.mrf.mxu3 }
 0x36e   :  { %v3110_v1 = vadd.f32 %v3109_v33, %v3061_v40  ;;  %v3063_v38 = vpop.f32.mrf.mxu2 }
 0x36f   :  { %v3064_v61 = vadd.f32 %v3063_v38, %v3015_v18  ;;  %v2977_v14 = vpop.f32.mrf.mxu0 }
 0x370   :  { %v3150_v2 = vpack.c.bf16 %v3110_v1, %v5710_v50  ;;  %v3026_v63 = vpop.f32.mrf.mxu1  ;;  %v2978_v46 = vadd.f32 %v2977_v14, %v5769_v11 }
 0x372   :  { %3182 = vst [vmem:[#allocation11 + $0x18] sm:$0xff] %v3150_v2  ;;  %v3027_v8 = vadd.f32 %v3026_v63, %v2978_v46 }
 0x375   :  { %v3112_v62 = vpop.f32.mrf.mxu3 }
 0x376   :  { %v3113_v0 = vadd.f32 %v3112_v62, %v3064_v61  ;;  %v3065_v48 = vpop.f32.mrf.mxu2 }
 0x377   :  { %v3066_v21 = vadd.f32 %v3065_v48, %v3017_v41  ;;  %v2980_v29 = vpop.f32.mrf.mxu0 }
 0x378   :  { %v3152_v12 = vpack.c.bf16 %v3113_v0, %v5714_v52  ;;  %v3029_v42 = vpop.f32.mrf.mxu1  ;;  %v2981_v37 = vadd.f32 %v2980_v29, %v5769_v11 }
 0x37a   :  { %3184 = vst [vmem:[#allocation11 + $0x28] sm:$0xff] %v3152_v12  ;;  %v3030_v2 = vadd.f32 %v3029_v42, %v2981_v37 }
 0x37d   :  { %v3114_v27 = vpop.f32.mrf.mxu3 }
 0x37e   :  { %v3115_v13 = vadd.f32 %v3114_v27, %v3066_v21  ;;  %v3068_v50 = vpop.f32.mrf.mxu2 }
 0x37f   :  { %v3069_v10 = vadd.f32 %v3068_v50, %v3020_v31  ;;  %v2982_v60 = vpop.f32.mrf.mxu0 }
 0x380   :  { %v3154_v26 = vpack.c.bf16 %v3115_v13, %v5720_v5  ;;  %v3031_v40 = vpop.f32.mrf.mxu1  ;;  %v2983_v44 = vadd.f32 %v2982_v60, %v5769_v11 }
 0x382   :  { %3186 = vst [vmem:[#allocation11 + $0x38] sm:$0xff] %v3154_v26  ;;  %v3032_v48 = vadd.f32 %v3031_v40, %v2983_v44 }
 0x385   :  { %v3117_v6 = vpop.f32.mrf.mxu3 }
 0x386   :  { %v3118_v52 = vadd.f32 %v3117_v6, %v3069_v10  ;;  %v3070_v53 = vpop.f32.mrf.mxu2 }
 0x387   :  { %v3071_v25 = vadd.f32 %v3070_v53, %v3022_v51  ;;  %v2985_v49 = vpop.f32.mrf.mxu0 }
 0x388   :  { %v3156_v23 = vpack.c.bf16 %v3118_v52, %v5724_v3  ;;  %v3034_v22 = vpop.f32.mrf.mxu1  ;;  %v2986_v21 = vadd.f32 %v2985_v49, %v5769_v11 }
 0x38a   :  { %3188 = vst [vmem:[#allocation11 + $0x48] sm:$0xff] %v3156_v23  ;;  %v3035_v50 = vadd.f32 %v3034_v22, %v2986_v21 }
 0x38d   :  { %v3119_v4 = vpop.f32.mrf.mxu3 }
 0x38e   :  { %v3120_v5 = vadd.f32 %v3119_v4, %v3071_v25  ;;  %v3073_v16 = vpop.f32.mrf.mxu2 }
 0x38f   :  { %v3074_v20 = vadd.f32 %v3073_v16, %v3025_v32  ;;  %v2987_v12 = vpop.f32.mrf.mxu0 }
 0x390   :  { %v3158_v55 = vpack.c.bf16 %v3120_v5, %v5730_v45  ;;  %v3036_v13 = vpop.f32.mrf.mxu1  ;;  %v2988_v14 = vadd.f32 %v2987_v12, %v5769_v11 }
 0x392   :  { %3190 = vst [vmem:[#allocation11 + $0x58] sm:$0xff] %v3158_v55  ;;  %v3037_v58 = vadd.f32 %v3036_v13, %v2988_v14 }
 0x395   :  { %v3122_v24 = vpop.f32.mrf.mxu3 }
 0x396   :  { %v3123_v3 = vadd.f32 %v3122_v24, %v3074_v20  ;;  %v3075_v59 = vpop.f32.mrf.mxu2 }
 0x397   :  { %v3076_v43 = vadd.f32 %v3075_v59, %v3027_v8  ;;  %v2990_v26 = vpop.f32.mrf.mxu0 }
 0x398   :  { %v3160_v17 = vpack.c.bf16 %v3123_v3, %v5734_v36  ;;  %v3039_v52 = vpop.f32.mrf.mxu1  ;;  %v2991_v63 = vadd.f32 %v2990_v26, %v5769_v11 }
 0x39a   :  { %3192 = vst [vmem:[#allocation11 + $0x68] sm:$0xff] %v3160_v17  ;;  %v3040_v4 = vadd.f32 %v3039_v52, %v2991_v63 }
 0x39d   :  { %v3124_v33 = vpop.f32.mrf.mxu3 }
 0x39e   :  { %v3125_v45 = vadd.f32 %v3124_v33, %v3076_v43  ;;  %v3078_v1 = vpop.f32.mrf.mxu2 }
 0x39f   :  { %v3079_v18 = vadd.f32 %v3078_v1, %v3030_v2  ;;  %v2992_v25 = vpop.f32.mrf.mxu0 }
 0x3a0   :  { %v3162_v38 = vpack.c.bf16 %v3125_v45, %v5740_v34  ;;  %v3041_v5 = vpop.f32.mrf.mxu1  ;;  %v2993_v55 = vadd.f32 %v2992_v25, %v5769_v11 }
 0x3a2   :  { %3194 = vst [vmem:[#allocation11 + $0x78] sm:$0xff] %v3162_v38  ;;  %v3042_v24 = vadd.f32 %v3041_v5, %v2993_v55 }
 0x3a5   :  { %v3127_v61 = vpop.f32.mrf.mxu3 }
 0x3a6   :  { %v3128_v62 = vadd.f32 %v3127_v61, %v3079_v18  ;;  %v3080_v36 = vpop.f32.mrf.mxu2 }
 0x3a7   :  { %v3081_v54 = vadd.f32 %v3080_v36, %v3032_v48  ;;  %v2995_v20 = vpop.f32.mrf.mxu0 }
 0x3a8   :  { %v3164_v0 = vpack.c.bf16 %v3128_v62, %v5744_v7  ;;  %v2996_v59 = vadd.f32 %v2995_v20, %v5769_v11 }
 0x3aa   :  { %3196 = vst [vmem:[#allocation11 + $0x88] sm:$0xff] %v3164_v0 }
 0x3ad   :  { %v3129_v41 = vpop.f32.mrf.mxu3 }
 0x3ae   :  { %v3130_v34 = vadd.f32 %v3129_v41, %v3081_v54  ;;  %v3083_v27 = vpop.f32.mrf.mxu2 }
 0x3af   :  { %v3084_v56 = vadd.f32 %v3083_v27, %v3035_v50  ;;  %v2997_v40 = vpop.f32.mrf.mxu0 }
 0x3b0   :  { %v3166_v9 = vpack.c.bf16 %v3130_v34, %v5750_v57  ;;  %v2998_v45 = vadd.f32 %v2997_v40, %v5769_v11 }
 0x3b2   :  { %3198 = vst [vmem:[#allocation11 + $0x98] sm:$0xff] %v3166_v9 }
 0x3b5   :  { %v3132_v31 = vpop.f32.mrf.mxu3 }
 0x3b6   :  { %v3133_v7 = vadd.f32 %v3132_v31, %v3084_v56  ;;  %v3085_v10 = vpop.f32.mrf.mxu2 }
 0x3b7   :  { %v3086_v53 = vadd.f32 %v3085_v10, %v3037_v58 }
 0x3b8   :  { %v3168_v6 = vpack.c.bf16 %v3133_v7, %v5754_v47 }
 0x3ba   :  { %3200 = vst [vmem:[#allocation11 + $0xa8] sm:$0xff] %v3168_v6 }
 0x3bd   :  { %v3134_v23 = vpop.f32.mrf.mxu3 }
 0x3be   :  { %v3135_v57 = vadd.f32 %v3134_v23, %v3086_v53  ;;  %v3088_v51 = vpop.f32.mrf.mxu2 }
 0x3bf   :  { %v3089_v28 = vadd.f32 %v3088_v51, %v3040_v4 }
 0x3c0   :  { %v3170_v29 = vpack.c.bf16 %v3135_v57, %v5757_v30  ;;  %v3044_v30 = vpop.f32.mrf.mxu1 }
 0x3c1   :  { %v3045_v43 = vadd.f32 %v3044_v30, %v2996_v59 }
 0x3c2   :  { %3202 = vst [vmem:[#allocation11 + $0xb8] sm:$0xff] %v3170_v29 }
 0x3c5   :  { %v3137_v16 = vpop.f32.mrf.mxu3 }
 0x3c6   :  { %v3138_v47 = vadd.f32 %v3137_v16, %v3089_v28  ;;  %v3090_v32 = vpop.f32.mrf.mxu2 }
 0x3c7   :  { %v3091_v46 = vadd.f32 %v3090_v32, %v3042_v24 }
 0x3c8   :  { %v3172_v42 = vpack.c.bf16 %v3138_v47, %v5760_v39  ;;  %v3046_v38 = vpop.f32.mrf.mxu1 }
 0x3c9   :  { %v3047_v2 = vadd.f32 %v3046_v38, %v2998_v45 }
 0x3ca   :  { %3204 = vst [vmem:[#allocation11 + $0xc8] sm:$0xff] %v3172_v42 }
 0x3cd   :  { %v3139_v3 = vpop.f32.mrf.mxu3 }
 0x3ce   :  { %v3140_v60 = vadd.f32 %v3139_v3, %v3091_v46  ;;  %v3093_v17 = vpop.f32.mrf.mxu2 }
 0x3cf   :  { %v3094_v33 = vadd.f32 %v3093_v17, %v3045_v43 }
 0x3d0   :  { %v3174_v8 = vpack.c.bf16 %v3140_v60, %v5763_v15 }
 0x3d2   :  { %3206 = vst [vmem:[#allocation11 + $0xd8] sm:$0xff] %v3174_v8 }
 0x3d5   :  { %v3142_v37 = vpop.f32.mrf.mxu3 }
 0x3d6   :  { %v3143_v39 = vadd.f32 %v3142_v37, %v3094_v33  ;;  %v3095_v49 = vpop.f32.mrf.mxu2 }
 0x3d7   :  { %v3096_v18 = vadd.f32 %v3095_v49, %v3047_v2 }
 0x3d8   :  { %v3176_v1 = vpack.c.bf16 %v3143_v39, %v5766_v19 }
 0x3da   :  { %3208 = vst [vmem:[#allocation11 + $0xe8] sm:$0xff] %v3176_v1 }
 0x3dd   :  { %v3144_v61 = vpop.f32.mrf.mxu3 }
 0x3de   :  { %v3145_v15 = vadd.f32 %v3144_v61, %v3096_v18 }
 0x3e0   :  { %v3178_v44 = vpack.c.bf16 %v3145_v15, %v5772_v35 }
 0x3e2   :  { %3210 = vst [vmem:[#allocation11 + $0xf8] sm:$0xff] %v3178_v44 }
 0x3e3   :  { %3223 = dma.vmem_to_hbm [thread:$0]  %s3216_s4, 4096, %s3218_s21, [#allocation4], %s4565_s26, %s4565_s26, %s4566_s27  }
 0x3e4   :  { %4562 = dma.done.wait [#allocation4], 4096  }
 0x3e5   :  { %4563 = vsyncadd [#allocation4], 4294963200 }
 0x3e6   :  { %3228 = vsyncpa [#allocation3], 1 }
 0x3e7   :  { %3229 = vsyncpa [#allocation6], 1 }
 0x3e8   :  { %3230 = vsyncpa [#allocation9], 1 }
 0x3e9   :  { %3231 = vsyncpa [#allocation4], 1 }

</bundles_post_ra>
